<compile_context>
chip_gen: v5e
topology: v5e:2x2
jax: 0.10.0
libtpu: 0.0.40
codegen_flags: <defaults>
</compile_context>

<pallas_src>
import functools

import jax
import jax.numpy as jnp
from jax.experimental import pallas as pl
from jax.experimental.pallas import tpu as pltpu


EDGE_TYPES = [('cons', 'vals'), ('vals', 'cons'), ('vals', 'obj'),
              ('obj', 'vals'), ('cons', 'obj'), ('obj', 'cons')]

NODE_ORDER = ('cons', 'vals', 'obj')      # row-stack / fused-source order
DST_ORDER = ('vals', 'cons', 'obj')       # destination order
# HeteroConv aggr='cat': per destination, concat conv outputs in module order.
DST_SOURCES = {
    'vals': (('cons', 'vals'), ('obj', 'vals')),
    'cons': (('vals', 'cons'), ('obj', 'cons')),
    'obj':  (('vals', 'obj'), ('cons', 'obj')),
}
# Per source node type: its two outgoing edges as (dst, slot index at dst).
SRC_OUT = {
    'cons': (('vals', 0), ('obj', 1)),
    'vals': (('cons', 0), ('obj', 0)),
    'obj':  (('vals', 1), ('cons', 1)),
}


def _build_dst_msg_cols():
    """For each destination, which column block of the fused per-source output
    holds the (slot-padded) message for that destination, in slot order."""
    cols = {}
    for dname, srcs in DST_SOURCES.items():
        entries = []
        for (src, _dst) in srcs:
            j = next(k for k, (dd, _s) in enumerate(SRC_OUT[src]) if dd == dname)
            entries.append((src, j))
        cols[dname] = tuple(entries)
    return cols


DST_MSG_COLS = _build_dst_msg_cols()

OUT_PAD = 128   # lane-dense padded output width; sliced to ipm_steps outside


# ---------------------------------------------------------------------------
# The single fused Pallas kernel
# ---------------------------------------------------------------------------

def _gnn_kernel(
    # block-diagonal row-stacked raw features [n_total, 3*in]
    x_bd_ref,
    # fused encoder weights (block-diag W1, row-stacked W2, per-row biases)
    ew1_ref, eb1_ref, ew2_ref, eb2_ref,
    # per-destination column-concatenated mean adjacencies (bf16)
    a_v_ref, a_c_ref, a_o_ref,
    # mean edge attr per destination node; 2 cols = the 2 incoming edge types
    ea_v_ref, ea_c_ref, ea_o_ref,
    # conv weights
    wcat_ref,  # [L*3, 2h, 6h]  fused per-source [msg0 | msg1 | root] (bf16)
    we_ref,    # [L*6, 2h]      slot-padded edge weights (f32)
    bc_ref,    # [L*3, 2h]      concatenated biases (f32)
    # packed prediction heads (vals, cons)
    pvw1_ref, pvb1_ref, pvw2_ref, pvb2_ref,
    pcw1_ref, pcb1_ref, pcw2_ref, pcb2_ref,
    # outputs (lane-padded to OUT_PAD columns)
    out_vals_ref, out_cons_ref,
    *, num_layers, ipm_steps, use_res, hid_dim, n_cons, n_vals, n_obj):

    two_h = 2 * hid_dim

    def mm(a, b):
        # bf16 MXU inputs, f32 accumulation; epilogues stay f32.
        return jnp.dot(a.astype(jnp.bfloat16), b.astype(jnp.bfloat16),
                       preferred_element_type=jnp.float32)

    # ---- row-stacked fused encoders: 2 matmuls for all 3 node types --------
    h1 = jnp.maximum(mm(x_bd_ref[...], ew1_ref[...]) + eb1_ref[...], 0.0)
    x_all = mm(h1, ew2_ref[...]) + eb2_ref[...]
    # row splits are sublane-aligned (counts are multiples of 8) -> free.
    x = {'cons': x_all[0:n_cons],
         'vals': x_all[n_cons:n_cons + n_vals],
         'obj':  x_all[n_cons + n_vals:n_cons + n_vals + n_obj]}

    a_cat = {'vals': a_v_ref[...], 'cons': a_c_ref[...], 'obj': a_o_ref[...]}
    ea = {'vals': ea_v_ref[...], 'cons': ea_c_ref[...], 'obj': ea_o_ref[...]}

    # ---- hoisted per-(layer, dst) additive term: edge-attr term (VPU
    # broadcast multiply, not a K=1 MXU matmul) + bias; constant over ipm ----
    edge_bias = {}
    for li in range(num_layers):
        for d, dname in enumerate(DST_ORDER):
            base = li * 3 + d
            f = 2 * base
            edge_bias[(li, dname)] = (ea[dname][:, 0:1] * we_ref[f:f + 1, :]
                                      + ea[dname][:, 1:2] * we_ref[f + 1:f + 2, :]
                                      + bc_ref[base:base + 1, :])

    # ---- streamed prediction-head first-layer accumulators -----------------
    s_tot = ipm_steps * hid_dim
    pv_acc = jnp.zeros((n_vals, s_tot), jnp.float32)
    pc_acc = jnp.zeros((n_cons, s_tot), jnp.float32)

    # ---- ipm_steps x num_layers hetero-conv loop (statically unrolled) -----
    for step in range(ipm_steps):
        h2 = None
        for li in range(num_layers):
            # ONE fused x[src] @ [msg->dst0 | msg->dst1 | root] per source.
            y = {}
            for s_idx, s in enumerate(NODE_ORDER):
                y[s] = mm(x[s], wcat_ref[li * 3 + s_idx])
            h2 = {}
            for dname in DST_ORDER:
                # slot-padded msg weights: each conv already lands in its own
                # column half of the [n_dst, 2h] tile ('cat' aggregation
                # without an in-kernel lane concat).
                msgs = [y[src][:, j * two_h:(j + 1) * two_h]
                        for src, j in DST_MSG_COLS[dname]]
                # ONE A_cat @ [msg0; msg1] per destination (sublane concat).
                agg = mm(a_cat[dname], jnp.concatenate(msgs, axis=0))
                root = y[dname][:, 2 * two_h:3 * two_h]
                h2[dname] = agg + root + edge_bias[(li, dname)]
            if use_res:
                x = {k: (jnp.maximum(h2[k], 0.0) + x[k]) * 0.5 for k in h2}
            else:
                x = {k: jnp.maximum(h2[k], 0.0) for k in h2}
            # dropout: no-op (eval mode)

        # Streamed pred first layer: slot-padded weights/biases -> the other
        # slots stay exactly zero after relu, so a running sum equals 'cat'.
        pv_acc = pv_acc + jnp.maximum(
            mm(h2['vals'], pvw1_ref[step]) + pvb1_ref[step:step + 1, :], 0.0)
        pc_acc = pc_acc + jnp.maximum(
            mm(h2['cons'], pcw1_ref[step]) + pcb1_ref[step:step + 1, :], 0.0)

    # ---- block-diagonal, lane-padded final pred layer: lane-dense stores ---
    out_vals_ref[...] = jnp.maximum(mm(pv_acc, pvw2_ref[...]) + pvb2_ref[...],
                                    0.0)
    out_cons_ref[...] = mm(pc_acc, pcw2_ref[...]) + pcb2_ref[...]


# ---------------------------------------------------------------------------
# Wrapper
# ---------------------------------------------------------------------------

def forward(packed, x_cons, x_vals, x_obj, *, ipm_steps, num_layers, hid_dim,
            use_res=True):
    """Single gridless pallas_call; all operands VMEM-resident (toy sizes)."""
    n_cons, n_vals, n_obj = x_cons.shape[0], x_vals.shape[0], x_obj.shape[0]
    in_shape = x_cons.shape[1]
    n_total = n_cons + n_vals + n_obj
    two_h = 2 * hid_dim

    # Block-diagonal row-stacked raw features (layout plumbing only).
    def bd(xarr, t):
        return jnp.concatenate(
            [jnp.zeros((xarr.shape[0], t * in_shape), jnp.float32), xarr,
             jnp.zeros((xarr.shape[0], (2 - t) * in_shape), jnp.float32)],
            axis=1)

    x_bd = jnp.concatenate([bd(x_cons, 0), bd(x_vals, 1), bd(x_obj, 2)], axis=0)

    operands = (
        x_bd,
        packed['enc_w1'], packed['enc_b1'], packed['enc_w2'], packed['enc_b2'],
        packed['a_vals'], packed['a_cons'], packed['a_obj'],
        packed['ea_vals'], packed['ea_cons'], packed['ea_obj'],
        packed['conv_wcat'], packed['conv_we'], packed['conv_b'],
        packed['pv_w1'], packed['pv_b1'], packed['pv_w2'], packed['pv_b2'],
        packed['pc_w1'], packed['pc_b1'], packed['pc_w2'], packed['pc_b2'],
    )

    # Advisory cost estimate so XLA schedules around the fused call sensibly.
    flops = (2 * n_total * (3 * in_shape) * (3 * hid_dim)
             + 2 * n_total * (3 * hid_dim) * two_h)
    per_layer = (2 * n_total * two_h * (3 * two_h)
                 + 2 * two_h * (n_vals * (n_cons + n_obj)
                                + n_cons * (n_vals + n_obj)
                                + n_obj * (n_vals + n_cons)))
    flops += ipm_steps * num_layers * per_layer
    flops += ipm_steps * 2 * (n_vals + n_cons) * two_h * (ipm_steps * hid_dim)
    flops += 2 * (n_vals + n_cons) * (ipm_steps * hid_dim) * OUT_PAD
    bytes_accessed = (sum(int(a.size) * a.dtype.itemsize for a in operands)
                      + (n_vals + n_cons) * OUT_PAD * 4)

    kernel = functools.partial(
        _gnn_kernel, num_layers=num_layers, ipm_steps=ipm_steps,
        use_res=use_res, hid_dim=hid_dim,
        n_cons=n_cons, n_vals=n_vals, n_obj=n_obj)

    vals_pad, cons_pad = pl.pallas_call(
        kernel,
        out_shape=(jax.ShapeDtypeStruct((n_vals, OUT_PAD), jnp.float32),
                   jax.ShapeDtypeStruct((n_cons, OUT_PAD), jnp.float32)),
        in_specs=[pl.BlockSpec(memory_space=pltpu.MemorySpace.VMEM)
                  for _ in operands],
        out_specs=(pl.BlockSpec(memory_space=pltpu.MemorySpace.VMEM),
                   pl.BlockSpec(memory_space=pltpu.MemorySpace.VMEM)),
        compiler_params=pltpu.CompilerParams(
            vmem_limit_bytes=64 * 1024 * 1024),
        cost_estimate=pl.CostEstimate(flops=flops, transcendentals=0,
                                      bytes_accessed=bytes_accessed),
    )(*operands)

    # Lane-dense [n, 128] slabs stored in-kernel; slice to ipm_steps here.
    return vals_pad[:, :ipm_steps], cons_pad[:, :ipm_steps]


# ---------------------------------------------------------------------------
# Parameter construction (deterministic) and host-side weight packing
# ---------------------------------------------------------------------------

def _glorot(key, shape):
    fan_in, fan_out = shape
    lim = jnp.sqrt(6.0 / (fan_in + fan_out))
    return jax.random.uniform(key, shape, jnp.float32, -lim, lim)


def _mlp_params(key, dims):
    layers = []
    for i in range(len(dims) - 1):
        key, kw, kb = jax.random.split(key, 3)
        w = _glorot(kw, (dims[i], dims[i + 1]))
        b = 0.01 * jax.random.normal(kb, (dims[i + 1],), jnp.float32)
        layers.append((w, b))
    return layers


def init_params(key, in_shape, hid_dim, num_conv_layers, num_pred_layers,
                ipm_steps):
    in_emb_dim = 2 * hid_dim  # pe_dim == 0
    params = {'encoder': {}, 'gcns': [], 'pred_vals': [], 'pred_cons': []}
    for k in NODE_ORDER:
        key, sub = jax.random.split(key)
        params['encoder'][k] = _mlp_params(sub, [in_shape, hid_dim, in_emb_dim])
    for _ in range(num_conv_layers):
        layer = {}
        for et in EDGE_TYPES:
            key, k1, k2, k3, k4 = jax.random.split(key, 5)
            layer[et] = (
                _glorot(k1, (2 * hid_dim, hid_dim)),       # W_msg
                _glorot(k2, (1, hid_dim)),                 # W_edge
                _glorot(k3, (2 * hid_dim, hid_dim)),       # W_root
                0.01 * jax.random.normal(k4, (hid_dim,)),  # bias
            )
        params['gcns'].append(layer)
    pred_dims = [2 * hid_dim] + [hid_dim] * (num_pred_layers - 1) + [1]
    for _ in range(ipm_steps):
        key, kv, kc = jax.random.split(key, 3)
        params['pred_vals'].append(_mlp_params(kv, pred_dims))
        params['pred_cons'].append(_mlp_params(kc, pred_dims))
    return params


def dense_graph(edge_index, edge_attr, n_src, n_dst):
    """Mean-normalized dense adjacency + mean edge attribute per dst node."""
    src, dst = edge_index[0], edge_index[1]
    adj = jnp.zeros((n_dst, n_src), jnp.float32).at[dst, src].add(1.0)
    ea_sum = jnp.zeros((n_dst, 1), jnp.float32).at[dst].add(edge_attr)
    deg = jnp.clip(adj.sum(axis=1, keepdims=True), 1.0, None)
    return adj / deg, ea_sum / deg


def pack_params(params, graphs, *, in_shape, hid_dim, num_layers, ipm_steps,
                n_nodes):
    """Host-side packing: fuse / slot-pad weights into lane-dense bf16 tiles."""
    two_h = 2 * hid_dim
    bf16 = jnp.bfloat16
    packed = {}
    n_total = sum(n_nodes[k] for k in NODE_ORDER)

    # Encoders: block-diag W1 (per-type input blocks), row-stacked W2,
    # per-row biases -> 3 MLPs become 2 fused matmuls in-kernel.
    w1_bd = jnp.zeros((3 * in_shape, 3 * hid_dim), jnp.float32)
    w2_stk = jnp.zeros((3 * hid_dim, two_h), jnp.float32)
    b1_full = jnp.zeros((n_total, 3 * hid_dim), jnp.float32)
    b2_full = jnp.zeros((n_total, two_h), jnp.float32)
    row = 0
    for t, k in enumerate(NODE_ORDER):
        (w1, b1), (w2, b2) = params['encoder'][k]
        n_k = n_nodes[k]
        w1_bd = w1_bd.at[t * in_shape:(t + 1) * in_shape,
                         t * hid_dim:(t + 1) * hid_dim].set(w1)
        w2_stk = w2_stk.at[t * hid_dim:(t + 1) * hid_dim, :].set(w2)
        b1_full = b1_full.at[row:row + n_k,
                             t * hid_dim:(t + 1) * hid_dim].set(
            jnp.broadcast_to(b1, (n_k, hid_dim)))
        b2_full = b2_full.at[row:row + n_k, :].set(
            jnp.broadcast_to(b2, (n_k, two_h)))
        row += n_k
    packed['enc_w1'] = w1_bd.astype(bf16)
    packed['enc_b1'] = b1_full
    packed['enc_w2'] = w2_stk.astype(bf16)
    packed['enc_b2'] = b2_full

    # Conv: per (layer, source) N-concatenated weight
    # [slot-padded W_msg(->dst0) | slot-padded W_msg(->dst1) | W_root cat].
    # (N = 192: multiple of 64; on v5e, 128-aligned N would avoid a half-empty
    #  second MXU pass — irrelevant at these sizes.)
    wcat_list = []
    for li in range(num_layers):
        layer = params['gcns'][li]
        for s in NODE_ORDER:
            cols = []
            for (dname, slot) in SRC_OUT[s]:
                wm = layer[(s, dname)][0]
                wm_pad = jnp.zeros((two_h, two_h), jnp.float32)
                wm_pad = wm_pad.at[:, slot * hid_dim:(slot + 1) * hid_dim].set(wm)
                cols.append(wm_pad)
            wr_cat = jnp.concatenate([layer[et][2] for et in DST_SOURCES[s]],
                                     axis=1)
            cols.append(wr_cat)
            wcat_list.append(jnp.concatenate(cols, axis=1))
    packed['conv_wcat'] = jnp.stack(wcat_list).astype(bf16)  # [L*3, 2h, 6h]

    # Per (layer, dst): slot-padded edge weights + concatenated biases (f32).
    we_list, b_list = [], []
    for li in range(num_layers):
        layer = params['gcns'][li]
        for dname in DST_ORDER:
            b_cat = []
            for slot, et in enumerate(DST_SOURCES[dname]):
                _, we, _, b = layer[et]
                we_pad = jnp.zeros((two_h,), jnp.float32)
                we_pad = we_pad.at[slot * hid_dim:(slot + 1) * hid_dim].set(we[0])
                we_list.append(we_pad)
                b_cat.append(b)
            b_list.append(jnp.concatenate(b_cat, axis=0))
    packed['conv_we'] = jnp.stack(we_list)   # [L*6, 2h]
    packed['conv_b'] = jnp.stack(b_list)     # [L*3, 2h]

    # Prediction heads, batched over ipm steps; final layer lane-padded.
    # TODO(synk): generalize fused pred packing to num_pred_layers > 2.
    def pack_pred(plist):
        assert all(len(p) == 2 for p in plist)
        s_tot = ipm_steps * hid_dim
        w1p = jnp.zeros((ipm_steps, two_h, s_tot), jnp.float32)
        b1p = jnp.zeros((ipm_steps, s_tot), jnp.float32)
        w2p = jnp.zeros((s_tot, OUT_PAD), jnp.float32)
        b2p = jnp.zeros((1, OUT_PAD), jnp.float32)
        for i in range(ipm_steps):
            (w1, b1), (w2, b2) = plist[i]
            w1p = w1p.at[i, :, i * hid_dim:(i + 1) * hid_dim].set(w1)
            b1p = b1p.at[i, i * hid_dim:(i + 1) * hid_dim].set(b1)
            w2p = w2p.at[i * hid_dim:(i + 1) * hid_dim, i].set(w2[:, 0])
            b2p = b2p.at[0, i].set(b2[0])
        return w1p.astype(bf16), b1p, w2p.astype(bf16), b2p

    (packed['pv_w1'], packed['pv_b1'],
     packed['pv_w2'], packed['pv_b2']) = pack_pred(params['pred_vals'])
    (packed['pc_w1'], packed['pc_b1'],
     packed['pc_w2'], packed['pc_b2']) = pack_pred(params['pred_cons'])

    # Graph structure: per-destination column-concatenated adjacencies (bf16
    # MXU operands) + per-destination mean edge attrs (f32, tiny).
    adj = {et: graphs[et][0] for et in EDGE_TYPES}
    ea = {et: graphs[et][1] for et in EDGE_TYPES}
    for dname in DST_ORDER:
        e0, e1 = DST_SOURCES[dname]
        packed['a_' + dname] = jnp.concatenate([adj[e0], adj[e1]],
                                               axis=1).astype(bf16)
        packed['ea_' + dname] = jnp.concatenate([ea[e0], ea[e1]], axis=1)
    return packed


# ---------------------------------------------------------------------------
# Plain-JAX reference (unpacked params, f32 HIGHEST) for correctness check
# ---------------------------------------------------------------------------

def reference_forward(params, x_dict, graphs, *, ipm_steps, num_layers,
                      use_res=True):
    hp = jax.lax.Precision.HIGHEST

    def lin(x, w, b, relu=False):
        y = jnp.dot(x, w, precision=hp) + b
        return jnp.maximum(y, 0.0) if relu else y

    x = {}
    for k in NODE_ORDER:
        (w1, b1), (w2, b2) = params['encoder'][k]
        x[k] = lin(lin(x_dict[k], w1, b1, True), w2, b2)

    hiddens = []
    for _ in range(ipm_steps):
        h2 = None
        for li in range(num_layers):
            conv = params['gcns'][li]
            h2 = {}
            for dst, srcs in DST_SOURCES.items():
                outs = []
                for et in srcs:
                    a, ea = graphs[et]
                    wm, we, wr, b = conv[et]
                    outs.append(jnp.dot(a, jnp.dot(x[et[0]], wm, precision=hp),
                                        precision=hp)
                                + ea * we
                                + jnp.dot(x[dst], wr, precision=hp) + b)
                h2[dst] = jnp.concatenate(outs, axis=1)
            if use_res:
                x = {k: (jnp.maximum(h2[k], 0.0) + x[k]) * 0.5 for k in h2}
            else:
                x = {k: jnp.maximum(h2[k], 0.0) for k in h2}
        hiddens.append((h2['cons'], h2['vals']))

    vcols, ccols = [], []
    for i, (c, v) in enumerate(hiddens):
        (w1, b1), (w2, b2) = params['pred_vals'][i]
        vcols.append(lin(lin(v, w1, b1, True), w2, b2))
        (w1, b1), (w2, b2) = params['pred_cons'][i]
        ccols.append(lin(lin(c, w1, b1, True), w2, b2))
    vals = jnp.maximum(jnp.concatenate(vcols, axis=1), 0.0)
    cons = jnp.concatenate(ccols, axis=1)
    return vals, cons


# ---------------------------------------------------------------------------
# Driver
# ---------------------------------------------------------------------------

if __name__ == "__main__":
    in_shape = 16
    hid_dim = 32
    ipm_steps = 2
    num_conv_layers = 2
    num_pred_layers = 2

    n_nodes = {'cons': 24, 'vals': 40, 'obj': 8}
    n_edges = {('cons', 'vals'): 96, ('vals', 'cons'): 96,
               ('vals', 'obj'): 48, ('obj', 'vals'): 48,
               ('cons', 'obj'): 32, ('obj', 'cons'): 32}

    key = jax.random.PRNGKey(0)

    # node features
    x_dict = {}
    for k in NODE_ORDER:
        key, sub = jax.random.split(key)
        x_dict[k] = jax.random.normal(sub, (n_nodes[k], in_shape), jnp.float32)

    # edges -> dense mean-adjacency + mean edge attribute
    graphs = {}
    for (s, d), e in n_edges.items():
        key, ks, kd, ka = jax.random.split(key, 4)
        src = jax.random.randint(ks, (e,), 0, n_nodes[s])
        dst = jax.random.randint(kd, (e,), 0, n_nodes[d])
        edge_index = jnp.stack([src, dst], axis=0)
        edge_attr = jax.random.normal(ka, (e, 1), jnp.float32)
        graphs[(s, d)] = dense_graph(edge_index, edge_attr,
                                     n_nodes[s], n_nodes[d])

    key, pkey = jax.random.split(key)
    params = init_params(pkey, in_shape, hid_dim, num_conv_layers,
                         num_pred_layers, ipm_steps)
    packed = pack_params(params, graphs, in_shape=in_shape, hid_dim=hid_dim,
                         num_layers=num_conv_layers, ipm_steps=ipm_steps,
                         n_nodes=n_nodes)

    fwd = jax.jit(functools.partial(forward, ipm_steps=ipm_steps,
                                    num_layers=num_conv_layers,
                                    hid_dim=hid_dim, use_res=True))
    vals, cons = fwd(packed, x_dict['cons'], x_dict['vals'], x_dict['obj'])
    jax.block_until_ready((vals, cons))

    assert vals.shape == (n_nodes['vals'], ipm_steps)
    assert cons.shape == (n_nodes['cons'], ipm_steps)
    assert bool(jnp.all(vals >= 0.0))
    assert bool(jnp.all(jnp.isfinite(vals))) and bool(jnp.all(jnp.isfinite(cons)))

    # Cross-check against the plain-JAX f32 reference.  The kernel now feeds
    # the MXU bf16 operands with f32 accumulation, so allow ~1e-1 combined
    # tolerance (typical error is well below; this catches packing bugs).
    vals_ref, cons_ref = reference_forward(params, x_dict, graphs,
                                           ipm_steps=ipm_steps,
                                           num_layers=num_conv_layers,
                                           use_res=True)
    assert bool(jnp.allclose(vals, vals_ref, rtol=1e-1, atol=1e-1))
    assert bool(jnp.allclose(cons, cons_ref, rtol=1e-1, atol=1e-1))

    print("KERNEL_OK")
</pallas_src>

<mosaic_0001>
module attributes {stable_mosaic.version = 11 : i64} {
  func.func @_gnn_kernel(%arg0: memref<72x48xf32, #tpu.memory_space<vmem>>, %arg1: memref<48x96xbf16, #tpu.memory_space<vmem>>, %arg2: memref<72x96xf32, #tpu.memory_space<vmem>>, %arg3: memref<96x64xbf16, #tpu.memory_space<vmem>>, %arg4: memref<72x64xf32, #tpu.memory_space<vmem>>, %arg5: memref<40x32xbf16, #tpu.memory_space<vmem>>, %arg6: memref<24x48xbf16, #tpu.memory_space<vmem>>, %arg7: memref<8x64xbf16, #tpu.memory_space<vmem>>, %arg8: memref<40x2xf32, #tpu.memory_space<vmem>>, %arg9: memref<24x2xf32, #tpu.memory_space<vmem>>, %arg10: memref<8x2xf32, #tpu.memory_space<vmem>>, %arg11: memref<6x64x192xbf16, #tpu.memory_space<vmem>>, %arg12: memref<12x64xf32, #tpu.memory_space<vmem>>, %arg13: memref<6x64xf32, #tpu.memory_space<vmem>>, %arg14: memref<2x64x64xbf16, #tpu.memory_space<vmem>>, %arg15: memref<2x64xf32, #tpu.memory_space<vmem>>, %arg16: memref<64x128xbf16, #tpu.memory_space<vmem>>, %arg17: memref<1x128xf32, #tpu.memory_space<vmem>>, %arg18: memref<2x64x64xbf16, #tpu.memory_space<vmem>>, %arg19: memref<2x64xf32, #tpu.memory_space<vmem>>, %arg20: memref<64x128xbf16, #tpu.memory_space<vmem>>, %arg21: memref<1x128xf32, #tpu.memory_space<vmem>>, %arg22: memref<40x128xf32, #tpu.memory_space<vmem>>, %arg23: memref<24x128xf32, #tpu.memory_space<vmem>>) attributes {dimension_semantics = [], scalar_prefetch = 0 : i64, scratch_operands = 0 : i64, tpu.core_type = #tpu.core_type<tc>} {
    %c0 = arith.constant 0 : index
    %c0_0 = arith.constant 0 : index
    %0 = vector.load %arg0[%c0, %c0_0] : memref<72x48xf32, #tpu.memory_space<vmem>>, vector<72x48xf32>
    %c0_1 = arith.constant 0 : index
    %c0_2 = arith.constant 0 : index
    %1 = vector.load %arg1[%c0_1, %c0_2] : memref<48x96xbf16, #tpu.memory_space<vmem>>, vector<48x96xbf16>
    %2 = arith.truncf %0 : vector<72x48xf32> to vector<72x48xbf16>
    %cst = arith.constant dense<0.000000e+00> : vector<72x96xf32>
    %3 = tpu.matmul %2, %1, %cst {dimension_numbers = #tpu.dot_dimension_numbers<[1], [0], [0], [1], [0, 0, 1, 1], [], []>} : vector<72x48xbf16>, vector<48x96xbf16>, vector<72x96xf32> -> vector<72x96xf32>
    %c0_3 = arith.constant 0 : index
    %c0_4 = arith.constant 0 : index
    %4 = vector.load %arg2[%c0_3, %c0_4] : memref<72x96xf32, #tpu.memory_space<vmem>>, vector<72x96xf32>
    %5 = arith.addf %3, %4 : vector<72x96xf32>
    %cst_5 = arith.constant 0.000000e+00 : f32
    %6 = vector.broadcast %cst_5 : f32 to vector<72x96xf32>
    %7 = arith.maximumf %5, %6 : vector<72x96xf32>
    %c0_6 = arith.constant 0 : index
    %c0_7 = arith.constant 0 : index
    %8 = vector.load %arg3[%c0_6, %c0_7] : memref<96x64xbf16, #tpu.memory_space<vmem>>, vector<96x64xbf16>
    %9 = arith.truncf %7 : vector<72x96xf32> to vector<72x96xbf16>
    %cst_8 = arith.constant dense<0.000000e+00> : vector<72x64xf32>
    %10 = tpu.matmul %9, %8, %cst_8 {dimension_numbers = #tpu.dot_dimension_numbers<[1], [0], [0], [1], [0, 0, 1, 1], [], []>} : vector<72x96xbf16>, vector<96x64xbf16>, vector<72x64xf32> -> vector<72x64xf32>
    %c0_9 = arith.constant 0 : index
    %c0_10 = arith.constant 0 : index
    %11 = vector.load %arg4[%c0_9, %c0_10] : memref<72x64xf32, #tpu.memory_space<vmem>>, vector<72x64xf32>
    %12 = arith.addf %10, %11 : vector<72x64xf32>
    %13 = vector.extract_strided_slice %12 {offsets = [0, 0], sizes = [24, 64], strides = [1, 1]} : vector<72x64xf32> to vector<24x64xf32>
    %14 = vector.extract_strided_slice %12 {offsets = [24, 0], sizes = [40, 64], strides = [1, 1]} : vector<72x64xf32> to vector<40x64xf32>
    %15 = vector.extract_strided_slice %12 {offsets = [64, 0], sizes = [8, 64], strides = [1, 1]} : vector<72x64xf32> to vector<8x64xf32>
    %c0_11 = arith.constant 0 : index
    %c0_12 = arith.constant 0 : index
    %16 = vector.load %arg5[%c0_11, %c0_12] : memref<40x32xbf16, #tpu.memory_space<vmem>>, vector<40x32xbf16>
    %c0_13 = arith.constant 0 : index
    %c0_14 = arith.constant 0 : index
    %17 = vector.load %arg6[%c0_13, %c0_14] : memref<24x48xbf16, #tpu.memory_space<vmem>>, vector<24x48xbf16>
    %c0_15 = arith.constant 0 : index
    %c0_16 = arith.constant 0 : index
    %18 = vector.load %arg7[%c0_15, %c0_16] : memref<8x64xbf16, #tpu.memory_space<vmem>>, vector<8x64xbf16>
    %c0_17 = arith.constant 0 : index
    %c0_18 = arith.constant 0 : index
    %19 = vector.load %arg8[%c0_17, %c0_18] : memref<40x2xf32, #tpu.memory_space<vmem>>, vector<40x2xf32>
    %c0_19 = arith.constant 0 : index
    %c0_20 = arith.constant 0 : index
    %20 = vector.load %arg9[%c0_19, %c0_20] : memref<24x2xf32, #tpu.memory_space<vmem>>, vector<24x2xf32>
    %c0_21 = arith.constant 0 : index
    %c0_22 = arith.constant 0 : index
    %21 = vector.load %arg10[%c0_21, %c0_22] : memref<8x2xf32, #tpu.memory_space<vmem>>, vector<8x2xf32>
    %22 = vector.extract_strided_slice %19 {offsets = [0, 0], sizes = [40, 1], strides = [1, 1]} : vector<40x2xf32> to vector<40x1xf32>
    %c0_23 = arith.constant 0 : index
    %c0_24 = arith.constant 0 : index
    %23 = vector.load %arg12[%c0_23, %c0_24] : memref<12x64xf32, #tpu.memory_space<vmem>>, vector<1x64xf32>
    %24 = vector.broadcast %22 : vector<40x1xf32> to vector<40x64xf32>
    %25 = vector.broadcast %23 : vector<1x64xf32> to vector<40x64xf32>
    %26 = arith.mulf %24, %25 : vector<40x64xf32>
    %27 = vector.extract_strided_slice %19 {offsets = [0, 1], sizes = [40, 1], strides = [1, 1]} : vector<40x2xf32> to vector<40x1xf32>
    %c1 = arith.constant 1 : index
    %c0_25 = arith.constant 0 : index
    %28 = vector.load %arg12[%c1, %c0_25] : memref<12x64xf32, #tpu.memory_space<vmem>>, vector<1x64xf32>
    %29 = vector.broadcast %27 : vector<40x1xf32> to vector<40x64xf32>
    %30 = vector.broadcast %28 : vector<1x64xf32> to vector<40x64xf32>
    %31 = arith.mulf %29, %30 : vector<40x64xf32>
    %32 = arith.addf %26, %31 : vector<40x64xf32>
    %c0_26 = arith.constant 0 : index
    %c0_27 = arith.constant 0 : index
    %33 = vector.load %arg13[%c0_26, %c0_27] : memref<6x64xf32, #tpu.memory_space<vmem>>, vector<1x64xf32>
    %34 = vector.broadcast %33 : vector<1x64xf32> to vector<40x64xf32>
    %35 = arith.addf %32, %34 : vector<40x64xf32>
    %36 = vector.extract_strided_slice %20 {offsets = [0, 0], sizes = [24, 1], strides = [1, 1]} : vector<24x2xf32> to vector<24x1xf32>
    %c2 = arith.constant 2 : index
    %c0_28 = arith.constant 0 : index
    %37 = vector.load %arg12[%c2, %c0_28] : memref<12x64xf32, #tpu.memory_space<vmem>>, vector<1x64xf32>
    %38 = vector.broadcast %36 : vector<24x1xf32> to vector<24x64xf32>
    %39 = vector.broadcast %37 : vector<1x64xf32> to vector<24x64xf32>
    %40 = arith.mulf %38, %39 : vector<24x64xf32>
    %41 = vector.extract_strided_slice %20 {offsets = [0, 1], sizes = [24, 1], strides = [1, 1]} : vector<24x2xf32> to vector<24x1xf32>
    %c3 = arith.constant 3 : index
    %c0_29 = arith.constant 0 : index
    %42 = vector.load %arg12[%c3, %c0_29] : memref<12x64xf32, #tpu.memory_space<vmem>>, vector<1x64xf32>
    %43 = vector.broadcast %41 : vector<24x1xf32> to vector<24x64xf32>
    %44 = vector.broadcast %42 : vector<1x64xf32> to vector<24x64xf32>
    %45 = arith.mulf %43, %44 : vector<24x64xf32>
    %46 = arith.addf %40, %45 : vector<24x64xf32>
    %c1_30 = arith.constant 1 : index
    %c0_31 = arith.constant 0 : index
    %47 = vector.load %arg13[%c1_30, %c0_31] : memref<6x64xf32, #tpu.memory_space<vmem>>, vector<1x64xf32>
    %48 = vector.broadcast %47 : vector<1x64xf32> to vector<24x64xf32>
    %49 = arith.addf %46, %48 : vector<24x64xf32>
    %50 = vector.extract_strided_slice %21 {offsets = [0, 0], sizes = [8, 1], strides = [1, 1]} : vector<8x2xf32> to vector<8x1xf32>
    %c4 = arith.constant 4 : index
    %c0_32 = arith.constant 0 : index
    %51 = vector.load %arg12[%c4, %c0_32] : memref<12x64xf32, #tpu.memory_space<vmem>>, vector<1x64xf32>
    %52 = vector.broadcast %50 : vector<8x1xf32> to vector<8x64xf32>
    %53 = vector.broadcast %51 : vector<1x64xf32> to vector<8x64xf32>
    %54 = arith.mulf %52, %53 : vector<8x64xf32>
    %55 = vector.extract_strided_slice %21 {offsets = [0, 1], sizes = [8, 1], strides = [1, 1]} : vector<8x2xf32> to vector<8x1xf32>
    %c5 = arith.constant 5 : index
    %c0_33 = arith.constant 0 : index
    %56 = vector.load %arg12[%c5, %c0_33] : memref<12x64xf32, #tpu.memory_space<vmem>>, vector<1x64xf32>
    %57 = vector.broadcast %55 : vector<8x1xf32> to vector<8x64xf32>
    %58 = vector.broadcast %56 : vector<1x64xf32> to vector<8x64xf32>
    %59 = arith.mulf %57, %58 : vector<8x64xf32>
    %60 = arith.addf %54, %59 : vector<8x64xf32>
    %c2_34 = arith.constant 2 : index
    %c0_35 = arith.constant 0 : index
    %61 = vector.load %arg13[%c2_34, %c0_35] : memref<6x64xf32, #tpu.memory_space<vmem>>, vector<1x64xf32>
    %62 = vector.broadcast %61 : vector<1x64xf32> to vector<8x64xf32>
    %63 = arith.addf %60, %62 : vector<8x64xf32>
    %64 = vector.extract_strided_slice %19 {offsets = [0, 0], sizes = [40, 1], strides = [1, 1]} : vector<40x2xf32> to vector<40x1xf32>
    %c6 = arith.constant 6 : index
    %c0_36 = arith.constant 0 : index
    %65 = vector.load %arg12[%c6, %c0_36] : memref<12x64xf32, #tpu.memory_space<vmem>>, vector<1x64xf32>
    %66 = vector.broadcast %64 : vector<40x1xf32> to vector<40x64xf32>
    %67 = vector.broadcast %65 : vector<1x64xf32> to vector<40x64xf32>
    %68 = arith.mulf %66, %67 : vector<40x64xf32>
    %69 = vector.extract_strided_slice %19 {offsets = [0, 1], sizes = [40, 1], strides = [1, 1]} : vector<40x2xf32> to vector<40x1xf32>
    %c7 = arith.constant 7 : index
    %c0_37 = arith.constant 0 : index
    %70 = vector.load %arg12[%c7, %c0_37] : memref<12x64xf32, #tpu.memory_space<vmem>>, vector<1x64xf32>
    %71 = vector.broadcast %69 : vector<40x1xf32> to vector<40x64xf32>
    %72 = vector.broadcast %70 : vector<1x64xf32> to vector<40x64xf32>
    %73 = arith.mulf %71, %72 : vector<40x64xf32>
    %74 = arith.addf %68, %73 : vector<40x64xf32>
    %c3_38 = arith.constant 3 : index
    %c0_39 = arith.constant 0 : index
    %75 = vector.load %arg13[%c3_38, %c0_39] : memref<6x64xf32, #tpu.memory_space<vmem>>, vector<1x64xf32>
    %76 = vector.broadcast %75 : vector<1x64xf32> to vector<40x64xf32>
    %77 = arith.addf %74, %76 : vector<40x64xf32>
    %78 = vector.extract_strided_slice %20 {offsets = [0, 0], sizes = [24, 1], strides = [1, 1]} : vector<24x2xf32> to vector<24x1xf32>
    %c8 = arith.constant 8 : index
    %c0_40 = arith.constant 0 : index
    %79 = vector.load %arg12[%c8, %c0_40] : memref<12x64xf32, #tpu.memory_space<vmem>>, vector<1x64xf32>
    %80 = vector.broadcast %78 : vector<24x1xf32> to vector<24x64xf32>
    %81 = vector.broadcast %79 : vector<1x64xf32> to vector<24x64xf32>
    %82 = arith.mulf %80, %81 : vector<24x64xf32>
    %83 = vector.extract_strided_slice %20 {offsets = [0, 1], sizes = [24, 1], strides = [1, 1]} : vector<24x2xf32> to vector<24x1xf32>
    %c9 = arith.constant 9 : index
    %c0_41 = arith.constant 0 : index
    %84 = vector.load %arg12[%c9, %c0_41] : memref<12x64xf32, #tpu.memory_space<vmem>>, vector<1x64xf32>
    %85 = vector.broadcast %83 : vector<24x1xf32> to vector<24x64xf32>
    %86 = vector.broadcast %84 : vector<1x64xf32> to vector<24x64xf32>
    %87 = arith.mulf %85, %86 : vector<24x64xf32>
    %88 = arith.addf %82, %87 : vector<24x64xf32>
    %c4_42 = arith.constant 4 : index
    %c0_43 = arith.constant 0 : index
    %89 = vector.load %arg13[%c4_42, %c0_43] : memref<6x64xf32, #tpu.memory_space<vmem>>, vector<1x64xf32>
    %90 = vector.broadcast %89 : vector<1x64xf32> to vector<24x64xf32>
    %91 = arith.addf %88, %90 : vector<24x64xf32>
    %92 = vector.extract_strided_slice %21 {offsets = [0, 0], sizes = [8, 1], strides = [1, 1]} : vector<8x2xf32> to vector<8x1xf32>
    %c10 = arith.constant 10 : index
    %c0_44 = arith.constant 0 : index
    %93 = vector.load %arg12[%c10, %c0_44] : memref<12x64xf32, #tpu.memory_space<vmem>>, vector<1x64xf32>
    %94 = vector.broadcast %92 : vector<8x1xf32> to vector<8x64xf32>
    %95 = vector.broadcast %93 : vector<1x64xf32> to vector<8x64xf32>
    %96 = arith.mulf %94, %95 : vector<8x64xf32>
    %97 = vector.extract_strided_slice %21 {offsets = [0, 1], sizes = [8, 1], strides = [1, 1]} : vector<8x2xf32> to vector<8x1xf32>
    %c11 = arith.constant 11 : index
    %c0_45 = arith.constant 0 : index
    %98 = vector.load %arg12[%c11, %c0_45] : memref<12x64xf32, #tpu.memory_space<vmem>>, vector<1x64xf32>
    %99 = vector.broadcast %97 : vector<8x1xf32> to vector<8x64xf32>
    %100 = vector.broadcast %98 : vector<1x64xf32> to vector<8x64xf32>
    %101 = arith.mulf %99, %100 : vector<8x64xf32>
    %102 = arith.addf %96, %101 : vector<8x64xf32>
    %c5_46 = arith.constant 5 : index
    %c0_47 = arith.constant 0 : index
    %103 = vector.load %arg13[%c5_46, %c0_47] : memref<6x64xf32, #tpu.memory_space<vmem>>, vector<1x64xf32>
    %104 = vector.broadcast %103 : vector<1x64xf32> to vector<8x64xf32>
    %105 = arith.addf %102, %104 : vector<8x64xf32>
    %cst_48 = arith.constant 0.000000e+00 : f32
    %106 = vector.broadcast %cst_48 : f32 to vector<40x64xf32>
    %cst_49 = arith.constant 0.000000e+00 : f32
    %107 = vector.broadcast %cst_49 : f32 to vector<24x64xf32>
    %c0_50 = arith.constant 0 : index
    %c0_51 = arith.constant 0 : index
    %c0_52 = arith.constant 0 : index
    %108 = vector.load %arg11[%c0_50, %c0_51, %c0_52] : memref<6x64x192xbf16, #tpu.memory_space<vmem>>, vector<1x64x192xbf16>
    %109 = vector.shape_cast %108 : vector<1x64x192xbf16> to vector<64x192xbf16>
    %110 = arith.truncf %13 : vector<24x64xf32> to vector<24x64xbf16>
    %cst_53 = arith.constant dense<0.000000e+00> : vector<24x192xf32>
    %111 = tpu.matmul %110, %109, %cst_53 {dimension_numbers = #tpu.dot_dimension_numbers<[1], [0], [0], [1], [0, 0, 1, 1], [], []>} : vector<24x64xbf16>, vector<64x192xbf16>, vector<24x192xf32> -> vector<24x192xf32>
    %c1_54 = arith.constant 1 : index
    %c0_55 = arith.constant 0 : index
    %c0_56 = arith.constant 0 : index
    %112 = vector.load %arg11[%c1_54, %c0_55, %c0_56] : memref<6x64x192xbf16, #tpu.memory_space<vmem>>, vector<1x64x192xbf16>
    %113 = vector.shape_cast %112 : vector<1x64x192xbf16> to vector<64x192xbf16>
    %114 = arith.truncf %14 : vector<40x64xf32> to vector<40x64xbf16>
    %cst_57 = arith.constant dense<0.000000e+00> : vector<40x192xf32>
    %115 = tpu.matmul %114, %113, %cst_57 {dimension_numbers = #tpu.dot_dimension_numbers<[1], [0], [0], [1], [0, 0, 1, 1], [], []>} : vector<40x64xbf16>, vector<64x192xbf16>, vector<40x192xf32> -> vector<40x192xf32>
    %c2_58 = arith.constant 2 : index
    %c0_59 = arith.constant 0 : index
    %c0_60 = arith.constant 0 : index
    %116 = vector.load %arg11[%c2_58, %c0_59, %c0_60] : memref<6x64x192xbf16, #tpu.memory_space<vmem>>, vector<1x64x192xbf16>
    %117 = vector.shape_cast %116 : vector<1x64x192xbf16> to vector<64x192xbf16>
    %118 = arith.truncf %15 : vector<8x64xf32> to vector<8x64xbf16>
    %cst_61 = arith.constant dense<0.000000e+00> : vector<8x192xf32>
    %119 = tpu.matmul %118, %117, %cst_61 {dimension_numbers = #tpu.dot_dimension_numbers<[1], [0], [0], [1], [0, 0, 1, 1], [], []>} : vector<8x64xbf16>, vector<64x192xbf16>, vector<8x192xf32> -> vector<8x192xf32>
    %120 = vector.extract_strided_slice %111 {offsets = [0, 0], sizes = [24, 64], strides = [1, 1]} : vector<24x192xf32> to vector<24x64xf32>
    %121 = vector.extract_strided_slice %119 {offsets = [0, 0], sizes = [8, 64], strides = [1, 1]} : vector<8x192xf32> to vector<8x64xf32>
    %122 = tpu.concatenate %120, %121 in 0 : vector<24x64xf32>, vector<8x64xf32> -> vector<32x64xf32>
    %123 = arith.truncf %122 : vector<32x64xf32> to vector<32x64xbf16>
    %cst_62 = arith.constant dense<0.000000e+00> : vector<40x64xf32>
    %124 = tpu.matmul %16, %123, %cst_62 {dimension_numbers = #tpu.dot_dimension_numbers<[1], [0], [0], [1], [0, 0, 1, 1], [], []>} : vector<40x32xbf16>, vector<32x64xbf16>, vector<40x64xf32> -> vector<40x64xf32>
    %125 = vector.extract_strided_slice %115 {offsets = [0, 128], sizes = [40, 64], strides = [1, 1]} : vector<40x192xf32> to vector<40x64xf32>
    %126 = arith.addf %124, %125 : vector<40x64xf32>
    %127 = arith.addf %126, %35 : vector<40x64xf32>
    %128 = vector.extract_strided_slice %115 {offsets = [0, 0], sizes = [40, 64], strides = [1, 1]} : vector<40x192xf32> to vector<40x64xf32>
    %129 = vector.extract_strided_slice %119 {offsets = [0, 64], sizes = [8, 64], strides = [1, 1]} : vector<8x192xf32> to vector<8x64xf32>
    %130 = tpu.concatenate %128, %129 in 0 : vector<40x64xf32>, vector<8x64xf32> -> vector<48x64xf32>
    %131 = arith.truncf %130 : vector<48x64xf32> to vector<48x64xbf16>
    %cst_63 = arith.constant dense<0.000000e+00> : vector<24x64xf32>
    %132 = tpu.matmul %17, %131, %cst_63 {dimension_numbers = #tpu.dot_dimension_numbers<[1], [0], [0], [1], [0, 0, 1, 1], [], []>} : vector<24x48xbf16>, vector<48x64xbf16>, vector<24x64xf32> -> vector<24x64xf32>
    %133 = vector.extract_strided_slice %111 {offsets = [0, 128], sizes = [24, 64], strides = [1, 1]} : vector<24x192xf32> to vector<24x64xf32>
    %134 = arith.addf %132, %133 : vector<24x64xf32>
    %135 = arith.addf %134, %49 : vector<24x64xf32>
    %136 = vector.extract_strided_slice %115 {offsets = [0, 64], sizes = [40, 64], strides = [1, 1]} : vector<40x192xf32> to vector<40x64xf32>
    %137 = vector.extract_strided_slice %111 {offsets = [0, 64], sizes = [24, 64], strides = [1, 1]} : vector<24x192xf32> to vector<24x64xf32>
    %138 = tpu.concatenate %136, %137 in 0 : vector<40x64xf32>, vector<24x64xf32> -> vector<64x64xf32>
    %139 = arith.truncf %138 : vector<64x64xf32> to vector<64x64xbf16>
    %cst_64 = arith.constant dense<0.000000e+00> : vector<8x64xf32>
    %140 = tpu.matmul %18, %139, %cst_64 {dimension_numbers = #tpu.dot_dimension_numbers<[1], [0], [0], [1], [0, 0, 1, 1], [], []>} : vector<8x64xbf16>, vector<64x64xbf16>, vector<8x64xf32> -> vector<8x64xf32>
    %141 = vector.extract_strided_slice %119 {offsets = [0, 128], sizes = [8, 64], strides = [1, 1]} : vector<8x192xf32> to vector<8x64xf32>
    %142 = arith.addf %140, %141 : vector<8x64xf32>
    %143 = arith.addf %142, %63 : vector<8x64xf32>
    %cst_65 = arith.constant 0.000000e+00 : f32
    %144 = vector.broadcast %cst_65 : f32 to vector<40x64xf32>
    %145 = arith.maximumf %127, %144 : vector<40x64xf32>
    %146 = arith.addf %145, %14 : vector<40x64xf32>
    %cst_66 = arith.constant 5.000000e-01 : f32
    %147 = vector.broadcast %cst_66 : f32 to vector<40x64xf32>
    %148 = arith.mulf %146, %147 : vector<40x64xf32>
    %cst_67 = arith.constant 0.000000e+00 : f32
    %149 = vector.broadcast %cst_67 : f32 to vector<24x64xf32>
    %150 = arith.maximumf %135, %149 : vector<24x64xf32>
    %151 = arith.addf %150, %13 : vector<24x64xf32>
    %cst_68 = arith.constant 5.000000e-01 : f32
    %152 = vector.broadcast %cst_68 : f32 to vector<24x64xf32>
    %153 = arith.mulf %151, %152 : vector<24x64xf32>
    %cst_69 = arith.constant 0.000000e+00 : f32
    %154 = vector.broadcast %cst_69 : f32 to vector<8x64xf32>
    %155 = arith.maximumf %143, %154 : vector<8x64xf32>
    %156 = arith.addf %155, %15 : vector<8x64xf32>
    %cst_70 = arith.constant 5.000000e-01 : f32
    %157 = vector.broadcast %cst_70 : f32 to vector<8x64xf32>
    %158 = arith.mulf %156, %157 : vector<8x64xf32>
    %c3_71 = arith.constant 3 : index
    %c0_72 = arith.constant 0 : index
    %c0_73 = arith.constant 0 : index
    %159 = vector.load %arg11[%c3_71, %c0_72, %c0_73] : memref<6x64x192xbf16, #tpu.memory_space<vmem>>, vector<1x64x192xbf16>
    %160 = vector.shape_cast %159 : vector<1x64x192xbf16> to vector<64x192xbf16>
    %161 = arith.truncf %153 : vector<24x64xf32> to vector<24x64xbf16>
    %cst_74 = arith.constant dense<0.000000e+00> : vector<24x192xf32>
    %162 = tpu.matmul %161, %160, %cst_74 {dimension_numbers = #tpu.dot_dimension_numbers<[1], [0], [0], [1], [0, 0, 1, 1], [], []>} : vector<24x64xbf16>, vector<64x192xbf16>, vector<24x192xf32> -> vector<24x192xf32>
    %c4_75 = arith.constant 4 : index
    %c0_76 = arith.constant 0 : index
    %c0_77 = arith.constant 0 : index
    %163 = vector.load %arg11[%c4_75, %c0_76, %c0_77] : memref<6x64x192xbf16, #tpu.memory_space<vmem>>, vector<1x64x192xbf16>
    %164 = vector.shape_cast %163 : vector<1x64x192xbf16> to vector<64x192xbf16>
    %165 = arith.truncf %148 : vector<40x64xf32> to vector<40x64xbf16>
    %cst_78 = arith.constant dense<0.000000e+00> : vector<40x192xf32>
    %166 = tpu.matmul %165, %164, %cst_78 {dimension_numbers = #tpu.dot_dimension_numbers<[1], [0], [0], [1], [0, 0, 1, 1], [], []>} : vector<40x64xbf16>, vector<64x192xbf16>, vector<40x192xf32> -> vector<40x192xf32>
    %c5_79 = arith.constant 5 : index
    %c0_80 = arith.constant 0 : index
    %c0_81 = arith.constant 0 : index
    %167 = vector.load %arg11[%c5_79, %c0_80, %c0_81] : memref<6x64x192xbf16, #tpu.memory_space<vmem>>, vector<1x64x192xbf16>
    %168 = vector.shape_cast %167 : vector<1x64x192xbf16> to vector<64x192xbf16>
    %169 = arith.truncf %158 : vector<8x64xf32> to vector<8x64xbf16>
    %cst_82 = arith.constant dense<0.000000e+00> : vector<8x192xf32>
    %170 = tpu.matmul %169, %168, %cst_82 {dimension_numbers = #tpu.dot_dimension_numbers<[1], [0], [0], [1], [0, 0, 1, 1], [], []>} : vector<8x64xbf16>, vector<64x192xbf16>, vector<8x192xf32> -> vector<8x192xf32>
    %171 = vector.extract_strided_slice %162 {offsets = [0, 0], sizes = [24, 64], strides = [1, 1]} : vector<24x192xf32> to vector<24x64xf32>
    %172 = vector.extract_strided_slice %170 {offsets = [0, 0], sizes = [8, 64], strides = [1, 1]} : vector<8x192xf32> to vector<8x64xf32>
    %173 = tpu.concatenate %171, %172 in 0 : vector<24x64xf32>, vector<8x64xf32> -> vector<32x64xf32>
    %174 = arith.truncf %173 : vector<32x64xf32> to vector<32x64xbf16>
    %cst_83 = arith.constant dense<0.000000e+00> : vector<40x64xf32>
    %175 = tpu.matmul %16, %174, %cst_83 {dimension_numbers = #tpu.dot_dimension_numbers<[1], [0], [0], [1], [0, 0, 1, 1], [], []>} : vector<40x32xbf16>, vector<32x64xbf16>, vector<40x64xf32> -> vector<40x64xf32>
    %176 = vector.extract_strided_slice %166 {offsets = [0, 128], sizes = [40, 64], strides = [1, 1]} : vector<40x192xf32> to vector<40x64xf32>
    %177 = arith.addf %175, %176 : vector<40x64xf32>
    %178 = arith.addf %177, %77 : vector<40x64xf32>
    %179 = vector.extract_strided_slice %166 {offsets = [0, 0], sizes = [40, 64], strides = [1, 1]} : vector<40x192xf32> to vector<40x64xf32>
    %180 = vector.extract_strided_slice %170 {offsets = [0, 64], sizes = [8, 64], strides = [1, 1]} : vector<8x192xf32> to vector<8x64xf32>
    %181 = tpu.concatenate %179, %180 in 0 : vector<40x64xf32>, vector<8x64xf32> -> vector<48x64xf32>
    %182 = arith.truncf %181 : vector<48x64xf32> to vector<48x64xbf16>
    %cst_84 = arith.constant dense<0.000000e+00> : vector<24x64xf32>
    %183 = tpu.matmul %17, %182, %cst_84 {dimension_numbers = #tpu.dot_dimension_numbers<[1], [0], [0], [1], [0, 0, 1, 1], [], []>} : vector<24x48xbf16>, vector<48x64xbf16>, vector<24x64xf32> -> vector<24x64xf32>
    %184 = vector.extract_strided_slice %162 {offsets = [0, 128], sizes = [24, 64], strides = [1, 1]} : vector<24x192xf32> to vector<24x64xf32>
    %185 = arith.addf %183, %184 : vector<24x64xf32>
    %186 = arith.addf %185, %91 : vector<24x64xf32>
    %187 = vector.extract_strided_slice %166 {offsets = [0, 64], sizes = [40, 64], strides = [1, 1]} : vector<40x192xf32> to vector<40x64xf32>
    %188 = vector.extract_strided_slice %162 {offsets = [0, 64], sizes = [24, 64], strides = [1, 1]} : vector<24x192xf32> to vector<24x64xf32>
    %189 = tpu.concatenate %187, %188 in 0 : vector<40x64xf32>, vector<24x64xf32> -> vector<64x64xf32>
    %190 = arith.truncf %189 : vector<64x64xf32> to vector<64x64xbf16>
    %cst_85 = arith.constant dense<0.000000e+00> : vector<8x64xf32>
    %191 = tpu.matmul %18, %190, %cst_85 {dimension_numbers = #tpu.dot_dimension_numbers<[1], [0], [0], [1], [0, 0, 1, 1], [], []>} : vector<8x64xbf16>, vector<64x64xbf16>, vector<8x64xf32> -> vector<8x64xf32>
    %192 = vector.extract_strided_slice %170 {offsets = [0, 128], sizes = [8, 64], strides = [1, 1]} : vector<8x192xf32> to vector<8x64xf32>
    %193 = arith.addf %191, %192 : vector<8x64xf32>
    %194 = arith.addf %193, %105 : vector<8x64xf32>
    %cst_86 = arith.constant 0.000000e+00 : f32
    %195 = vector.broadcast %cst_86 : f32 to vector<40x64xf32>
    %196 = arith.maximumf %178, %195 : vector<40x64xf32>
    %197 = arith.addf %196, %148 : vector<40x64xf32>
    %cst_87 = arith.constant 5.000000e-01 : f32
    %198 = vector.broadcast %cst_87 : f32 to vector<40x64xf32>
    %199 = arith.mulf %197, %198 : vector<40x64xf32>
    %cst_88 = arith.constant 0.000000e+00 : f32
    %200 = vector.broadcast %cst_88 : f32 to vector<24x64xf32>
    %201 = arith.maximumf %186, %200 : vector<24x64xf32>
    %202 = arith.addf %201, %153 : vector<24x64xf32>
    %cst_89 = arith.constant 5.000000e-01 : f32
    %203 = vector.broadcast %cst_89 : f32 to vector<24x64xf32>
    %204 = arith.mulf %202, %203 : vector<24x64xf32>
    %cst_90 = arith.constant 0.000000e+00 : f32
    %205 = vector.broadcast %cst_90 : f32 to vector<8x64xf32>
    %206 = arith.maximumf %194, %205 : vector<8x64xf32>
    %207 = arith.addf %206, %158 : vector<8x64xf32>
    %cst_91 = arith.constant 5.000000e-01 : f32
    %208 = vector.broadcast %cst_91 : f32 to vector<8x64xf32>
    %209 = arith.mulf %207, %208 : vector<8x64xf32>
    %c0_92 = arith.constant 0 : index
    %c0_93 = arith.constant 0 : index
    %c0_94 = arith.constant 0 : index
    %210 = vector.load %arg14[%c0_92, %c0_93, %c0_94] : memref<2x64x64xbf16, #tpu.memory_space<vmem>>, vector<1x64x64xbf16>
    %211 = vector.shape_cast %210 : vector<1x64x64xbf16> to vector<64x64xbf16>
    %212 = arith.truncf %178 : vector<40x64xf32> to vector<40x64xbf16>
    %cst_95 = arith.constant dense<0.000000e+00> : vector<40x64xf32>
    %213 = tpu.matmul %212, %211, %cst_95 {dimension_numbers = #tpu.dot_dimension_numbers<[1], [0], [0], [1], [0, 0, 1, 1], [], []>} : vector<40x64xbf16>, vector<64x64xbf16>, vector<40x64xf32> -> vector<40x64xf32>
    %c0_96 = arith.constant 0 : index
    %c0_97 = arith.constant 0 : index
    %214 = vector.load %arg15[%c0_96, %c0_97] : memref<2x64xf32, #tpu.memory_space<vmem>>, vector<1x64xf32>
    %215 = vector.broadcast %214 : vector<1x64xf32> to vector<40x64xf32>
    %216 = arith.addf %213, %215 : vector<40x64xf32>
    %cst_98 = arith.constant 0.000000e+00 : f32
    %217 = vector.broadcast %cst_98 : f32 to vector<40x64xf32>
    %218 = arith.maximumf %216, %217 : vector<40x64xf32>
    %219 = arith.addf %106, %218 : vector<40x64xf32>
    %c0_99 = arith.constant 0 : index
    %c0_100 = arith.constant 0 : index
    %c0_101 = arith.constant 0 : index
    %220 = vector.load %arg18[%c0_99, %c0_100, %c0_101] : memref<2x64x64xbf16, #tpu.memory_space<vmem>>, vector<1x64x64xbf16>
    %221 = vector.shape_cast %220 : vector<1x64x64xbf16> to vector<64x64xbf16>
    %222 = arith.truncf %186 : vector<24x64xf32> to vector<24x64xbf16>
    %cst_102 = arith.constant dense<0.000000e+00> : vector<24x64xf32>
    %223 = tpu.matmul %222, %221, %cst_102 {dimension_numbers = #tpu.dot_dimension_numbers<[1], [0], [0], [1], [0, 0, 1, 1], [], []>} : vector<24x64xbf16>, vector<64x64xbf16>, vector<24x64xf32> -> vector<24x64xf32>
    %c0_103 = arith.constant 0 : index
    %c0_104 = arith.constant 0 : index
    %224 = vector.load %arg19[%c0_103, %c0_104] : memref<2x64xf32, #tpu.memory_space<vmem>>, vector<1x64xf32>
    %225 = vector.broadcast %224 : vector<1x64xf32> to vector<24x64xf32>
    %226 = arith.addf %223, %225 : vector<24x64xf32>
    %cst_105 = arith.constant 0.000000e+00 : f32
    %227 = vector.broadcast %cst_105 : f32 to vector<24x64xf32>
    %228 = arith.maximumf %226, %227 : vector<24x64xf32>
    %229 = arith.addf %107, %228 : vector<24x64xf32>
    %c0_106 = arith.constant 0 : index
    %c0_107 = arith.constant 0 : index
    %c0_108 = arith.constant 0 : index
    %230 = vector.load %arg11[%c0_106, %c0_107, %c0_108] : memref<6x64x192xbf16, #tpu.memory_space<vmem>>, vector<1x64x192xbf16>
    %231 = vector.shape_cast %230 : vector<1x64x192xbf16> to vector<64x192xbf16>
    %232 = arith.truncf %204 : vector<24x64xf32> to vector<24x64xbf16>
    %cst_109 = arith.constant dense<0.000000e+00> : vector<24x192xf32>
    %233 = tpu.matmul %232, %231, %cst_109 {dimension_numbers = #tpu.dot_dimension_numbers<[1], [0], [0], [1], [0, 0, 1, 1], [], []>} : vector<24x64xbf16>, vector<64x192xbf16>, vector<24x192xf32> -> vector<24x192xf32>
    %c1_110 = arith.constant 1 : index
    %c0_111 = arith.constant 0 : index
    %c0_112 = arith.constant 0 : index
    %234 = vector.load %arg11[%c1_110, %c0_111, %c0_112] : memref<6x64x192xbf16, #tpu.memory_space<vmem>>, vector<1x64x192xbf16>
    %235 = vector.shape_cast %234 : vector<1x64x192xbf16> to vector<64x192xbf16>
    %236 = arith.truncf %199 : vector<40x64xf32> to vector<40x64xbf16>
    %cst_113 = arith.constant dense<0.000000e+00> : vector<40x192xf32>
    %237 = tpu.matmul %236, %235, %cst_113 {dimension_numbers = #tpu.dot_dimension_numbers<[1], [0], [0], [1], [0, 0, 1, 1], [], []>} : vector<40x64xbf16>, vector<64x192xbf16>, vector<40x192xf32> -> vector<40x192xf32>
    %c2_114 = arith.constant 2 : index
    %c0_115 = arith.constant 0 : index
    %c0_116 = arith.constant 0 : index
    %238 = vector.load %arg11[%c2_114, %c0_115, %c0_116] : memref<6x64x192xbf16, #tpu.memory_space<vmem>>, vector<1x64x192xbf16>
    %239 = vector.shape_cast %238 : vector<1x64x192xbf16> to vector<64x192xbf16>
    %240 = arith.truncf %209 : vector<8x64xf32> to vector<8x64xbf16>
    %cst_117 = arith.constant dense<0.000000e+00> : vector<8x192xf32>
    %241 = tpu.matmul %240, %239, %cst_117 {dimension_numbers = #tpu.dot_dimension_numbers<[1], [0], [0], [1], [0, 0, 1, 1], [], []>} : vector<8x64xbf16>, vector<64x192xbf16>, vector<8x192xf32> -> vector<8x192xf32>
    %242 = vector.extract_strided_slice %233 {offsets = [0, 0], sizes = [24, 64], strides = [1, 1]} : vector<24x192xf32> to vector<24x64xf32>
    %243 = vector.extract_strided_slice %241 {offsets = [0, 0], sizes = [8, 64], strides = [1, 1]} : vector<8x192xf32> to vector<8x64xf32>
    %244 = tpu.concatenate %242, %243 in 0 : vector<24x64xf32>, vector<8x64xf32> -> vector<32x64xf32>
    %245 = arith.truncf %244 : vector<32x64xf32> to vector<32x64xbf16>
    %cst_118 = arith.constant dense<0.000000e+00> : vector<40x64xf32>
    %246 = tpu.matmul %16, %245, %cst_118 {dimension_numbers = #tpu.dot_dimension_numbers<[1], [0], [0], [1], [0, 0, 1, 1], [], []>} : vector<40x32xbf16>, vector<32x64xbf16>, vector<40x64xf32> -> vector<40x64xf32>
    %247 = vector.extract_strided_slice %237 {offsets = [0, 128], sizes = [40, 64], strides = [1, 1]} : vector<40x192xf32> to vector<40x64xf32>
    %248 = arith.addf %246, %247 : vector<40x64xf32>
    %249 = arith.addf %248, %35 : vector<40x64xf32>
    %250 = vector.extract_strided_slice %237 {offsets = [0, 0], sizes = [40, 64], strides = [1, 1]} : vector<40x192xf32> to vector<40x64xf32>
    %251 = vector.extract_strided_slice %241 {offsets = [0, 64], sizes = [8, 64], strides = [1, 1]} : vector<8x192xf32> to vector<8x64xf32>
    %252 = tpu.concatenate %250, %251 in 0 : vector<40x64xf32>, vector<8x64xf32> -> vector<48x64xf32>
    %253 = arith.truncf %252 : vector<48x64xf32> to vector<48x64xbf16>
    %cst_119 = arith.constant dense<0.000000e+00> : vector<24x64xf32>
    %254 = tpu.matmul %17, %253, %cst_119 {dimension_numbers = #tpu.dot_dimension_numbers<[1], [0], [0], [1], [0, 0, 1, 1], [], []>} : vector<24x48xbf16>, vector<48x64xbf16>, vector<24x64xf32> -> vector<24x64xf32>
    %255 = vector.extract_strided_slice %233 {offsets = [0, 128], sizes = [24, 64], strides = [1, 1]} : vector<24x192xf32> to vector<24x64xf32>
    %256 = arith.addf %254, %255 : vector<24x64xf32>
    %257 = arith.addf %256, %49 : vector<24x64xf32>
    %258 = vector.extract_strided_slice %237 {offsets = [0, 64], sizes = [40, 64], strides = [1, 1]} : vector<40x192xf32> to vector<40x64xf32>
    %259 = vector.extract_strided_slice %233 {offsets = [0, 64], sizes = [24, 64], strides = [1, 1]} : vector<24x192xf32> to vector<24x64xf32>
    %260 = tpu.concatenate %258, %259 in 0 : vector<40x64xf32>, vector<24x64xf32> -> vector<64x64xf32>
    %261 = arith.truncf %260 : vector<64x64xf32> to vector<64x64xbf16>
    %cst_120 = arith.constant dense<0.000000e+00> : vector<8x64xf32>
    %262 = tpu.matmul %18, %261, %cst_120 {dimension_numbers = #tpu.dot_dimension_numbers<[1], [0], [0], [1], [0, 0, 1, 1], [], []>} : vector<8x64xbf16>, vector<64x64xbf16>, vector<8x64xf32> -> vector<8x64xf32>
    %263 = vector.extract_strided_slice %241 {offsets = [0, 128], sizes = [8, 64], strides = [1, 1]} : vector<8x192xf32> to vector<8x64xf32>
    %264 = arith.addf %262, %263 : vector<8x64xf32>
    %265 = arith.addf %264, %63 : vector<8x64xf32>
    %cst_121 = arith.constant 0.000000e+00 : f32
    %266 = vector.broadcast %cst_121 : f32 to vector<40x64xf32>
    %267 = arith.maximumf %249, %266 : vector<40x64xf32>
    %268 = arith.addf %267, %199 : vector<40x64xf32>
    %cst_122 = arith.constant 5.000000e-01 : f32
    %269 = vector.broadcast %cst_122 : f32 to vector<40x64xf32>
    %270 = arith.mulf %268, %269 : vector<40x64xf32>
    %cst_123 = arith.constant 0.000000e+00 : f32
    %271 = vector.broadcast %cst_123 : f32 to vector<24x64xf32>
    %272 = arith.maximumf %257, %271 : vector<24x64xf32>
    %273 = arith.addf %272, %204 : vector<24x64xf32>
    %cst_124 = arith.constant 5.000000e-01 : f32
    %274 = vector.broadcast %cst_124 : f32 to vector<24x64xf32>
    %275 = arith.mulf %273, %274 : vector<24x64xf32>
    %cst_125 = arith.constant 0.000000e+00 : f32
    %276 = vector.broadcast %cst_125 : f32 to vector<8x64xf32>
    %277 = arith.maximumf %265, %276 : vector<8x64xf32>
    %278 = arith.addf %277, %209 : vector<8x64xf32>
    %cst_126 = arith.constant 5.000000e-01 : f32
    %279 = vector.broadcast %cst_126 : f32 to vector<8x64xf32>
    %280 = arith.mulf %278, %279 : vector<8x64xf32>
    %c3_127 = arith.constant 3 : index
    %c0_128 = arith.constant 0 : index
    %c0_129 = arith.constant 0 : index
    %281 = vector.load %arg11[%c3_127, %c0_128, %c0_129] : memref<6x64x192xbf16, #tpu.memory_space<vmem>>, vector<1x64x192xbf16>
    %282 = vector.shape_cast %281 : vector<1x64x192xbf16> to vector<64x192xbf16>
    %283 = arith.truncf %275 : vector<24x64xf32> to vector<24x64xbf16>
    %cst_130 = arith.constant dense<0.000000e+00> : vector<24x192xf32>
    %284 = tpu.matmul %283, %282, %cst_130 {dimension_numbers = #tpu.dot_dimension_numbers<[1], [0], [0], [1], [0, 0, 1, 1], [], []>} : vector<24x64xbf16>, vector<64x192xbf16>, vector<24x192xf32> -> vector<24x192xf32>
    %c4_131 = arith.constant 4 : index
    %c0_132 = arith.constant 0 : index
    %c0_133 = arith.constant 0 : index
    %285 = vector.load %arg11[%c4_131, %c0_132, %c0_133] : memref<6x64x192xbf16, #tpu.memory_space<vmem>>, vector<1x64x192xbf16>
    %286 = vector.shape_cast %285 : vector<1x64x192xbf16> to vector<64x192xbf16>
    %287 = arith.truncf %270 : vector<40x64xf32> to vector<40x64xbf16>
    %cst_134 = arith.constant dense<0.000000e+00> : vector<40x192xf32>
    %288 = tpu.matmul %287, %286, %cst_134 {dimension_numbers = #tpu.dot_dimension_numbers<[1], [0], [0], [1], [0, 0, 1, 1], [], []>} : vector<40x64xbf16>, vector<64x192xbf16>, vector<40x192xf32> -> vector<40x192xf32>
    %c5_135 = arith.constant 5 : index
    %c0_136 = arith.constant 0 : index
    %c0_137 = arith.constant 0 : index
    %289 = vector.load %arg11[%c5_135, %c0_136, %c0_137] : memref<6x64x192xbf16, #tpu.memory_space<vmem>>, vector<1x64x192xbf16>
    %290 = vector.shape_cast %289 : vector<1x64x192xbf16> to vector<64x192xbf16>
    %291 = arith.truncf %280 : vector<8x64xf32> to vector<8x64xbf16>
    %cst_138 = arith.constant dense<0.000000e+00> : vector<8x192xf32>
    %292 = tpu.matmul %291, %290, %cst_138 {dimension_numbers = #tpu.dot_dimension_numbers<[1], [0], [0], [1], [0, 0, 1, 1], [], []>} : vector<8x64xbf16>, vector<64x192xbf16>, vector<8x192xf32> -> vector<8x192xf32>
    %293 = vector.extract_strided_slice %284 {offsets = [0, 0], sizes = [24, 64], strides = [1, 1]} : vector<24x192xf32> to vector<24x64xf32>
    %294 = vector.extract_strided_slice %292 {offsets = [0, 0], sizes = [8, 64], strides = [1, 1]} : vector<8x192xf32> to vector<8x64xf32>
    %295 = tpu.concatenate %293, %294 in 0 : vector<24x64xf32>, vector<8x64xf32> -> vector<32x64xf32>
    %296 = arith.truncf %295 : vector<32x64xf32> to vector<32x64xbf16>
    %cst_139 = arith.constant dense<0.000000e+00> : vector<40x64xf32>
    %297 = tpu.matmul %16, %296, %cst_139 {dimension_numbers = #tpu.dot_dimension_numbers<[1], [0], [0], [1], [0, 0, 1, 1], [], []>} : vector<40x32xbf16>, vector<32x64xbf16>, vector<40x64xf32> -> vector<40x64xf32>
    %298 = vector.extract_strided_slice %288 {offsets = [0, 128], sizes = [40, 64], strides = [1, 1]} : vector<40x192xf32> to vector<40x64xf32>
    %299 = arith.addf %297, %298 : vector<40x64xf32>
    %300 = arith.addf %299, %77 : vector<40x64xf32>
    %301 = vector.extract_strided_slice %288 {offsets = [0, 0], sizes = [40, 64], strides = [1, 1]} : vector<40x192xf32> to vector<40x64xf32>
    %302 = vector.extract_strided_slice %292 {offsets = [0, 64], sizes = [8, 64], strides = [1, 1]} : vector<8x192xf32> to vector<8x64xf32>
    %303 = tpu.concatenate %301, %302 in 0 : vector<40x64xf32>, vector<8x64xf32> -> vector<48x64xf32>
    %304 = arith.truncf %303 : vector<48x64xf32> to vector<48x64xbf16>
    %cst_140 = arith.constant dense<0.000000e+00> : vector<24x64xf32>
    %305 = tpu.matmul %17, %304, %cst_140 {dimension_numbers = #tpu.dot_dimension_numbers<[1], [0], [0], [1], [0, 0, 1, 1], [], []>} : vector<24x48xbf16>, vector<48x64xbf16>, vector<24x64xf32> -> vector<24x64xf32>
    %306 = vector.extract_strided_slice %284 {offsets = [0, 128], sizes = [24, 64], strides = [1, 1]} : vector<24x192xf32> to vector<24x64xf32>
    %307 = arith.addf %305, %306 : vector<24x64xf32>
    %308 = arith.addf %307, %91 : vector<24x64xf32>
    %c1_141 = arith.constant 1 : index
    %c0_142 = arith.constant 0 : index
    %c0_143 = arith.constant 0 : index
    %309 = vector.load %arg14[%c1_141, %c0_142, %c0_143] : memref<2x64x64xbf16, #tpu.memory_space<vmem>>, vector<1x64x64xbf16>
    %310 = vector.shape_cast %309 : vector<1x64x64xbf16> to vector<64x64xbf16>
    %311 = arith.truncf %300 : vector<40x64xf32> to vector<40x64xbf16>
    %cst_144 = arith.constant dense<0.000000e+00> : vector<40x64xf32>
    %312 = tpu.matmul %311, %310, %cst_144 {dimension_numbers = #tpu.dot_dimension_numbers<[1], [0], [0], [1], [0, 0, 1, 1], [], []>} : vector<40x64xbf16>, vector<64x64xbf16>, vector<40x64xf32> -> vector<40x64xf32>
    %c1_145 = arith.constant 1 : index
    %c0_146 = arith.constant 0 : index
    %313 = vector.load %arg15[%c1_145, %c0_146] : memref<2x64xf32, #tpu.memory_space<vmem>>, vector<1x64xf32>
    %314 = vector.broadcast %313 : vector<1x64xf32> to vector<40x64xf32>
    %315 = arith.addf %312, %314 : vector<40x64xf32>
    %cst_147 = arith.constant 0.000000e+00 : f32
    %316 = vector.broadcast %cst_147 : f32 to vector<40x64xf32>
    %317 = arith.maximumf %315, %316 : vector<40x64xf32>
    %318 = arith.addf %219, %317 : vector<40x64xf32>
    %c1_148 = arith.constant 1 : index
    %c0_149 = arith.constant 0 : index
    %c0_150 = arith.constant 0 : index
    %319 = vector.load %arg18[%c1_148, %c0_149, %c0_150] : memref<2x64x64xbf16, #tpu.memory_space<vmem>>, vector<1x64x64xbf16>
    %320 = vector.shape_cast %319 : vector<1x64x64xbf16> to vector<64x64xbf16>
    %321 = arith.truncf %308 : vector<24x64xf32> to vector<24x64xbf16>
    %cst_151 = arith.constant dense<0.000000e+00> : vector<24x64xf32>
    %322 = tpu.matmul %321, %320, %cst_151 {dimension_numbers = #tpu.dot_dimension_numbers<[1], [0], [0], [1], [0, 0, 1, 1], [], []>} : vector<24x64xbf16>, vector<64x64xbf16>, vector<24x64xf32> -> vector<24x64xf32>
    %c1_152 = arith.constant 1 : index
    %c0_153 = arith.constant 0 : index
    %323 = vector.load %arg19[%c1_152, %c0_153] : memref<2x64xf32, #tpu.memory_space<vmem>>, vector<1x64xf32>
    %324 = vector.broadcast %323 : vector<1x64xf32> to vector<24x64xf32>
    %325 = arith.addf %322, %324 : vector<24x64xf32>
    %cst_154 = arith.constant 0.000000e+00 : f32
    %326 = vector.broadcast %cst_154 : f32 to vector<24x64xf32>
    %327 = arith.maximumf %325, %326 : vector<24x64xf32>
    %328 = arith.addf %229, %327 : vector<24x64xf32>
    %c0_155 = arith.constant 0 : index
    %c0_156 = arith.constant 0 : index
    %329 = vector.load %arg16[%c0_155, %c0_156] : memref<64x128xbf16, #tpu.memory_space<vmem>>, vector<64x128xbf16>
    %330 = arith.truncf %318 : vector<40x64xf32> to vector<40x64xbf16>
    %cst_157 = arith.constant dense<0.000000e+00> : vector<40x128xf32>
    %331 = tpu.matmul %330, %329, %cst_157 {dimension_numbers = #tpu.dot_dimension_numbers<[1], [0], [0], [1], [0, 0, 1, 1], [], []>} : vector<40x64xbf16>, vector<64x128xbf16>, vector<40x128xf32> -> vector<40x128xf32>
    %c0_158 = arith.constant 0 : index
    %c0_159 = arith.constant 0 : index
    %332 = vector.load %arg17[%c0_158, %c0_159] : memref<1x128xf32, #tpu.memory_space<vmem>>, vector<1x128xf32>
    %333 = vector.broadcast %332 : vector<1x128xf32> to vector<40x128xf32>
    %334 = arith.addf %331, %333 : vector<40x128xf32>
    %cst_160 = arith.constant 0.000000e+00 : f32
    %335 = vector.broadcast %cst_160 : f32 to vector<40x128xf32>
    %336 = arith.maximumf %334, %335 : vector<40x128xf32>
    %c0_161 = arith.constant 0 : index
    %c0_162 = arith.constant 0 : index
    %337 = vector.load %arg22[%c0_161, %c0_162] : memref<40x128xf32, #tpu.memory_space<vmem>>, vector<40x128xf32>
    tpu.vector_store %arg22[%c0_161, %c0_162], %336 {strides = array<i32>} : memref<40x128xf32, #tpu.memory_space<vmem>>, vector<40x128xf32>,
    %c0_163 = arith.constant 0 : index
    %c0_164 = arith.constant 0 : index
    %338 = vector.load %arg20[%c0_163, %c0_164] : memref<64x128xbf16, #tpu.memory_space<vmem>>, vector<64x128xbf16>
    %339 = arith.truncf %328 : vector<24x64xf32> to vector<24x64xbf16>
    %cst_165 = arith.constant dense<0.000000e+00> : vector<24x128xf32>
    %340 = tpu.matmul %339, %338, %cst_165 {dimension_numbers = #tpu.dot_dimension_numbers<[1], [0], [0], [1], [0, 0, 1, 1], [], []>} : vector<24x64xbf16>, vector<64x128xbf16>, vector<24x128xf32> -> vector<24x128xf32>
    %c0_166 = arith.constant 0 : index
    %c0_167 = arith.constant 0 : index
    %341 = vector.load %arg21[%c0_166, %c0_167] : memref<1x128xf32, #tpu.memory_space<vmem>>, vector<1x128xf32>
    %342 = vector.broadcast %341 : vector<1x128xf32> to vector<24x128xf32>
    %343 = arith.addf %340, %342 : vector<24x128xf32>
    %c0_168 = arith.constant 0 : index
    %c0_169 = arith.constant 0 : index
    %344 = vector.load %arg23[%c0_168, %c0_169] : memref<24x128xf32, #tpu.memory_space<vmem>>, vector<24x128xf32>
    tpu.vector_store %arg23[%c0_168, %c0_169], %343 {strides = array<i32>} : memref<24x128xf32, #tpu.memory_space<vmem>>, vector<24x128xf32>,
    return
  }
}

</mosaic_0001>

<bundles_post_ra>
// kernel: forward.1
= control target key start
LH: loop header
LB: loop body
LE: loop exit
PB: predicated region body
PF: predicated region fallthrough
CT: control target
= control target key end

     0   :  { %s4692_s0 = inlined_call_operand.vmem [shape: f32[72,48], index: 0, kind: input, shape index: {}]   ;;  %s4693_s1 = inlined_call_operand.hbm [shape: bf16[48,96], index: 1, kind: input, shape index: {}]   ;;  %s4694_s2 = inlined_call_operand.vmem [shape: f32[72,96], index: 2, kind: input, shape index: {}]   ;;  %s4695_s3 = inlined_call_operand.vmem [shape: bf16[96,64], index: 3, kind: input, shape index: {}]   ;;  %s4696_s4 = inlined_call_operand.vmem [shape: f32[72,64], index: 4, kind: input, shape index: {}]   ;;  %s4697_s5 = inlined_call_operand.vmem [shape: bf16[40,32], index: 5, kind: input, shape index: {}]   ;;  %s4698_s6 = inlined_call_operand.hbm [shape: bf16[24,48], index: 6, kind: input, shape index: {}]   ;;  %s4699_s7 = inlined_call_operand.hbm [shape: bf16[8,64], index: 7, kind: input, shape index: {}]   ;;  %s4700_s8 = inlined_call_operand.vmem [shape: f32[40,2], index: 8, kind: input, shape index: {}]   ;;  %s4701_s9 = inlined_call_operand.vmem [shape: f32[24,2], index: 9, kind: input, shape index: {}]   ;;  %s4702_s10 = inlined_call_operand.vmem [shape: f32[8,2], index: 10, kind: input, shape index: {}]   ;;  %s4703_s11 = inlined_call_operand.vmem [shape: bf16[6,64,192], index: 11, kind: input, shape index: {}]   ;;  %s4704_s12 = inlined_call_operand.hbm [shape: f32[12,64], index: 12, kind: input, shape index: {}]   ;;  %s4705_s13 = inlined_call_operand.hbm [shape: f32[6,64], index: 13, kind: input, shape index: {}]   ;;  %s4706_s14 = inlined_call_operand.vmem [shape: bf16[2,64,64], index: 14, kind: input, shape index: {}]   ;;  %s4707_s15 = inlined_call_operand.hbm [shape: f32[2,64], index: 15, kind: input, shape index: {}]   ;;  %s4708_s16 = inlined_call_operand.hbm [shape: bf16[64,128], index: 16, kind: input, shape index: {}]   ;;  %s4709_s17 = inlined_call_operand.hbm [shape: f32[1,128], index: 17, kind: input, shape index: {}]   ;;  %s4710_s18 = inlined_call_operand.vmem [shape: bf16[2,64,64], index: 18, kind: input, shape index: {}]   ;;  %s4711_s19 = inlined_call_operand.hbm [shape: f32[2,64], index: 19, kind: input, shape index: {}]   ;;  %s4712_s20 = inlined_call_operand.hbm [shape: bf16[64,128], index: 20, kind: input, shape index: {}]   ;;  %s4713_s21 = inlined_call_operand.hbm [shape: f32[1,128], index: 21, kind: input, shape index: {}]   ;;  %s4714_s22 = inlined_call_operand.vmem [shape: f32[40,128], index: 22, kind: output, shape index: {0}]   ;;  %s4715_s23 = inlined_call_operand.vmem [shape: f32[24,128], index: 23, kind: output, shape index: {1}]  }
   0x1   :  { %4760 = sst [smem:[#allocation64_spill]] %s4692_s0 }
   0x2   :  { %4761 = sst [smem:[#allocation65_spill]] %s4693_s1 }
   0x3   :  { %4762 = sst [smem:[#allocation66_spill]] %s4694_s2 }
   0x4   :  { %4763 = sst [smem:[#allocation67_spill]] %s4695_s3 }
   0x5   :  { %4764 = sst [smem:[#allocation68_spill]] %s4696_s4 }
   0x6   :  { %4765 = sst [smem:[#allocation69_spill]] %s4697_s5 }
   0x7   :  { %4766 = sst [smem:[#allocation70_spill]] %s4698_s6 }
   0x8   :  { %4767 = sst [smem:[#allocation71_spill]] %s4699_s7 }
   0x9   :  { %4768 = sst [smem:[#allocation72_spill]] %s4715_s23 }
   0xa   :  { %29 = vsyncpa [#allocation3], 0 }
   0xb   :  { %30 = vsyncpa [#allocation5], 0 }
   0xc   :  { %31 = vsyncpa [#allocation8], 0 }
   0xd   :  { %32 = vsyncpa [#allocation11], 0 }
   0xe   :  { %33 = vsyncpa [#allocation14], 0 }
   0xf   :  { %34 = vsyncpa [#allocation17], 0  ;;  %s4769_s24 = sld [smem:[#allocation70_spill]]  ;;  %s3271_s5 = smov [#allocation4]  }
  0x10   :  { %s64_s1 = sshll.u32 %s3271_s5, 4  ;;  %s94_s6 = sshll.u32 %s4704_s12, 4  ;;  %s65_s1 = int_to_ptr.vmem [resolvable:$true] %s64_s1  ;;  %s95_s6 = int_to_ptr.hbm [resolvable:$true] %s94_s6 }
  0x11   :  { %s4722_s27 = smov 64   ;;  %s3273_s7 = smov 4  }
  0x12   :  { %s3274_s28 = smov [#allocation7]   ;;  %s3275_s3 = smov 128  }
  0x13   :  { %s96_s29 = sshll.u32 %s3274_s28, 4  ;;  %s3276_s0 = smov 8   ;;  %s97_s29 = int_to_ptr.vmem [resolvable:$true] %s96_s29 }
  0x14   :  { %102 = dma.hbm_to_vmem [thread:$0]  %s95_s6, 256, %s97_s29, [#allocation8], %s3275_s3, %s3275_s3, %s3276_s0  }
  0x15   :  { %s62_s25 = sshll.u32 %s4769_s24, 4  ;;  %s121_s24 = sshll.u32 %s4707_s15, 4  ;;  %s63_s25 = int_to_ptr.hbm [resolvable:$true] %s62_s25  ;;  %s122_s24 = int_to_ptr.hbm [resolvable:$true] %s121_s24 }
  0x16   :  { %70 = dma.hbm_to_vmem [thread:$0]  %s63_s25, 192, %s65_s1, [#allocation5], %s4722_s27, %s4722_s27, %s3273_s7  }
  0x17   :  { %s3277_s5 = smov [#allocation10]   ;;  %s145_s23 = sshll.u32 %s4709_s17, 4  ;;  %s146_s23 = int_to_ptr.hbm [resolvable:$true] %s145_s23 }
  0x18   :  { %s123_s12 = sshll.u32 %s3277_s5, 4  ;;  %s3278_s25 = smov [#allocation13]   ;;  %s124_s12 = int_to_ptr.vmem [resolvable:$true] %s123_s12 }
  0x19   :  { %126 = dma.hbm_to_vmem [thread:$0]  %s122_s24, 32, %s124_s12, [#allocation11]  }
  0x1a   :  { %s147_s1 = sshll.u32 %s3278_s25, 4  ;;  %s168_s6 = sshll.u32 %s4712_s20, 4  ;;  %s148_s1 = int_to_ptr.vmem [resolvable:$true] %s147_s1  ;;  %s169_s6 = int_to_ptr.hbm [resolvable:$true] %s168_s6 }
  0x1b   :  { %150 = dma.hbm_to_vmem [thread:$0]  %s146_s23, 16, %s148_s1, [#allocation14]  }
  0x1c   :  { %s4770_s3 = sld [smem:[#allocation65_spill]]  ;;  %s3279_s4 = smov [#allocation16]  }
  0x1d   :  { %s170_s30 = sshll.u32 %s3279_s4, 4  ;;  %s4771_s17 = smov 64   ;;  %s171_s30 = int_to_ptr.vmem [resolvable:$true] %s170_s30 }
  0x1e   :  { %176 = dma.hbm_to_vmem [thread:$0]  %s169_s6, 512, %s171_s30, [#allocation17], %s4771_s17, %s4771_s17, %s3273_s7  }
  0x1f   :  { %s3280_s24 = smov [#allocation2]   ;;  %s4772_s20 = sld [smem:[#allocation71_spill]] }
  0x20   :  { %s43_s5 = sshll.u32 %s3280_s24, 4  ;;  %s108_s25 = sshll.u32 %s4705_s13, 4  ;;  %s44_s5 = int_to_ptr.vmem [resolvable:$true] %s43_s5  ;;  %s109_s25 = int_to_ptr.hbm [resolvable:$true] %s108_s25 }
  0x21   :  { %s3281_s1 = smov [#allocation6]   ;;  %s3282_s6 = smov [#allocation9]  }
  0x22   :  { %s41_s0 = sshll.u32 %s4770_s3, 4  ;;  %s78_s28 = sshll.u32 %s3281_s1, 4  ;;  %s42_s0 = int_to_ptr.hbm [resolvable:$true] %s41_s0  ;;  %s79_s28 = int_to_ptr.vmem [resolvable:$true] %s78_s28 }
  0x23   :  { %49 = dma.hbm_to_vmem [thread:$0]  %s42_s0, 384, %s44_s5, [#allocation3], %s4771_s17, %s4771_s17, %s3273_s7  }
  0x24   :  { %s110_s15 = sshll.u32 %s3282_s6, 4  ;;  %s131_s4 = sshll.u32 %s4708_s16, 4  ;;  %s111_s15 = int_to_ptr.vmem [resolvable:$true] %s110_s15  ;;  %s132_s4 = int_to_ptr.hbm [resolvable:$true] %s131_s4 }
  0x25   :  { %s76_s26 = sshll.u32 %s4772_s20, 4  ;;  %s158_s24 = sshll.u32 %s4711_s19, 4  ;;  %s77_s26 = int_to_ptr.hbm [resolvable:$true] %s76_s26  ;;  %s159_s24 = int_to_ptr.hbm [resolvable:$true] %s158_s24 }
  0x26   :  { %81 = dma.hbm_to_vmem [thread:$0]  %s77_s26, 64, %s79_s28, [#allocation5]  }
  0x27   :  { %113 = dma.hbm_to_vmem [thread:$0]  %s109_s25, 128, %s111_s15, [#allocation8]  }
  0x28   :  { %s3283_s5 = smov [#allocation12]   ;;  %s3284_s12 = smov [#allocation15]  }
  0x29   :  { %s133_s13 = sshll.u32 %s3283_s5, 4  ;;  %s160_s27 = sshll.u32 %s3284_s12, 4  ;;  %s134_s13 = int_to_ptr.vmem [resolvable:$true] %s133_s13  ;;  %s161_s27 = int_to_ptr.vmem [resolvable:$true] %s160_s27 }
  0x2a   :  { %139 = dma.hbm_to_vmem [thread:$0]  %s132_s4, 512, %s134_s13, [#allocation11], %s4771_s17, %s4771_s17, %s3273_s7  }
  0x2b   :  { %s182_s16 = sshll.u32 %s4713_s21, 4  ;;  %s3285_s23 = smov [#allocation18]   ;;  %s183_s16 = int_to_ptr.hbm [resolvable:$true] %s182_s16 }
  0x2c   :  { %163 = dma.hbm_to_vmem [thread:$0]  %s159_s24, 32, %s161_s27, [#allocation14]  }
  0x2d   :  { %s184_s2 = sshll.u32 %s3285_s23, 4  ;;  %s185_s2 = int_to_ptr.vmem [resolvable:$true] %s184_s2 }
  0x2e   :  { %187 = dma.hbm_to_vmem [thread:$0]  %s183_s16, 16, %s185_s2, [#allocation17]  }
  0x2f   :  { %3259 = dma.done.wait [#allocation3], 384  }
  0x30   :  { %3260 = vsyncadd [#allocation3], 4294966912 }
  0x31   :  { %3261 = dma.done.wait [#allocation5], 256  }
  0x32   :  { %3262 = vsyncadd [#allocation5], 4294967040 }
  0x33   :  { %3263 = dma.done.wait [#allocation8], 384  }
  0x34   :  { %3264 = vsyncadd [#allocation8], 4294966912 }
  0x35   :  { %3265 = dma.done.wait [#allocation11], 544  }
  0x36   :  { %3266 = vsyncadd [#allocation11], 4294966752 }
  0x37   :  { %3267 = dma.done.wait [#allocation14], 48  }
  0x38   :  { %3268 = vsyncadd [#allocation14], 4294967248 }
  0x39   :  { %3269 = dma.done.wait [#allocation17], 528  }
  0x3a   :  { %3270 = vsyncadd [#allocation17], 4294966768  ;;  %v2855_v0 = vld [vmem:[#allocation2 + $0x10] sm:$0xff]  ;;  %v2854_v1 = vld [vmem:[#allocation2 + $0x8] sm:$0xff]  ;;  %vm280_vm0 = vcmask 392192   ;;  %s4773_s7 = sld [smem:[#allocation64_spill]] }
  0x3b   :  { %301 = vmatpush.bf16.msra.mxu0 %v2855_v0  ;;  %2937 = vmatpush.bf16.msra.mxu2 %v2855_v0  ;;  %v2853_v2 = vld [vmem:[#allocation2] sm:$0xff]  ;;  %s4774_s24 = sld [smem:[#allocation67_spill]]  ;;  %vm400_vm1 = vcmask 785408   ;;  %v2438_v52 = vld [vmem:[%s4703_s11 + $0x30] sm:$0xf]  ;;  %vm706_vm2 = vcmask 523264  }
  0x3c   :  { %s4775_s30 = sld [smem:[#allocation66_spill]]  ;;  %v2872_v53 = vld [vmem:[%s4703_s11 + $0x34] sm:$0xf0]  ;;  %v2871_v54 = vld [vmem:[%s4703_s11 + $0x34] sm:$0xf]  ;;  %vm950_vm3 = vcmask 261120  }
  0x3d   :  { %v3533_v56 = vor.u32 %v2872_v53, %v2438_v52  ;;  %v2440_v57 = vld [vmem:[%s4703_s11 + $0x38] sm:$0xf0]  ;;  %s4784_s20 = sld [smem:[#allocation68_spill]] }
  0x3e   :  { %v3538_v58 = vor.u32 %v2871_v54, %v2440_v57  ;;  %s4790_s4 = sld [smem:[#allocation69_spill]] }
  0x3f   :  { %302 = vmatpush.bf16.msra.mxu0 %v2854_v1  ;;  %2938 = vmatpush.bf16.msra.mxu2 %v2854_v1  ;;  %s4856_s16 = sld [smem:[#allocation72_spill]] }
  0x40   :  { %v233_v3 = vld [vmem:[%s4773_s7] sm:$0xff]  ;;  %v234_v4 = vld [vmem:[%s4773_s7 + $0x8] sm:$0xff]  ;;  %v235_v6 = vld [vmem:[%s4773_s7 + $0x10] sm:$0xff]  ;;  %735 = vmatpush.bf16.msra.mxu3 %v3538_v58 }
  0x41   :  { %v248_v5 = vpack.c.bf16 %v234_v4, %v233_v3  ;;  %v236_v7 = vld [vmem:[%s4773_s7 + $0x18] sm:$0xff]  ;;  %v241_v9 = vld [vmem:[%s4773_s7 + $0x40] sm:$0xff]  ;;  %v2861_v10 = vld [vmem:[%s4774_s24 + $0x28] sm:$0xff] }
  0x42   :  { %v249_v8 = vpack.c.bf16 %v236_v7, %v235_v6  ;;  %v252_v11 = vpack.c.bf16 %v241_v9, %v241_v9  ;;  %418 = vmatpush.bf16.msra.mxu1 %v2861_v10  ;;  %v2860_v12 = vld [vmem:[%s4774_s24 + $0x20] sm:$0xff]  ;;  %v238_v14 = vld [vmem:[%s4773_s7 + $0x28] sm:$0xff]  ;;  %v239_v16 = vld [vmem:[%s4773_s7 + $0x30] sm:$0xff] }
  0x43   :  { %303 = vmatpush.bf16.msra.mxu0 %v2853_v2  ;;  %2939 = vmatpush.bf16.msra.mxu2 %v2853_v2  ;;  %v237_v13 = vld [vmem:[%s4773_s7 + $0x20] sm:$0xff]  ;;  %v240_v17 = vld [vmem:[%s4773_s7 + $0x38] sm:$0xff]  ;;  %v2858_v20 = vld [vmem:[%s4774_s24 + $0x10] sm:$0xff] }
  0x44   :  { %v250_v15 = vpack.c.bf16 %v238_v14, %v237_v13  ;;  %v251_v18 = vpack.c.bf16 %v240_v17, %v239_v16  ;;  %v2859_v19 = vld [vmem:[%s4774_s24 + $0x18] sm:$0xff]  ;;  %v2857_v21 = vld [vmem:[%s4774_s24 + $0x8] sm:$0xff]  ;;  %v2856_v22 = vld [vmem:[%s4774_s24] sm:$0xff] }
  0x45   :  { %v253_v24 = vld [vmem:[%s4775_s30] sm:$0xff]  ;;  %v254_v25 = vld [vmem:[%s4775_s30 + $0x8] sm:$0xff]  ;;  %v255_v33 = vld [vmem:[%s4775_s30 + $0x10] sm:$0xff] }
  0x46   :  { %2378 = vmatmul.msk.bf16.vlgmr.msra.gmra.mxu0 %vm280_vm0, %v248_v5  ;;  %2382 = vmatmul.msk.bf16.vlgmr.msra.gmra.mxu2 %vm280_vm0, %v252_v11  ;;  %v256_v35 = vld [vmem:[%s4775_s30 + $0x18] sm:$0xff]  ;;  %v257_v43 = vld [vmem:[%s4775_s30 + $0x20] sm:$0xff]  ;;  %v258_v45 = vld [vmem:[%s4775_s30 + $0x28] sm:$0xff] }
  0x47   :  { %419 = vmatpush.bf16.msra.mxu1 %v2860_v12  ;;  %v259_v59 = vld [vmem:[%s4775_s30 + $0x30] sm:$0xff]  ;;  %717 = vmatpush.bf16.msrb.mxu2 %v3533_v56  ;;  %v260_v61 = vld [vmem:[%s4775_s30 + $0x38] sm:$0xff]  ;;  %v261_v3 = vld [vmem:[%s4775_s30 + $0x40] sm:$0xff] }
  0x48   :  { %v2430_v7 = vld [vmem:[%s4703_s11 + $0x20] sm:$0xf]  ;;  %v2869_v9 = vld [vmem:[%s4703_s11 + $0x24] sm:$0xf]  ;;  %v2432_v11 = vld [vmem:[%s4703_s11 + $0x28] sm:$0xf0] }
  0x49   :  { %v3567_v12 = vor.u32 %v2869_v9, %v2432_v11  ;;  %v2422_v13 = vld [vmem:[%s4703_s11 + $0x10] sm:$0xf]  ;;  %v2868_v14 = vld [vmem:[%s4703_s11 + $0x14] sm:$0xf0]  ;;  %v2424_v17 = vld [vmem:[%s4703_s11 + $0x18] sm:$0xf0] }
  0x4a   :  { %v3579_v16 = vor.u32 %v2868_v14, %v2422_v13  ;;  %v2882_v9 = vld [vmem:[%s4703_s11 + $0x84] sm:$0xf0]  ;;  %v359_v14 = vld [vmem:[%s4784_s20 + $0x20] sm:$0xff] }
  0x4b   :  { %420 = vmatpush.bf16.msra.mxu1 %v2859_v19  ;;  %736 = vmatpush.bf16.msra.mxu3 %v3567_v12  ;;  %v2414_v19 = vld [vmem:[%s4703_s11] sm:$0xf] }
  0x4c   :  { %4776 = vst [vmem:[#allocation25_spill] sm:$0xff] %v3579_v16 }
  0x4f   :  { %421 = vmatpush.bf16.msra.mxu1 %v2858_v20  ;;  %v2866_v20 = vld [vmem:[%s4703_s11 + $0x4] sm:$0xf0] }
  0x53   :  { %422 = vmatpush.bf16.msra.mxu1 %v2857_v21  ;;  %v2865_v21 = vld [vmem:[%s4703_s11 + $0x4] sm:$0xf] }
  0x56   :  { %2379 = vmatmul.msk.bf16.gmra.mxu0 %vm280_vm0, %v249_v8  ;;  %v2870_v8 = vld [vmem:[%s4703_s11 + $0x24] sm:$0xf0] }
  0x57   :  { %423 = vmatpush.bf16.msra.mxu1 %v2856_v22  ;;  %v3562_v10 = vor.u32 %v2870_v8, %v2430_v7  ;;  %v3598_v22 = vor.u32 %v2866_v20, %v2414_v19  ;;  %v2504_v8 = vld [vmem:[%s4703_s11 + $0x80] sm:$0xf] }
  0x58   :  { %v3735_v13 = vor.u32 %v2882_v9, %v2504_v8 }
  0x59   :  { %718 = vmatpush.bf16.msrb.mxu2 %v3562_v10  ;;  %4777 = vst [vmem:[#allocation26_spill] sm:$0xff] %v3598_v22 }
  0x5a   :  { %4789 = vst [vmem:[#allocation37_spill] sm:$0xff] %v3735_v13 }
  0x5d   :  { %719 = vmatpush.bf16.msrb.mxu2 %v3579_v16 }
  0x61   :  { %720 = vmatpush.bf16.msrb.mxu2 %v3598_v22 }
  0x66   :  { %2380 = vmatmul.msk.bf16.gmra.mxu0 %vm280_vm0, %v250_v15  ;;  %v2867_v15 = vld [vmem:[%s4703_s11 + $0x14] sm:$0xf] }
  0x76   :  { %2381 = vmatmul.msk.bf16.gmra.mxu0 %vm280_vm0, %v251_v18  ;;  %v3585_v18 = vor.u32 %v2867_v15, %v2424_v17  ;;  %v358_v15 = vld [vmem:[%s4784_s20 + $0x18] sm:$0xff] }
  0x78   :  { %737 = vmatpush.bf16.msra.mxu3 %v3585_v18 }
  0xc3   :  { %v305_v23 = vpop.f32.mrf.mxu0 }
  0xc4   :  { %v306_v26 = vadd.f32 %v305_v23, %v253_v24  ;;  %v2416_v23 = vld [vmem:[%s4703_s11 + $0x8] sm:$0xf0] }
  0xc5   :  { %v3603_v24 = vor.u32 %v2865_v21, %v2416_v23  ;;  %v2887_v23 = vld [vmem:[%s4703_s11 + $0xb4] sm:$0xf] }
  0xc6   :  { %v329_v29 = vmax.f32 %v306_v26, 0.0  ;;  %v2880_v26 = vld [vmem:[%s4703_s11 + $0x74] sm:$0xf0] }
  0xc7   :  { %738 = vmatpush.bf16.msra.mxu3 %v3603_v24 }
  0xc9   :  { %v325_v41 = vpop.f32.mrf.mxu2 }
  0xca   :  { %v326_v4 = vadd.f32 %v325_v41, %v261_v3 }
  0xcb   :  { %v307_v27 = vpop.f32.mrf.mxu0 }
  0xcc   :  { %v308_v28 = vadd.f32 %v307_v27, %v254_v25  ;;  %v337_v5 = vmax.f32 %v326_v4, 0.0  ;;  %v2482_v25 = vld [vmem:[%s4703_s11 + $0x70] sm:$0xf]  ;;  %v2879_v27 = vld [vmem:[%s4703_s11 + $0x74] sm:$0xf] }
  0xce   :  { %v330_v30 = vmax.f32 %v308_v28, 0.0  ;;  %v354_v6 = vpack.c.bf16 %v337_v5, %v337_v5  ;;  %v3616_v28 = vor.u32 %v2880_v26, %v2482_v25  ;;  %v2512_v5 = vld [vmem:[%s4703_s11 + $0x90] sm:$0xf]  ;;  %v2530_v25 = vld [vmem:[%s4703_s11 + $0xb8] sm:$0xf0] }
  0xcf   :  { %v3756_v26 = vor.u32 %v2887_v23, %v2530_v25 }
  0xd0   :  { %v350_v31 = vpack.c.bf16 %v330_v30, %v329_v29  ;;  %4778 = vst [vmem:[#allocation27_spill] sm:$0xff] %v3616_v28  ;;  %v2484_v29 = vld [vmem:[%s4703_s11 + $0x78] sm:$0xf0]  ;;  %814 = vmatpush.bf16.msra.mxu2 %v3616_v28 }
  0xd1   :  { %v327_v46 = vpop.f32.mrf.mxu2  ;;  %v3621_v30 = vor.u32 %v2879_v27, %v2484_v29  ;;  %v2885_v27 = vld [vmem:[%s4703_s11 + $0xa4] sm:$0xf]  ;;  %v2522_v29 = vld [vmem:[%s4703_s11 + $0xa8] sm:$0xf0] }
  0xd2   :  { %2407 = vmatmul.msk.bf16.vlgmr.msra.gmra.mxu1 %vm400_vm1, %v350_v31  ;;  %v2474_v31 = vld [vmem:[%s4703_s11 + $0x60] sm:$0xf] }
  0xd3   :  { %v310_v32 = vpop.f32.mrf.mxu0  ;;  %4779 = vst [vmem:[#allocation28_spill] sm:$0xff] %v3621_v30  ;;  %837 = vmatpush.bf16.msrb.mxu3 %v3621_v30  ;;  %v2458_v46 = vld [vmem:[%s4703_s11 + $0x40] sm:$0xf] }
  0xd4   :  { %v311_v34 = vadd.f32 %v310_v32, %v255_v33  ;;  %v2878_v32 = vld [vmem:[%s4703_s11 + $0x64] sm:$0xf0]  ;;  %v2877_v33 = vld [vmem:[%s4703_s11 + $0x64] sm:$0xf] }
  0xd6   :  { %v331_v37 = vmax.f32 %v311_v34, 0.0 }
  0xdb   :  { %v312_v36 = vpop.f32.mrf.mxu0 }
  0xdc   :  { %v313_v38 = vadd.f32 %v312_v36, %v256_v35  ;;  %v3634_v35 = vor.u32 %v2878_v32, %v2474_v31  ;;  %v2476_v36 = vld [vmem:[%s4703_s11 + $0x68] sm:$0xf0]  ;;  %v3767_v31 = vor.u32 %v2885_v27, %v2522_v29  ;;  %v2883_v32 = vld [vmem:[%s4703_s11 + $0x94] sm:$0xf]  ;;  %v3287_v27 = vmov 1  }
  0xdd   :  { %2959 = vset.pattern.permute.xlu1 %v3287_v27 }
  0xde   :  { %v332_v39 = vmax.f32 %v313_v38, 0.0  ;;  %4780 = vst [vmem:[#allocation29_spill] sm:$0xff] %v3634_v35  ;;  %815 = vmatpush.bf16.msra.mxu2 %v3634_v35  ;;  %v2466_v38 = vld [vmem:[%s4703_s11 + $0x50] sm:$0xf] }
  0xe0   :  { %v351_v40 = vpack.c.bf16 %v332_v39, %v331_v37  ;;  %v3639_v37 = vor.u32 %v2877_v33, %v2476_v36  ;;  %v2876_v39 = vld [vmem:[%s4703_s11 + $0x54] sm:$0xf0]  ;;  %v2514_v33 = vld [vmem:[%s4703_s11 + $0x98] sm:$0xf0] }
  0xe1   :  { %v3652_v41 = vor.u32 %v2876_v39, %v2466_v38  ;;  %v3776_v36 = vor.u32 %v2883_v32, %v2514_v33  ;;  %v2881_v38 = vld [vmem:[%s4703_s11 + $0x84] sm:$0xf]  ;;  %v2506_v39 = vld [vmem:[%s4703_s11 + $0x88] sm:$0xf0] }
  0xe2   :  { %2408 = vmatmul.msk.bf16.gmra.mxu1 %vm400_vm1, %v351_v40  ;;  %4781 = vst [vmem:[#allocation30_spill] sm:$0xff] %v3639_v37  ;;  %838 = vmatpush.bf16.msrb.mxu3 %v3639_v37  ;;  %v2875_v40 = vld [vmem:[%s4703_s11 + $0x54] sm:$0xf]  ;;  %v463_v33 = vld [vmem:[%s4701_s9] sm:$0xff] }
  0xe3   :  { %v315_v42 = vpop.f32.mrf.mxu0  ;;  %4782 = vst [vmem:[#allocation31_spill] sm:$0xff] %v3652_v41  ;;  %816 = vmatpush.bf16.msra.mxu2 %v3652_v41  ;;  %v2902_v41 = vld [vmem:[%s4703_s11 + $0x124] sm:$0xf0] }
  0xe4   :  { %v316_v44 = vadd.f32 %v315_v42, %v257_v43  ;;  %v2468_v42 = vld [vmem:[%s4703_s11 + $0x58] sm:$0xf0] }
  0xe5   :  { %v3657_v43 = vor.u32 %v2875_v40, %v2468_v42  ;;  %v361_v40 = vld [vmem:[%s4784_s20 + $0x30] sm:$0xff]  ;;  %v360_v42 = vld [vmem:[%s4784_s20 + $0x28] sm:$0xff] }
  0xe6   :  { %v333_v48 = vmax.f32 %v316_v44, 0.0  ;;  %v355_v44 = vld [vmem:[%s4784_s20] sm:$0xff] }
  0xe7   :  { %4783 = vst [vmem:[#allocation32_spill] sm:$0xff] %v3657_v43  ;;  %839 = vmatpush.bf16.msrb.mxu3 %v3657_v43 }
  0xeb   :  { %v317_v47 = vpop.f32.mrf.mxu0 }
  0xec   :  { %v318_v49 = vadd.f32 %v317_v47, %v258_v45  ;;  %v356_v45 = vld [vmem:[%s4784_s20 + $0x8] sm:$0xff] }
  0xed   :  { %v2874_v47 = vld [vmem:[%s4703_s11 + $0x44] sm:$0xf0] }
  0xee   :  { %v334_v50 = vmax.f32 %v318_v49, 0.0 }
  0xf0   :  { %v352_v51 = vpack.c.bf16 %v334_v50, %v333_v48  ;;  %v2873_v48 = vld [vmem:[%s4703_s11 + $0x44] sm:$0xf]  ;;  %v3676_v50 = vor.u32 %v2874_v47, %v2458_v46 }
  0xf2   :  { %2409 = vmatmul.msk.bf16.gmra.mxu1 %vm400_vm1, %v352_v51  ;;  %4785 = vst [vmem:[#allocation33_spill] sm:$0xff] %v3676_v50  ;;  %v2460_v51 = vld [vmem:[%s4703_s11 + $0x48] sm:$0xf0]  ;;  %817 = vmatpush.bf16.msra.mxu2 %v3676_v50 }
  0xf3   :  { %v320_v55 = vpop.f32.mrf.mxu0  ;;  %v3685_v54 = vor.u32 %v2873_v48, %v2460_v51 }
  0xf4   :  { %v321_v60 = vadd.f32 %v320_v55, %v259_v59  ;;  %v2528_v59 = vld [vmem:[%s4703_s11 + $0xb0] sm:$0xf] }
  0xf5   :  { %4786 = vst [vmem:[#allocation34_spill] sm:$0xff] %v3685_v54  ;;  %840 = vmatpush.bf16.msrb.mxu3 %v3685_v54 }
  0xf6   :  { %v335_v63 = vmax.f32 %v321_v60, 0.0  ;;  %v2888_v60 = vld [vmem:[%s4703_s11 + $0xb4] sm:$0xf0] }
  0xfb   :  { %v322_v62 = vpop.f32.mrf.mxu0 }
  0xfc   :  { %v323_v0 = vadd.f32 %v322_v62, %v260_v61  ;;  %v357_v61 = vld [vmem:[%s4784_s20 + $0x10] sm:$0xff]  ;;  %v3702_v62 = vor.u32 %v2888_v60, %v2528_v59  ;;  %v362_v59 = vld [vmem:[%s4784_s20 + $0x38] sm:$0xff] }
  0xfe   :  { %v336_v1 = vmax.f32 %v323_v0, 0.0  ;;  %913 = vmatpush.bf16.msrb.mxu0 %v3702_v62  ;;  %v2520_v0 = vld [vmem:[%s4703_s11 + $0xa0] sm:$0xf] }
 0x100   :  { %v353_v2 = vpack.c.bf16 %v336_v1, %v335_v63  ;;  %v2886_v1 = vld [vmem:[%s4703_s11 + $0xa4] sm:$0xf0] }
 0x101   :  { %v3713_v3 = vor.u32 %v2886_v1, %v2520_v0 }
 0x102   :  { %2410 = vmatmul.msk.bf16.gmra.mxu1 %vm400_vm1, %v353_v2 }
 0x103   :  { %4787 = vst [vmem:[#allocation35_spill] sm:$0xff] %v3713_v3  ;;  %914 = vmatpush.bf16.msrb.mxu0 %v3713_v3 }
 0x112   :  { %2411 = vmatmul.msk.bf16.gmra.mxu1 %vm400_vm1, %v354_v6  ;;  %v2884_v6 = vld [vmem:[%s4703_s11 + $0x94] sm:$0xf0] }
 0x113   :  { %v3724_v7 = vor.u32 %v2884_v6, %v2512_v5 }
 0x115   :  { %4788 = vst [vmem:[#allocation36_spill] sm:$0xff] %v3724_v7  ;;  %915 = vmatpush.bf16.msrb.mxu0 %v3724_v7 }
 0x119   :  { %916 = vmatpush.bf16.msrb.mxu0 %v3735_v13 }
 0x14f   :  { %v425_v34 = vpop.f32.mrf.mxu1 }
 0x150   :  { %v3681_v52 = vadd.f32 %v425_v34, %v355_v44  ;;  %v3791_v44 = vor.u32 %v2881_v38, %v2506_v39 }
 0x157   :  { %v427_v49 = vpop.f32.mrf.mxu1 }
 0x158   :  { %v3683_v53 = vadd.f32 %v427_v49, %v356_v45  ;;  %v363_v49 = vld [vmem:[%s4784_s20 + $0x40] sm:$0xff] }
 0x15a   :  { %v664_v55 = vpack.c.bf16 %v3683_v53, %v3681_v52 }
 0x15c   :  { %2444 = vmatmul.msk.bf16.vlgmr.msrb.gmra.mxu2 %vm706_vm2, %v664_v55  ;;  %2446 = vmatmul.msk.bf16.vlgmr.msra.gmra.mxu3 %vm706_vm2, %v664_v55 }
 0x15d   :  { %926 = vmatpush.bf16.msrb.mxu2 %v3756_v26 }
 0x15f   :  { %v430_v57 = vpop.f32.mrf.mxu1 }
 0x160   :  { %v3705_v63 = vadd.f32 %v430_v57, %v357_v61 }
 0x161   :  { %927 = vmatpush.bf16.msrb.mxu2 %v3767_v31 }
 0x162   :  { %v665_v4 = vpack.c.bf16 %v3705_v63, %v3705_v63 }
 0x165   :  { %928 = vmatpush.bf16.msrb.mxu2 %v3776_v36 }
 0x167   :  { %v432_v2 = vpop.f32.mrf.mxu1 }
 0x168   :  { %v3746_v20 = vadd.f32 %v432_v2, %v358_v15 }
 0x169   :  { %929 = vmatpush.bf16.msrb.mxu2 %v3791_v44 }
 0x16c   :  { %2445 = vmatmul.msk.bf16.gmra.mxu2 %vm706_vm2, %v665_v4  ;;  %2447 = vmatmul.msk.bf16.gmra.mxu3 %vm706_vm2, %v665_v4 }
 0x16f   :  { %v435_v11 = vpop.f32.mrf.mxu1 }
 0x170   :  { %v3744_v17 = vadd.f32 %v435_v11, %v359_v14 }
 0x172   :  { %v758_v21 = vpack.c.bf16 %v3744_v17, %v3746_v20 }
 0x177   :  { %v437_v19 = vpop.f32.mrf.mxu1 }
 0x178   :  { %v3795_v47 = vadd.f32 %v437_v19, %v360_v42  ;;  %v3286_v19 = vmov 0  }
 0x179   :  { %2958 = vset.pattern.permute.xlu0 %v3286_v19  ;;  %2957 = vset.pattern.permute.xlu2 %v3286_v19 }
 0x17c   :  { %2488 = vmatmul.msk.bf16.vlgmr.msra.gmra.mxu2 %vm706_vm2, %v758_v21  ;;  %2491 = vmatmul.msk.bf16.vlgmr.msrb.gmra.mxu3 %vm706_vm2, %v758_v21 }
 0x17f   :  { %v440_v34 = vpop.f32.mrf.mxu1 }
 0x180   :  { %v3793_v45 = vadd.f32 %v440_v34, %v361_v40 }
 0x182   :  { %v759_v48 = vpack.c.bf16 %v3793_v45, %v3795_v47 }
 0x187   :  { %v442_v46 = vpop.f32.mrf.mxu1 }
 0x188   :  { %v3813_v60 = vadd.f32 %v442_v46, %v362_v59  ;;  %v3848_v46 = vld [vmem:[%s4790_s4] sm:$0xff] }
 0x18a   :  { %v760_v0 = vpack.c.bf16 %v3813_v60, %v3813_v60 }
 0x18c   :  { %2489 = vmatmul.msk.bf16.gmra.mxu2 %vm706_vm2, %v759_v48  ;;  %2492 = vmatmul.msk.bf16.gmra.mxu3 %vm706_vm2, %v759_v48 }
 0x18f   :  { %v445_v51 = vpop.f32.mrf.mxu1 }
 0x190   :  { %v3805_v55 = vadd.f32 %v445_v51, %v363_v49  ;;  %v464_v51 = vld [vmem:[%s4701_s9 + $0x8] sm:$0xff] }
 0x192   :  { %v865_v57 = vpack.c.bf16 %v3805_v55, %v3805_v55 }
 0x194   :  { %2534 = vmatmul.msk.bf16.vlgmr.msrb.gmra.mxu0 %vm706_vm2, %v865_v57 }
 0x197   :  { %v447_v61 = vpop.f32.mrf.mxu1 }
 0x19c   :  { %2490 = vmatmul.msk.bf16.gmra.mxu2 %vm706_vm2, %v760_v0  ;;  %2493 = vmatmul.msk.bf16.gmra.mxu3 %vm706_vm2, %v760_v0  ;;  %v459_v0 = vld [vmem:[%s4700_s8 + $0x8] sm:$0xff] }
 0x1ac   :  { %2535 = vmatmul.msk.bf16.vlgmr.msrb.gmra.mxu2 %vm706_vm2, %v865_v57 }
 0x1df   :  { %v722_v1 = vpop.f32.mrf.mxu2  ;;  %v3820_v2 = vpop.f32.mrf.mxu3 }
 0x1e7   :  { %v724_v4 = vpop.f32.mrf.mxu2  ;;  %v3822_v5 = vpop.f32.mrf.mxu3 }
 0x1e8   :  { %v935_v39 = vpack.c.bf16 %v724_v4, %v722_v1 }
 0x1ef   :  { %v727_v6 = vpop.f32.mrf.mxu2  ;;  %v3824_v8 = vpop.f32.mrf.mxu3 }
 0x1f0   :  { %v1031_v48 = vpack.c.bf16 %v727_v6, %v724_v4 }
 0x1f7   :  { %v729_v9 = vpop.f32.mrf.mxu2  ;;  %v747_v11 = vpop.f32.mrf.mxu3 }
 0x1f8   :  { %v3867_v9 = vld [vmem:[%s4790_s4 + $0x8] sm:$0xff] }
 0x1ff   :  { %v819_v14 = vpop.f32.mrf.mxu2  ;;  %v3826_v15 = vpop.f32.mrf.mxu3 }
 0x207   :  { %v821_v21 = vpop.f32.mrf.mxu2  ;;  %v3830_v23 = vpop.f32.mrf.mxu3 }
 0x208   :  { %v3832_v25 = vpack.c.bf16 %v821_v21, %v819_v14  ;;  %v466_v14 = vld [vmem:[%s4702_s10] sm:$0xff] }
 0x20a   :  { %1036 = vrot.lane.b32.xlu2 %v3832_v25, %s4771_s17 }
 0x20f   :  { %v824_v29 = vpop.f32.mrf.mxu2  ;;  %v3837_v32 = vpop.f32.mrf.mxu3 }
 0x211   :  { %v918_v34 = vpop.f32.mrf.mxu0 }
 0x212   :  { %v936_v38 = vpack.c.bf16 %v918_v34, %v727_v6  ;;  %989 = vrot.lane.b32.xlu0 %v918_v34, %s4771_s17  ;;  %541 = vperm.xlu2 %2957, %v463_v33   ;;  %v453_v34 = vld [vmem:[%s4790_s4 + $0x10] sm:$0xf] }
 0x214   :  { %966 = vmatpush.bf16.msra.mxu3 %v936_v38  ;;  %v946_v38 = vunpack.c.l.b16 %v453_v34  ;;  %v3904_v34 = vld [vmem:[#allocation4] sm:$0xff] }
 0x217   :  { %v826_v40 = vpop.f32.mrf.mxu2  ;;  %v3843_v42 = vpop.f32.mrf.mxu3 }
 0x218   :  { %967 = vmatpush.bf16.msra.mxu3 %v935_v39  ;;  %v993_v11 = vpack.c.bf16 %v826_v40, %v824_v29  ;;  %v465_v29 = vld [vmem:[%s4701_s9 + $0x10] sm:$0xff]  ;;  %v3887_v40 = vpack.c.b16 %v946_v38, %v946_v38 }
 0x219   :  { %v920_v49 = vpop.f32.mrf.mxu0  ;;  %v2968_v38 = vld [vmem:[#allocation7 + $0x8] ss:$0 sm:$0xff] }
 0x21a   :  { %1042 = vrot.lane.b32.xlu0 %v1031_v48, %s4771_s17  ;;  %2960 = vset.pattern.permute.xlu2 %v3287_v27  ;;  %v460_v48 = vld [vmem:[%s4700_s8 + $0x10] sm:$0xff]  ;;  %v461_v49 = vld [vmem:[%s4700_s8 + $0x18] sm:$0xff] }
 0x21b   :  { %2544 = vmatmul.msk.bf16.vlgmr.msra.gmra.mxu3 %vm950_vm3, %v3848_v46  ;;  %564 = vperm.xlu2 %2960, %v464_v51  }
 0x21f   :  { %v829_v57 = vpop.f32.mrf.mxu2  ;;  %v3857_v59 = vpop.f32.mrf.mxu3 }
 0x220   :  { %v1030_v61 = vpack.c.bf16 %v722_v1, %v829_v57  ;;  %v458_v1 = vld [vmem:[%s4700_s8] sm:$0xff] }
 0x222   :  { %1040 = vrot.lane.b32.xlu1 %v1030_v61, %s4771_s17  ;;  %546 = vperm.xlu0 %2958, %v464_v51  }
 0x223   :  { %2962 = vset.pattern.permute.xlu2 %v3286_v19 }
 0x224   :  { %475 = vperm.xlu2 %2962, %v459_v0  }
 0x227   :  { %v854_v4 = vpop.f32.mrf.mxu3  ;;  %v831_v6 = vpop.f32.mrf.mxu2 }
 0x22a   :  { %1038 = vrot.lane.b32.xlu1 %v993_v11, %s4771_s17  ;;  %2963 = vset.pattern.permute.xlu0 %v3287_v27 }
 0x22b   :  { %2545 = vmatmul.msk.bf16.gmra.mxu3 %vm950_vm3, %v3867_v9  ;;  %501 = vperm.xlu0 %2963, %v458_v1  }
 0x22c   :  { %586 = vperm.xlu2 %2962, %v466_v14  }
 0x22f   :  { %v3879_v21 = vpop.f32.mrf.mxu2 }
 0x232   :  { %560 = vperm.xlu1 %2959, %v463_v33   ;;  %v462_v33 = vld [vmem:[%s4700_s8 + $0x20] sm:$0xff] }
 0x233   :  { %568 = vperm.xlu0 %2963, %v465_v29  }
 0x234   :  { %551 = vperm.xlu2 %2962, %v465_v29  }
 0x237   :  { %v933_v39 = vpop.f32.mrf.mxu2 }
 0x23a   :  { %2961 = vset.pattern.permute.xlu1 %v3286_v19 }
 0x23b   :  { %2546 = vmatmul.msk.bf16.gmra.mxu3 %vm950_vm3, %v3887_v40  ;;  %470 = vperm.xlu1 %2961, %v458_v1  }
 0x23c   :  { %509 = vperm.xlu0 %2963, %v460_v48   ;;  %485 = vperm.xlu2 %2962, %v461_v49  }
 0x243   :  { %2964 = vset.pattern.permute.xlu1 %v3287_v27 }
 0x244   :  { %505 = vperm.xlu1 %2964, %v459_v0   ;;  %517 = vperm.xlu0 %2963, %v462_v33  }
 0x245   :  { %490 = vperm.xlu2 %2962, %v462_v33  }
 0x24c   :  { %593 = vperm.xlu1 %2964, %v466_v14   ;;  %v2970_v14 = vld [vmem:[#allocation7 + $0x9] ss:$0 sm:$0xff] }
 0x254   :  { %2965 = vset.pattern.permute.xlu1 %v3286_v19  ;;  %v2969_v19 = vld [vmem:[#allocation7 + $0x3] ss:$0 sm:$0xff] }
 0x255   :  { %480 = vperm.xlu1 %2965, %v460_v48  }
 0x25d   :  { %2966 = vset.pattern.permute.xlu1 %v3287_v27  ;;  %v2967_v27 = vld [vmem:[#allocation7 + $0x2] ss:$0 sm:$0xff] }
 0x25e   :  { %513 = vperm.xlu1 %2966, %v461_v49  }
 0x264   :  { %v1037_v51 = vpop.permute.xlu2 %1036 }
 0x26c   :  { %v542_v61 = vpop.permute.xlu2 %541 }
 0x275   :  { %v565_v1 = vpop.permute.xlu2 %564 }
 0x276   :  { %v573_v39 = vmul.f32 %v2969_v19, %v565_v1 }
 0x27e   :  { %v3907_v0 = vpop.permute.xlu2 %475 }
 0x284   :  { %v990_v4 = vpop.permute.xlu0 %989 }
 0x285   :  { %v994_v6 = vpack.c.bf16 %v990_v4, %v829_v57  ;;  %v636_v57 = vmul.f32 %v2970_v14, %v565_v1  ;;  %v2904_v4 = vld [vmem:[%s4703_s11 + $0x134] sm:$0xf0]  ;;  %v456_v1 = vld [vmem:[#allocation4 + $0x8] sm:$0xf] }
 0x286   :  { %v1000_v35 = vunpack.c.l.b16 %v456_v1  ;;  %v2608_v1 = vld [vmem:[%s4703_s11 + $0x100] sm:$0xf] }
 0x287   :  { %1014 = vmatpush.bf16.msrb.mxu1 %v994_v6 }
 0x28b   :  { %1015 = vmatpush.bf16.msrb.mxu1 %v993_v11 }
 0x28c   :  { %v1043_v29 = vpop.permute.xlu0 %1042 }
 0x28d   :  { %1055 = vmatpush.bf16.msra.mxu0 %v1043_v29 }
 0x28f   :  { %1016 = vmatpush.bf16.msrb.mxu1 %v3832_v25  ;;  %v2632_v25 = vld [vmem:[%s4703_s11 + $0x130] sm:$0xf] }
 0x290   :  { %v3917_v6 = vor.u32 %v2904_v4, %v2632_v25 }
 0x292   :  { %2551 = vmatmul.msk.bf16.vlgmr.msrb.gmra.mxu1 %vm280_vm0, %v3904_v34  ;;  %4791 = vst [vmem:[#allocation38_spill] sm:$0xff] %v3917_v6 }
 0x293   :  { %1250 = vmatpush.bf16.msra.mxu1 %v3917_v6  ;;  %v3941_v6 = vpack.c.b16 %v1000_v35, %v1000_v35 }
 0x294   :  { %v1041_v48 = vpop.permute.xlu1 %1040  ;;  %v547_v49 = vpop.permute.xlu0 %546 }
 0x295   :  { %1056 = vmatpush.bf16.msra.mxu0 %v1041_v48  ;;  %v556_v11 = vmul.f32 %v2967_v27, %v547_v49  ;;  %v631_v33 = vmul.f32 %v2968_v38, %v547_v49  ;;  %v3924_v48 = vpop.permute.xlu2 %586  ;;  %v2624_v49 = vld [vmem:[%s4703_s11 + $0x120] sm:$0xf]  ;;  %4794 = vst [vmem:[#allocation41_spill] sm:$0xff] %v3941_v6 }
 0x296   :  { %v3932_v25 = vor.u32 %v2902_v41, %v2624_v49  ;;  %v3946_v41 = vld [vmem:[#allocation6] sm:$0xf]  ;;  %v2898_v49 = vld [vmem:[%s4703_s11 + $0x104] sm:$0xf0] }
 0x297   :  { %v3919_v29 = vadd.f32 %v573_v39, %v556_v11  ;;  %v3921_v50 = vadd.f32 %v636_v57, %v631_v33  ;;  %v2616_v11 = vld [vmem:[%s4703_s11 + $0x110] sm:$0xf]  ;;  %v2900_v33 = vld [vmem:[%s4703_s11 + $0x114] sm:$0xf0]  ;;  %v3956_v35 = vor.u32 %v2898_v49, %v2608_v1  ;;  %v3967_v49 = vld [vmem:[#allocation7 + $0x7] ss:$0 sm:$0xff] }
 0x298   :  { %4793 = vst [vmem:[#allocation40_spill] sm:$0xff] %v3932_v25  ;;  %1251 = vmatpush.bf16.msra.mxu1 %v3932_v25 }
 0x299   :  { %4792 = vst [vmem:[#allocation39_spill] sm:$0xff] %v3921_v50  ;;  %v3943_v50 = vor.u32 %v2900_v33, %v2616_v11  ;;  %v630_v11 = vmul.f32 %v2968_v38, %v542_v61 }
 0x29a   :  { %4796 = vst [vmem:[#allocation43_spill] sm:$0xff] %v3956_v35 }
 0x29b   :  { %4795 = vst [vmem:[#allocation42_spill] sm:$0xff] %v3943_v50 }
 0x29c   :  { %v1039_v39 = vpop.permute.xlu1 %1038  ;;  %1252 = vmatpush.bf16.msra.mxu1 %v3943_v50 }
 0x29d   :  { %1057 = vmatpush.bf16.msra.mxu0 %v1039_v39  ;;  %v502_v57 = vpop.permute.xlu0 %501  ;;  %v555_v39 = vmul.f32 %v2967_v27, %v542_v61  ;;  %v552_v33 = vpop.permute.xlu2 %551  ;;  %v3965_v61 = vld [vmem:[#allocation7 + $0x1] ss:$0 sm:$0xff] }
 0x29e   :  { %v969_v4 = vpop.f32.mrf.mxu3  ;;  %v557_v50 = vmul.f32 %v2967_v27, %v552_v33  ;;  %v632_v25 = vmul.f32 %v2968_v38, %v552_v33  ;;  %v3973_v38 = vld [vmem:[#allocation7] ss:$0 sm:$0xff]  ;;  %v3975_v33 = vld [vmem:[#allocation7 + $0x6] ss:$0 sm:$0xff] }
 0x2a0   :  { %1253 = vmatpush.bf16.msra.mxu1 %v3956_v35 }
 0x2a1   :  { %1058 = vmatpush.bf16.msra.mxu0 %v1037_v51 }
 0x2a2   :  { %2552 = vmatmul.msk.bf16.gmra.mxu1 %vm280_vm0, %v3941_v6 }
 0x2a4   :  { %2553 = vmatmul.msk.bf16.vlgmr.msra.gmra.mxu0 %vm706_vm2, %v3946_v41  ;;  %v561_v51 = vpop.permute.xlu1 %560 }
 0x2a5   :  { %v572_v28 = vmul.f32 %v2969_v19, %v561_v51  ;;  %v635_v54 = vmul.f32 %v2970_v14, %v561_v51  ;;  %v569_v43 = vpop.permute.xlu0 %568  ;;  %v521_v51 = vmul.f32 %v3965_v61, %v502_v57 }
 0x2a6   :  { %v971_v37 = vpop.f32.mrf.mxu3  ;;  %v574_v13 = vmul.f32 %v2969_v19, %v569_v43  ;;  %v637_v30 = vmul.f32 %v2970_v14, %v569_v43  ;;  %v611_v43 = vmul.f32 %v3967_v49, %v502_v57  ;;  %v605_v57 = vmul.f32 %v3975_v33, %v3907_v0 }
 0x2a7   :  { %v3961_v6 = vadd.f32 %v572_v28, %v555_v39  ;;  %v3963_v1 = vadd.f32 %v635_v54, %v630_v11  ;;  %v3981_v39 = vld [vmem:[#allocation9] ss:$0 sm:$0xff]  ;;  %v970_v11 = vadd.f32 %v969_v4, %v3826_v15  ;;  %v2978_v15 = vld [vmem:[#allocation7 + $0x5] ss:$0 sm:$0xff]  ;;  %v2979_v4 = vld [vmem:[#allocation7 + $0xb] ss:$0 sm:$0xff] }
 0x2a8   :  { %v3969_v22 = vadd.f32 %v574_v13, %v557_v50  ;;  %v3971_v27 = vadd.f32 %v637_v30, %v632_v25  ;;  %v495_v25 = vmul.f32 %v3973_v38, %v3907_v0 }
 0x2a9   :  { %4797 = vst [vmem:[#allocation44_spill] sm:$0xff] %v3963_v1 }
 0x2aa   :  { %4798 = vst [vmem:[#allocation45_spill] sm:$0xff] %v3971_v27 }
 0x2ad   :  { %v471_v28 = vpop.permute.xlu1 %470 }
 0x2ae   :  { %v494_v54 = vmul.f32 %v3973_v38, %v471_v28  ;;  %v604_v19 = vmul.f32 %v3975_v33, %v471_v28  ;;  %v974_v14 = vpop.f32.mrf.mxu3 }
 0x2b0   :  { %v526_v50 = vadd.f32 %v521_v51, %v494_v54  ;;  %v3983_v13 = vadd.f32 %v611_v43, %v604_v19  ;;  %v2975_v43 = vld [vmem:[#allocation7 + $0x4] ss:$0 sm:$0xff]  ;;  %v2976_v54 = vld [vmem:[#allocation7 + $0xa] ss:$0 sm:$0xff] }
 0x2b1   :  { %v590_v16 = vmul.f32 %v2975_v43, %v3924_v48 }
 0x2b2   :  { %4799 = vst [vmem:[#allocation46_spill] sm:$0xff] %v3983_v13  ;;  %v3986_v30 = vadd.f32 %v3981_v39, %v526_v50  ;;  %v972_v13 = vadd.f32 %v971_v37, %v3830_v23 }
 0x2b4   :  { %4800 = vst [vmem:[#allocation47_spill] sm:$0xff] %v3986_v30  ;;  %v983_v28 = vadd.f32 %v970_v11, %v3986_v30  ;;  %v648_v11 = vmul.f32 %v2976_v54, %v3924_v48  ;;  %v510_v48 = vpop.permute.xlu0 %509  ;;  %v4015_v54 = vpop.permute.xlu2 %485 }
 0x2b6   :  { %v976_v35 = vpop.f32.mrf.mxu3  ;;  %v506_v27 = vpop.permute.xlu1 %505  ;;  %v1065_v7 = vmax.f32 %v983_v28, 0.0 }
 0x2b7   :  { %v522_v1 = vmul.f32 %v3965_v61, %v506_v27  ;;  %v612_v51 = vmul.f32 %v3967_v49, %v506_v27 }
 0x2b9   :  { %v527_v19 = vadd.f32 %v522_v1, %v495_v25  ;;  %v3996_v50 = vadd.f32 %v612_v51, %v605_v57  ;;  %v1070_v1 = vadd.f32 %v1065_v7, %v3746_v20  ;;  %v523_v7 = vmul.f32 %v3965_v61, %v510_v48 }
 0x2bb   :  { %v4000_v0 = vadd.f32 %v3981_v39, %v527_v19  ;;  %v4011_v19 = vmul.f32 0.5, %v1070_v1  ;;  %v975_v1 = vadd.f32 %v974_v14, %v3837_v32 }
 0x2bd   :  { %4801 = vst [vmem:[#allocation48_spill] sm:$0xff] %v4000_v0  ;;  %v984_v30 = vadd.f32 %v972_v13, %v4000_v0 }
 0x2be   :  { %v979_v27 = vpop.f32.mrf.mxu3  ;;  %v594_v3 = vpop.permute.xlu1 %593 }
 0x2bf   :  { %v1066_v25 = vmax.f32 %v984_v30, 0.0  ;;  %v597_v57 = vmul.f32 %v2978_v15, %v594_v3  ;;  %v651_v51 = vmul.f32 %v2979_v4, %v594_v3  ;;  %v613_v3 = vmul.f32 %v3967_v49, %v510_v48 }
 0x2c1   :  { %v1071_v37 = vadd.f32 %v1066_v25, %v3744_v17  ;;  %v4007_v23 = vadd.f32 %v597_v57, %v590_v16  ;;  %v4009_v28 = vadd.f32 %v651_v51, %v648_v11  ;;  %v497_v25 = vmul.f32 %v3973_v38, %v4015_v54  ;;  %v4035_v57 = vpop.permute.xlu2 %490  ;;  %v4037_v51 = vpop.permute.xlu0 %517 }
 0x2c2   :  { %v498_v32 = vmul.f32 %v3973_v38, %v4035_v57 }
 0x2c3   :  { %v4013_v43 = vmul.f32 0.5, %v1071_v37 }
 0x2c5   :  { %v4019_v13 = vpack.c.bf16 %v4013_v43, %v4011_v19 }
 0x2c6   :  { %v981_v17 = vpop.f32.mrf.mxu3 }
 0x2c7   :  { %v481_v16 = vpop.permute.xlu1 %480  ;;  %2638 = vmatmul.msk.bf16.vlgmr.msra.gmra.mxu1 %vm706_vm2, %v4019_v13  ;;  %v977_v17 = vadd.f32 %v976_v35, %v3843_v42 }
 0x2c8   :  { %v496_v20 = vmul.f32 %v3973_v38, %v481_v16  ;;  %v606_v30 = vmul.f32 %v3975_v33, %v481_v16 }
 0x2ca   :  { %v528_v15 = vadd.f32 %v523_v7, %v496_v20  ;;  %v4027_v4 = vadd.f32 %v613_v3, %v606_v30  ;;  %v525_v3 = vmul.f32 %v3965_v61, %v4037_v51 }
 0x2cc   :  { %v4030_v11 = vadd.f32 %v3981_v39, %v528_v15  ;;  %v530_v30 = vadd.f32 %v525_v3, %v498_v32  ;;  %v2590_v3 = vld [vmem:[%s4703_s11 + $0xf8] sm:$0xf0] }
 0x2ce   :  { %4802 = vst [vmem:[#allocation49_spill] sm:$0xff] %v4030_v11  ;;  %v985_v48 = vadd.f32 %v975_v1, %v4030_v11  ;;  %v4055_v0 = vadd.f32 %v3981_v39, %v530_v30 }
 0x2d0   :  { %v4039_v37 = vpop.permute.xlu1 %513  ;;  %v1067_v16 = vmax.f32 %v985_v48, 0.0  ;;  %4804 = vst [vmem:[#allocation51_spill] sm:$0xff] %v4055_v0 }
 0x2d1   :  { %v524_v7 = vmul.f32 %v3965_v61, %v4039_v37  ;;  %v980_v61 = vadd.f32 %v979_v27, %v3857_v59  ;;  %v2588_v59 = vld [vmem:[%s4703_s11 + $0xf0] sm:$0xf]  ;;  %v2896_v27 = vld [vmem:[%s4703_s11 + $0xf4] sm:$0xf0] }
 0x2d2   :  { %v1072_v11 = vadd.f32 %v1067_v16, %v3795_v47  ;;  %v2893_v16 = vld [vmem:[%s4703_s11 + $0xe4] sm:$0xf] }
 0x2d3   :  { %v529_v14 = vadd.f32 %v524_v7, %v497_v25  ;;  %v987_v35 = vadd.f32 %v980_v61, %v4055_v0  ;;  %v2572_v61 = vld [vmem:[%s4703_s11 + $0xd0] sm:$0xf] }
 0x2d4   :  { %v4059_v25 = vmul.f32 0.5, %v1072_v11  ;;  %v4088_v11 = vor.u32 %v2896_v27, %v2588_v59  ;;  %v2678_v27 = vld [vmem:[%s4703_s11 + $0x170] sm:$0xf] }
 0x2d5   :  { %v4050_v20 = vadd.f32 %v3981_v39, %v529_v14  ;;  %v1069_v47 = vmax.f32 %v987_v35, 0.0  ;;  %v2580_v14 = vld [vmem:[%s4703_s11 + $0xe0] sm:$0xf]  ;;  %v2891_v35 = vld [vmem:[%s4703_s11 + $0xd4] sm:$0xf] }
 0x2d6   :  { %1153 = vmatpush.bf16.msra.mxu2 %v4088_v11 }
 0x2d7   :  { %4803 = vst [vmem:[#allocation50_spill] sm:$0xff] %v4050_v20  ;;  %v986_v15 = vadd.f32 %v977_v17, %v4050_v20  ;;  %v1074_v39 = vadd.f32 %v1069_v47, %v3813_v60  ;;  %v2895_v60 = vld [vmem:[%s4703_s11 + $0xf4] sm:$0xf]  ;;  %v2894_v17 = vld [vmem:[%s4703_s11 + $0xe4] sm:$0xf0] }
 0x2d8   :  { %v4093_v32 = vor.u32 %v2895_v60, %v2590_v3  ;;  %v4106_v30 = vor.u32 %v2894_v17, %v2580_v14  ;;  %v2912_v60 = vld [vmem:[%s4703_s11 + $0x174] sm:$0xf0]  ;;  %v2564_v14 = vld [vmem:[%s4703_s11 + $0xc0] sm:$0xf]  ;;  %v2890_v17 = vld [vmem:[%s4703_s11 + $0xc4] sm:$0xf0] }
 0x2d9   :  { %v1068_v1 = vmax.f32 %v986_v15, 0.0  ;;  %v4071_v7 = vmul.f32 0.5, %v1074_v39  ;;  %v2582_v15 = vld [vmem:[%s4703_s11 + $0xe8] sm:$0xf0]  ;;  %v2574_v39 = vld [vmem:[%s4703_s11 + $0xd8] sm:$0xf0]  ;;  %v4138_v3 = vor.u32 %v2912_v60, %v2678_v27 }
 0x2da   :  { %4806 = vst [vmem:[#allocation53_spill] sm:$0xff] %v4093_v32  ;;  %1171 = vmatpush.bf16.msrb.mxu0 %v4093_v32  ;;  %1154 = vmatpush.bf16.msra.mxu2 %v4106_v30  ;;  %v4129_v59 = vor.u32 %v2891_v35, %v2574_v39  ;;  %v2670_v35 = vld [vmem:[%s4703_s11 + $0x160] sm:$0xf]  ;;  %v2910_v39 = vld [vmem:[%s4703_s11 + $0x164] sm:$0xf0] }
 0x2db   :  { %v1073_v38 = vadd.f32 %v1068_v1, %v3793_v45  ;;  %4805 = vst [vmem:[#allocation52_spill] sm:$0xff] %v4071_v7  ;;  %v4075_v45 = vpack.c.bf16 %v4071_v7, %v4071_v7  ;;  %v4111_v1 = vor.u32 %v2893_v16, %v2582_v15  ;;  %v2889_v16 = vld [vmem:[%s4703_s11 + $0xc4] sm:$0xf]  ;;  %1349 = vmatpush.bf16.msrb.mxu3 %v4138_v3  ;;  %v2662_v60 = vld [vmem:[%s4703_s11 + $0x150] sm:$0xf] }
 0x2dc   :  { %4808 = vst [vmem:[#allocation55_spill] sm:$0xff] %v4129_v59  ;;  %v4151_v15 = vor.u32 %v2890_v17, %v2564_v14  ;;  %v4165_v27 = vor.u32 %v2910_v39, %v2670_v35  ;;  %v2908_v14 = vld [vmem:[%s4703_s11 + $0x154] sm:$0xf0] }
 0x2dd   :  { %v4061_v42 = vmul.f32 0.5, %v1073_v38  ;;  %4807 = vst [vmem:[#allocation54_spill] sm:$0xff] %v4111_v1  ;;  %v2892_v38 = vld [vmem:[%s4703_s11 + $0xd4] sm:$0xf0]  ;;  %v4175_v17 = vor.u32 %v2908_v14, %v2662_v60  ;;  %v2903_v14 = vld [vmem:[%s4703_s11 + $0x134] sm:$0xf] }
 0x2de   :  { %1172 = vmatpush.bf16.msrb.mxu0 %v4111_v1  ;;  %v4124_v47 = vor.u32 %v2892_v38, %v2572_v61  ;;  %v2566_v61 = vld [vmem:[%s4703_s11 + $0xc8] sm:$0xf0]  ;;  %4810 = vst [vmem:[#allocation57_spill] sm:$0xff] %v4165_v27  ;;  %v2980_v39 = vld [vmem:[#allocation9 + $0x1] ss:$0 sm:$0xff] }
 0x2df   :  { %v4066_v48 = vpack.c.bf16 %v4061_v42, %v4059_v25  ;;  %v4156_v38 = vor.u32 %v2889_v16, %v2566_v61  ;;  %1350 = vmatpush.bf16.msrb.mxu3 %v4165_v27  ;;  %4811 = vst [vmem:[#allocation58_spill] sm:$0xff] %v4175_v17  ;;  %v2654_v16 = vld [vmem:[%s4703_s11 + $0x140] sm:$0xf]  ;;  %v2906_v61 = vld [vmem:[%s4703_s11 + $0x144] sm:$0xf0]  ;;  %v4189_v60 = vadd.f32 %v2980_v39, %v3961_v6 }
 0x2e0   :  { %1155 = vmatpush.bf16.msra.mxu2 %v4124_v47  ;;  %v4184_v35 = vor.u32 %v2906_v61, %v2654_v16  ;;  %v2911_v16 = vld [vmem:[%s4703_s11 + $0x174] sm:$0xf]  ;;  %v2626_v1 = vld [vmem:[%s4703_s11 + $0x128] sm:$0xf0]  ;;  %v4263_v27 = vadd.f32 %v2980_v39, %v3969_v22 }
 0x2e1   :  { %2639 = vmatmul.msk.bf16.gmra.mxu1 %vm706_vm2, %v4066_v48  ;;  %4809 = vst [vmem:[#allocation56_spill] sm:$0xff] %v4156_v38 }
 0x2e2   :  { %1173 = vmatpush.bf16.msrb.mxu0 %v4129_v59  ;;  %4812 = vst [vmem:[#allocation59_spill] sm:$0xff] %v4184_v35  ;;  %v2901_v59 = vld [vmem:[%s4703_s11 + $0x124] sm:$0xf] }
 0x2e3   :  { %1351 = vmatpush.bf16.msrb.mxu3 %v4175_v17  ;;  %4813 = vst [vmem:[#allocation60_spill] sm:$0xff] %v4189_v60  ;;  %v4213_v32 = vor.u32 %v2901_v59, %v2626_v1  ;;  %v2907_v59 = vld [vmem:[%s4703_s11 + $0x154] sm:$0xf]  ;;  %v2897_v17 = vld [vmem:[%s4703_s11 + $0x104] sm:$0xf] }
 0x2e4   :  { %1156 = vmatpush.bf16.msra.mxu2 %v4151_v15 }
 0x2e5   :  { %4815 = vst [vmem:[#allocation62_spill] sm:$0xff] %v4213_v32 }
 0x2e6   :  { %1174 = vmatpush.bf16.msrb.mxu0 %v4156_v38  ;;  %v2634_v38 = vld [vmem:[%s4703_s11 + $0x138] sm:$0xf0] }
 0x2e7   :  { %1352 = vmatpush.bf16.msrb.mxu3 %v4184_v35  ;;  %v4200_v61 = vor.u32 %v2903_v14, %v2634_v38  ;;  %v2909_v38 = vld [vmem:[%s4703_s11 + $0x164] sm:$0xf] }
 0x2e9   :  { %4814 = vst [vmem:[#allocation61_spill] sm:$0xff] %v4200_v61  ;;  %1273 = vmatpush.bf16.msrb.mxu2 %v4200_v61 }
 0x2ed   :  { %1274 = vmatpush.bf16.msrb.mxu2 %v4213_v32 }
 0x2f1   :  { %2640 = vmatmul.msk.bf16.gmra.mxu1 %vm706_vm2, %v4075_v45 }
 0x30f   :  { %v1018_v0 = vpop.f32.mrf.mxu1 }
 0x310   :  { %v1019_v20 = vadd.f32 %v1018_v0, %v3820_v2  ;;  %v2680_v2 = vld [vmem:[%s4703_s11 + $0x178] sm:$0xf0] }
 0x311   :  { %v2683_v0 = vor.u32 %v2911_v16, %v2680_v2  ;;  %v2899_v16 = vld [vmem:[%s4703_s11 + $0x114] sm:$0xf]  ;;  %v2618_v2 = vld [vmem:[%s4703_s11 + $0x118] sm:$0xf0] }
 0x312   :  { %v1027_v6 = vadd.f32 %v1019_v20, %v4189_v60  ;;  %v2672_v20 = vld [vmem:[%s4703_s11 + $0x168] sm:$0xf0]  ;;  %v2664_v60 = vld [vmem:[%s4703_s11 + $0x158] sm:$0xf0] }
 0x313   :  { %1362 = vmatpush.bf16.msra.mxu0 %v2683_v0  ;;  %v2675_v14 = vor.u32 %v2909_v38, %v2672_v20  ;;  %v4234_v0 = vadd.f32 %v2980_v39, %v3919_v29  ;;  %v4238_v20 = vor.u32 %v2899_v16, %v2618_v2  ;;  %v2667_v35 = vor.u32 %v2907_v59, %v2664_v60  ;;  %v2656_v29 = vld [vmem:[%s4703_s11 + $0x148] sm:$0xf0] }
 0x314   :  { %v1080_v61 = vmax.f32 %v1027_v6, 0.0  ;;  %v2610_v6 = vld [vmem:[%s4703_s11 + $0x108] sm:$0xf0] }
 0x315   :  { %4816 = vst [vmem:[#allocation63_spill] sm:$0xff] %v4234_v0  ;;  %1275 = vmatpush.bf16.msrb.mxu2 %v4238_v20  ;;  %v4255_v60 = vor.u32 %v2897_v17, %v2610_v6 }
 0x316   :  { %v1083_v16 = vadd.f32 %v1080_v61, %v3681_v52 }
 0x317   :  { %v1020_v1 = vpop.f32.mrf.mxu1  ;;  %1363 = vmatpush.bf16.msra.mxu0 %v2675_v14 }
 0x318   :  { %v1021_v38 = vadd.f32 %v1020_v1, %v3822_v5  ;;  %v2905_v5 = vld [vmem:[%s4703_s11 + $0x144] sm:$0xf]  ;;  %v2981_v1 = vld [vmem:[#allocation9 + $0x2] ss:$0 sm:$0xff] }
 0x319   :  { %v2659_v59 = vor.u32 %v2905_v5, %v2656_v29  ;;  %1276 = vmatpush.bf16.msrb.mxu2 %v4255_v60 }
 0x31a   :  { %v1028_v7 = vadd.f32 %v1021_v38, %v4234_v0  ;;  %v4258_v0 = vmul.f32 0.5, %v1083_v16 }
 0x31b   :  { %1364 = vmatpush.bf16.msra.mxu0 %v2667_v35  ;;  %v4271_v35 = vadd.f32 %v2981_v1, %v4007_v23 }
 0x31c   :  { %v1081_v14 = vmax.f32 %v1028_v7, 0.0 }
 0x31e   :  { %v1084_v2 = vadd.f32 %v1081_v14, %v3683_v53 }
 0x31f   :  { %v1023_v38 = vpop.f32.mrf.mxu1  ;;  %1365 = vmatpush.bf16.msra.mxu0 %v2659_v59 }
 0x320   :  { %v4260_v32 = vmul.f32 0.5, %v1084_v2  ;;  %v1024_v52 = vadd.f32 %v1023_v38, %v3824_v8 }
 0x321   :  { %v1060_v7 = vpop.f32.mrf.mxu0 }
 0x322   :  { %v1101_v17 = vpack.c.bf16 %v4260_v32, %v4258_v0  ;;  %v1029_v53 = vadd.f32 %v1024_v52, %v4263_v27  ;;  %v1061_v61 = vadd.f32 %v1060_v7, %v3879_v21 }
 0x324   :  { %v1064_v6 = vadd.f32 %v1061_v61, %v4271_v35  ;;  %2594 = vmatmul.msk.bf16.vlgmr.msra.gmra.mxu2 %vm706_vm2, %v1101_v17  ;;  %2596 = vmatmul.msk.bf16.vlgmr.msrb.gmra.mxu0 %vm706_vm2, %v1101_v17  ;;  %v1082_v22 = vmax.f32 %v1029_v53, 0.0 }
 0x326   :  { %v1089_v8 = vmax.f32 %v1064_v6, 0.0  ;;  %v1085_v16 = vadd.f32 %v1082_v22, %v3705_v63 }
 0x327   :  { %v1025_v39 = vpop.f32.mrf.mxu1 }
 0x328   :  { %v1090_v5 = vadd.f32 %v1089_v8, %v3805_v55  ;;  %v4283_v23 = vmul.f32 0.5, %v1085_v16 }
 0x329   :  { %v1062_v29 = vpop.f32.mrf.mxu0 }
 0x32a   :  { %v4279_v14 = vmul.f32 0.5, %v1090_v5  ;;  %v1102_v2 = vpack.c.bf16 %v4283_v23, %v4283_v23 }
 0x32c   :  { %v1301_v21 = vpack.c.bf16 %v4279_v14, %v4279_v14 }
 0x32e   :  { %2684 = vmatmul.msk.bf16.vlgmr.msrb.gmra.mxu3 %vm706_vm2, %v1301_v21 }
 0x334   :  { %2595 = vmatmul.msk.bf16.gmra.mxu2 %vm706_vm2, %v1102_v2  ;;  %2597 = vmatmul.msk.bf16.gmra.mxu0 %vm706_vm2, %v1102_v2 }
 0x344   :  { %2641 = vmatmul.msk.bf16.vlgmr.msrb.gmra.mxu2 %vm706_vm2, %v4019_v13  ;;  %2685 = vmatmul.msk.bf16.vlgmr.msra.gmra.mxu0 %vm706_vm2, %v1301_v21  ;;  %v1255_v63 = vpop.f32.mrf.mxu1 }
 0x34c   :  { %v1257_v55 = vpop.f32.mrf.mxu1 }
 0x34d   :  { %v1405_v2 = vpack.c.bf16 %v1257_v55, %v1255_v63  ;;  %v2914_v55 = vld [vmem:[%s4706_s14 + $0x8] sm:$0xff] }
 0x354   :  { %2642 = vmatmul.msk.bf16.gmra.mxu2 %vm706_vm2, %v4066_v48 }
 0x35e   :  { %v1260_v1 = vpop.f32.mrf.mxu1 }
 0x364   :  { %2643 = vmatmul.msk.bf16.gmra.mxu2 %vm706_vm2, %v4075_v45 }
 0x366   :  { %v1262_v59 = vpop.f32.mrf.mxu1 }
 0x367   :  { %v1406_v45 = vpack.c.bf16 %v1262_v59, %v1260_v1 }
 0x36e   :  { %v1265_v38 = vpop.f32.mrf.mxu1 }
 0x376   :  { %v1267_v52 = vpop.f32.mrf.mxu1 }
 0x3a1   :  { %v4297_v7 = vpop.f32.mrf.mxu0 }
 0x3a7   :  { %v1158_v17 = vpop.f32.mrf.mxu2 }
 0x3a8   :  { %v1429_v53 = vpack.c.bf16 %v1158_v17, %v1265_v38 }
 0x3a9   :  { %v4299_v61 = vpop.f32.mrf.mxu0 }
 0x3aa   :  { %1439 = vrot.lane.b32.xlu0 %v1429_v53, %s4771_s17 }
 0x3af   :  { %v1160_v13 = vpop.f32.mrf.mxu2 }
 0x3b0   :  { %v1371_v16 = vpack.c.bf16 %v1160_v13, %v1158_v17 }
 0x3b1   :  { %v4302_v6 = vpop.f32.mrf.mxu0  ;;  %v1354_v48 = vpop.f32.mrf.mxu3 }
 0x3b2   :  { %1402 = vrot.lane.b32.xlu1 %v1354_v48, %s4771_s17 }
 0x3b7   :  { %v1163_v22 = vpop.f32.mrf.mxu2 }
 0x3b8   :  { %v1372_v8 = vpack.c.bf16 %v1354_v48, %v1163_v22  ;;  %v1430_v39 = vpack.c.bf16 %v1163_v22, %v1160_v13  ;;  %v4817_v13 = vld [vmem:[#allocation35_spill] sm:$0xff]  ;;  %v4818_v48 = vld [vmem:[#allocation25_spill] sm:$0xff]  ;;  %v4819_v22 = vld [vmem:[#allocation36_spill] sm:$0xff] }
 0x3b9   :  { %v1183_v5 = vpop.f32.mrf.mxu0  ;;  %v1356_v29 = vpop.f32.mrf.mxu3 }
 0x3ba   :  { %1437 = vrot.lane.b32.xlu1 %v1406_v45, %s4771_s17  ;;  %1441 = vrot.lane.b32.xlu2 %v1430_v39, %s4771_s17  ;;  %v4825_v39 = vld [vmem:[#allocation32_spill] sm:$0xff]  ;;  %v2982_v5 = vld [vmem:[#allocation9 + $0x3] ss:$0 sm:$0xff] }
 0x3bb   :  { %1379 = vmatpush.bf16.msra.mxu3 %v1372_v8  ;;  %v4820_v8 = vld [vmem:[#allocation26_spill] sm:$0xff] }
 0x3bf   :  { %1380 = vmatpush.bf16.msra.mxu3 %v1371_v16  ;;  %v1165_v21 = vpop.f32.mrf.mxu2 }
 0x3c0   :  { %v4827_v21 = vld [vmem:[#allocation46_spill] sm:$0xff] }
 0x3c1   :  { %v4308_v52 = vpop.f32.mrf.mxu0 }
 0x3c2   :  { %2686 = vmatmul.msk.bf16.vlgmr.msra.gmra.mxu3 %vm950_vm3, %v3848_v46  ;;  %1435 = vrot.lane.b32.xlu2 %v1405_v2, %s4771_s17 }
 0x3c3   :  { %1663 = vmatpush.bf16.msrb.mxu3 %v3538_v58 }
 0x3c7   :  { %1664 = vmatpush.bf16.msrb.mxu3 %v3567_v12  ;;  %v1278_v1 = vpop.f32.mrf.mxu2 }
 0x3c9   :  { %v1369_v59 = vpop.f32.mrf.mxu0 }
 0x3ca   :  { %v4360_v59 = vadd.f32 %v2982_v5, %v3996_v50  ;;  %v614_v50 = vmul.f32 %v3967_v49, %v4039_v37  ;;  %v615_v37 = vmul.f32 %v3967_v49, %v4037_v51  ;;  %v2920_v49 = vld [vmem:[%s4710_s18 + $0x18] sm:$0xff]  ;;  %v2917_v51 = vld [vmem:[%s4710_s18] sm:$0xff] }
 0x3cb   :  { %1665 = vmatpush.bf16.msrb.mxu3 %v3585_v18 }
 0x3cf   :  { %1666 = vmatpush.bf16.msrb.mxu3 %v3603_v24  ;;  %v1280_v63 = vpop.f32.mrf.mxu2 }
 0x3d2   :  { %2687 = vmatmul.msk.bf16.gmra.mxu3 %vm950_vm3, %v3867_v9 }
 0x3d3   :  { %1756 = vmatpush.bf16.msra.mxu3 %v3756_v26 }
 0x3d7   :  { %1757 = vmatpush.bf16.msra.mxu3 %v3767_v31  ;;  %v1283_v58 = vpop.f32.mrf.mxu2  ;;  %v2916_v31 = vld [vmem:[%s4706_s14 + $0x18] sm:$0xff] }
 0x3d8   :  { %1538 = vmatpush.bf16.msra.mxu2 %v2916_v31 }
 0x3db   :  { %1758 = vmatpush.bf16.msra.mxu3 %v3776_v36 }
 0x3df   :  { %1759 = vmatpush.bf16.msra.mxu3 %v3791_v44  ;;  %v1285_v12 = vpop.f32.mrf.mxu2  ;;  %v2915_v44 = vld [vmem:[%s4706_s14 + $0x10] sm:$0xff] }
 0x3e0   :  { %1539 = vmatpush.bf16.msra.mxu2 %v2915_v44 }
 0x3e2   :  { %2688 = vmatmul.msk.bf16.gmra.mxu3 %vm950_vm3, %v3887_v40 }
 0x3e4   :  { %1540 = vmatpush.bf16.msra.mxu2 %v2914_v55  ;;  %v4376_v55 = vadd.f32 %v2982_v5, %v4027_v4 }
 0x3e7   :  { %v4324_v18 = vpop.f32.mrf.mxu2 }
 0x3ef   :  { %v1290_v24 = vpop.f32.mrf.mxu2 }
 0x414   :  { %v1442_v46 = vpop.permute.xlu2 %1441 }
 0x415   :  { %1451 = vmatpush.bf16.msrb.mxu1 %v1442_v46 }
 0x41c   :  { %v1440_v26 = vpop.permute.xlu0 %1439  ;;  %v1436_v53 = vpop.permute.xlu2 %1435 }
 0x41d   :  { %1452 = vmatpush.bf16.msrb.mxu1 %v1440_v26 }
 0x424   :  { %v1403_v9 = vpop.permute.xlu1 %1402 }
 0x425   :  { %v1407_v36 = vpack.c.bf16 %v1403_v9, %v1265_v38  ;;  %v2913_v38 = vld [vmem:[%s4706_s14] sm:$0xff]  ;;  %v607_v9 = vmul.f32 %v3975_v33, %v4015_v54 }
 0x426   :  { %1541 = vmatpush.bf16.msra.mxu2 %v2913_v38 }
 0x427   :  { %1413 = vmatpush.bf16.msrb.mxu0 %v1407_v36  ;;  %v619_v36 = vadd.f32 %v614_v50, %v607_v9 }
 0x42a   :  { %1743 = vmatpush.bf16.msrb.mxu2 %v3702_v62  ;;  %v4824_v62 = vld [vmem:[#allocation41_spill] sm:$0xff] }
 0x42b   :  { %1414 = vmatpush.bf16.msrb.mxu0 %v1406_v45  ;;  %v4822_v45 = vld [vmem:[#allocation37_spill] sm:$0xff] }
 0x42c   :  { %v1438_v17 = vpop.permute.xlu1 %1437 }
 0x42d   :  { %1453 = vmatpush.bf16.msrb.mxu1 %v1438_v17  ;;  %v4378_v17 = vadd.f32 %v2982_v5, %v619_v36 }
 0x42e   :  { %1744 = vmatpush.bf16.msrb.mxu2 %v4817_v13 }
 0x42f   :  { %1415 = vmatpush.bf16.msrb.mxu0 %v1405_v2  ;;  %v4357_v2 = vadd.f32 %v2982_v5, %v4827_v21 }
 0x431   :  { %1454 = vmatpush.bf16.msrb.mxu1 %v1436_v53 }
 0x432   :  { %2689 = vmatmul.msk.bf16.vlgmr.msrb.gmra.mxu0 %vm280_vm0, %v3904_v34  ;;  %1745 = vmatpush.bf16.msrb.mxu2 %v4819_v22  ;;  %v4823_v34 = vld [vmem:[#allocation30_spill] sm:$0xff] }
 0x433   :  { %1645 = vmatpush.bf16.msra.mxu0 %v3533_v56  ;;  %v4821_v56 = vld [vmem:[#allocation28_spill] sm:$0xff] }
 0x434   :  { %2691 = vmatmul.msk.bf16.vlgmr.msrb.gmra.mxu1 %vm706_vm2, %v3946_v41 }
 0x435   :  { %1613 = vmatpush.bf16.msra.mxu1 %v2920_v49 }
 0x436   :  { %1746 = vmatpush.bf16.msrb.mxu2 %v4822_v45 }
 0x437   :  { %1646 = vmatpush.bf16.msra.mxu0 %v3562_v10  ;;  %v4826_v10 = vld [vmem:[#allocation34_spill] sm:$0xff] }
 0x43b   :  { %1647 = vmatpush.bf16.msra.mxu0 %v4818_v48 }
 0x43f   :  { %1648 = vmatpush.bf16.msra.mxu0 %v4820_v8 }
 0x442   :  { %2690 = vmatmul.msk.bf16.gmra.mxu0 %vm280_vm0, %v4824_v62 }
 0x443   :  { %1716 = vmatpush.bf16.msrb.mxu0 %v4821_v56 }
 0x445   :  { %v1382_v41 = vpop.f32.mrf.mxu3 }
 0x446   :  { %v1383_v29 = vadd.f32 %v1382_v41, %v1278_v1  ;;  %v4830_v41 = vld [vmem:[#allocation31_spill] sm:$0xff] }
 0x447   :  { %1717 = vmatpush.bf16.msrb.mxu0 %v4823_v34  ;;  %v4829_v34 = vld [vmem:[#allocation29_spill] sm:$0xff] }
 0x448   :  { %v4363_v46 = vadd.f32 %v1383_v29, %v4357_v2 }
 0x44b   :  { %1718 = vmatpush.bf16.msrb.mxu0 %v4825_v39  ;;  %v4831_v39 = vld [vmem:[#allocation33_spill] sm:$0xff] }
 0x44d   :  { %v1384_v16 = vpop.f32.mrf.mxu3 }
 0x44e   :  { %v1385_v24 = vadd.f32 %v1384_v16, %v1280_v63 }
 0x44f   :  { %1719 = vmatpush.bf16.msrb.mxu0 %v4826_v10  ;;  %v2983_v10 = vld [vmem:[#allocation9 + $0x4] ss:$0 sm:$0xff] }
 0x450   :  { %v4366_v26 = vadd.f32 %v1385_v24, %v4360_v59  ;;  %v4832_v24 = vld [vmem:[#allocation44_spill] sm:$0xff] }
 0x452   :  { %v1496_v31 = vpack.c.bf16 %v4366_v26, %v4363_v46 }
 0x454   :  { %2708 = vmatmul.msk.bf16.vlgmr.msra.gmra.mxu2 %vm706_vm2, %v1496_v31  ;;  %v4420_v31 = vadd.f32 %v2983_v10, %v4832_v24 }
 0x455   :  { %v1387_v1 = vpop.f32.mrf.mxu3 }
 0x456   :  { %v1388_v63 = vadd.f32 %v1387_v1, %v1283_v58  ;;  %v608_v58 = vmul.f32 %v3975_v33, %v4035_v57  ;;  %v2919_v33 = vld [vmem:[%s4710_s18 + $0x10] sm:$0xff]  ;;  %v2918_v57 = vld [vmem:[%s4710_s18 + $0x8] sm:$0xff] }
 0x457   :  { %1614 = vmatpush.bf16.msra.mxu1 %v2919_v33 }
 0x458   :  { %v4381_v53 = vadd.f32 %v1388_v63, %v4376_v55  ;;  %v620_v48 = vadd.f32 %v615_v37, %v608_v58  ;;  %v4833_v37 = vld [vmem:[#allocation39_spill] sm:$0xff] }
 0x459   :  { %v4427_v58 = vadd.f32 %v2983_v10, %v4833_v37 }
 0x45a   :  { %v4394_v22 = vadd.f32 %v2982_v5, %v620_v48  ;;  %v2984_v5 = vld [vmem:[#allocation9 + $0x5] ss:$0 sm:$0xff] }
 0x45b   :  { %1615 = vmatpush.bf16.msra.mxu1 %v2918_v57  ;;  %v655_v1 = vadd.f32 %v2984_v5, %v4009_v28  ;;  %v4834_v57 = vld [vmem:[#allocation45_spill] sm:$0xff]  ;;  %v1462_v5 = vmax.f32 %v4366_v26, 0.0 }
 0x45d   :  { %v1389_v44 = vpop.f32.mrf.mxu3 }
 0x45e   :  { %v1390_v38 = vadd.f32 %v1389_v44, %v1285_v12 }
 0x45f   :  { %1616 = vmatpush.bf16.msra.mxu1 %v2917_v51  ;;  %v4444_v51 = vadd.f32 %v2983_v10, %v4834_v57 }
 0x460   :  { %v4384_v13 = vadd.f32 %v1390_v38, %v4378_v17 }
 0x462   :  { %v1497_v54 = vpack.c.bf16 %v4384_v13, %v4381_v53 }
 0x464   :  { %2709 = vmatmul.msk.bf16.gmra.mxu2 %vm706_vm2, %v1497_v54 }
 0x465   :  { %v1392_v4 = vpop.f32.mrf.mxu3 }
 0x466   :  { %v1393_v12 = vadd.f32 %v1392_v4, %v4324_v18  ;;  %v4828_v18 = vld [vmem:[#allocation27_spill] sm:$0xff] }
 0x467   :  { %1693 = vmatpush.bf16.msrb.mxu1 %v4828_v18 }
 0x468   :  { %v4397_v56 = vadd.f32 %v1393_v12, %v4394_v22 }
 0x46a   :  { %v1498_v45 = vpack.c.bf16 %v4397_v56, %v4397_v56 }
 0x46b   :  { %1694 = vmatpush.bf16.msrb.mxu1 %v4829_v34 }
 0x46d   :  { %v1394_v8 = vpop.f32.mrf.mxu3 }
 0x46f   :  { %1695 = vmatpush.bf16.msrb.mxu1 %v4830_v41 }
 0x473   :  { %1696 = vmatpush.bf16.msrb.mxu1 %v4831_v39 }
 0x474   :  { %2710 = vmatmul.msk.bf16.gmra.mxu2 %vm706_vm2, %v1498_v45 }
 0x4af   :  { %v1417_v29 = vpop.f32.mrf.mxu0 }
 0x4b0   :  { %v1418_v16 = vadd.f32 %v1417_v29, %v4297_v7  ;;  %v1461_v29 = vmax.f32 %v4363_v46, 0.0 }
 0x4b1   :  { %v1456_v21 = vpop.f32.mrf.mxu1 }
 0x4b2   :  { %v1457_v9 = vadd.f32 %v1456_v21, %v4308_v52  ;;  %v1426_v50 = vadd.f32 %v1418_v16, %v4420_v31  ;;  %v1463_v21 = vmax.f32 %v4381_v53, 0.0 }
 0x4b4   :  { %v1460_v36 = vadd.f32 %v1457_v9, %v655_v1  ;;  %v1476_v38 = vmax.f32 %v1426_v50, 0.0 }
 0x4b6   :  { %v1485_v63 = vmax.f32 %v1460_v36, 0.0  ;;  %v1479_v52 = vadd.f32 %v1476_v38, %v4258_v0 }
 0x4b7   :  { %v1419_v44 = vpop.f32.mrf.mxu0 }
 0x4b8   :  { %v1486_v54 = vadd.f32 %v1485_v63, %v4279_v14  ;;  %v1420_v7 = vadd.f32 %v1419_v44, %v4299_v61  ;;  %v4439_v61 = vmul.f32 0.5, %v1479_v52  ;;  %v4838_v63 = vld [vmem:[#allocation52_spill] sm:$0xff] }
 0x4b9   :  { %v1458_v4 = vpop.f32.mrf.mxu1 }
 0x4ba   :  { %v4430_v48 = vmul.f32 0.5, %v1486_v54  ;;  %v1427_v28 = vadd.f32 %v1420_v7, %v4427_v58 }
 0x4bc   :  { %v1735_v12 = vpack.c.bf16 %v4430_v48, %v4430_v48  ;;  %v1477_v8 = vmax.f32 %v1427_v28, 0.0  ;;  %v1575_v45 = vpack.c.bf16 %v1427_v28, %v1426_v50  ;;  %v4835_v50 = vld [vmem:[#allocation57_spill] sm:$0xff] }
 0x4be   :  { %v1480_v49 = vadd.f32 %v1477_v8, %v4260_v32  ;;  %2727 = vmatmul.msk.bf16.vlgmr.msra.gmra.mxu1 %vm706_vm2, %v1575_v45  ;;  %2739 = vmatmul.msk.bf16.vlgmr.msrb.gmra.mxu2 %vm706_vm2, %v1735_v12 }
 0x4bf   :  { %v1422_v14 = vpop.f32.mrf.mxu0 }
 0x4c0   :  { %v4441_v33 = vmul.f32 0.5, %v1480_v49  ;;  %v1423_v0 = vadd.f32 %v1422_v14, %v4302_v6 }
 0x4c2   :  { %v1633_v18 = vpack.c.bf16 %v4441_v33, %v4439_v61  ;;  %v1428_v34 = vadd.f32 %v1423_v0, %v4444_v51 }
 0x4c4   :  { %2729 = vmatmul.msk.bf16.vlgmr.msra.gmra.mxu0 %vm706_vm2, %v1633_v18  ;;  %2731 = vmatmul.msk.bf16.vlgmr.msrb.gmra.mxu3 %vm706_vm2, %v1633_v18  ;;  %v1478_v32 = vmax.f32 %v1428_v34, 0.0  ;;  %v1576_v10 = vpack.c.bf16 %v1428_v34, %v1428_v34 }
 0x4c5   :  { %1894 = vmatpush.bf16.msra.mxu0 %v4088_v11 }
 0x4c6   :  { %v1481_v39 = vadd.f32 %v1478_v32, %v4283_v23 }
 0x4c7   :  { %v1424_v41 = vpop.f32.mrf.mxu0 }
 0x4c8   :  { %v4456_v6 = vmul.f32 0.5, %v1481_v39 }
 0x4c9   :  { %1895 = vmatpush.bf16.msra.mxu0 %v4106_v30  ;;  %v1467_v30 = vadd.f32 %v1462_v5, %v4013_v43  ;;  %v1464_v43 = vmax.f32 %v4384_v13, 0.0 }
 0x4ca   :  { %v1634_v11 = vpack.c.bf16 %v4456_v6, %v4456_v6 }
 0x4cb   :  { %v4470_v16 = vmul.f32 0.5, %v1467_v30  ;;  %v1469_v24 = vadd.f32 %v1464_v43, %v4061_v42  ;;  %v4836_v42 = vld [vmem:[#allocation58_spill] sm:$0xff] }
 0x4cd   :  { %1896 = vmatpush.bf16.msra.mxu0 %v4124_v47  ;;  %v1466_v47 = vadd.f32 %v1461_v29, %v4011_v19  ;;  %v1468_v19 = vadd.f32 %v1463_v21, %v4059_v25  ;;  %v4488_v9 = vmul.f32 0.5, %v1469_v24  ;;  %v4837_v25 = vld [vmem:[#allocation59_spill] sm:$0xff]  ;;  %v4529_v29 = vld [vmem:[%s4790_s4] sm:$0xff] }
 0x4ce   :  { %2728 = vmatmul.msk.bf16.gmra.mxu1 %vm706_vm2, %v1576_v10  ;;  %v4839_v10 = vld [vmem:[#allocation61_spill] sm:$0xff] }
 0x4cf   :  { %v4472_v26 = vmul.f32 0.5, %v1466_v47  ;;  %v4491_v36 = vmul.f32 0.5, %v1468_v19 }
 0x4d1   :  { %1897 = vmatpush.bf16.msra.mxu0 %v4151_v15  ;;  %v1677_v15 = vpack.c.bf16 %v4470_v16, %v4472_v26  ;;  %v1678_v53 = vpack.c.bf16 %v4488_v9, %v4491_v36 }
 0x4d4   :  { %2730 = vmatmul.msk.bf16.gmra.mxu0 %vm706_vm2, %v1634_v11  ;;  %2732 = vmatmul.msk.bf16.gmra.mxu3 %vm706_vm2, %v1634_v11  ;;  %v4840_v11 = vld [vmem:[#allocation62_spill] sm:$0xff] }
 0x4d7   :  { %v4468_v23 = vpop.f32.mrf.mxu2 }
 0x4de   :  { %2733 = vmatmul.msk.bf16.vlgmr.msrb.gmra.mxu1 %vm706_vm2, %v1677_v15 }
 0x4df   :  { %v4477_v46 = vpop.f32.mrf.mxu2 }
 0x4e4   :  { %2736 = vmatmul.msk.bf16.vlgmr.msrb.gmra.mxu0 %vm706_vm2, %v1677_v15  ;;  %2740 = vmatmul.msk.bf16.vlgmr.msra.gmra.mxu3 %vm706_vm2, %v1735_v12 }
 0x4e5   :  { %1992 = vmatpush.bf16.msrb.mxu0 %v4138_v3  ;;  %v1465_v3 = vmax.f32 %v4397_v56, 0.0 }
 0x4e7   :  { %v4486_v1 = vpop.f32.mrf.mxu2  ;;  %v1470_v44 = vadd.f32 %v1465_v3, %v4838_v63 }
 0x4e9   :  { %1993 = vmatpush.bf16.msrb.mxu0 %v4835_v50  ;;  %v4505_v54 = vmul.f32 0.5, %v1470_v44  ;;  %v4542_v50 = vld [vmem:[%s4790_s4 + $0x8] sm:$0xff] }
 0x4eb   :  { %v1679_v37 = vpack.c.bf16 %v4505_v54, %v4505_v54 }
 0x4ed   :  { %1994 = vmatpush.bf16.msrb.mxu0 %v4836_v42 }
 0x4ee   :  { %2734 = vmatmul.msk.bf16.gmra.mxu1 %vm706_vm2, %v1678_v53 }
 0x4ef   :  { %v4497_v13 = vpop.f32.mrf.mxu2 }
 0x4f1   :  { %1995 = vmatpush.bf16.msrb.mxu0 %v4837_v25 }
 0x4f4   :  { %2737 = vmatmul.msk.bf16.gmra.mxu0 %vm706_vm2, %v1678_v53 }
 0x4f7   :  { %v4503_v38 = vpop.f32.mrf.mxu2 }
 0x4fe   :  { %2735 = vmatmul.msk.bf16.gmra.mxu1 %vm706_vm2, %v1679_v37 }
 0x4ff   :  { %v1555_v7 = vpop.f32.mrf.mxu2 }
 0x504   :  { %2738 = vmatmul.msk.bf16.gmra.mxu0 %vm706_vm2, %v1679_v37 }
 0x53b   :  { %v4511_v4 = vpop.f32.mrf.mxu1 }
 0x541   :  { %v1650_v56 = vpop.f32.mrf.mxu0  ;;  %v1748_v28 = vpop.f32.mrf.mxu2 }
 0x542   :  { %1796 = vrot.lane.b32.xlu0 %v1748_v28, %s4771_s17 }
 0x543   :  { %v4514_v52 = vpop.f32.mrf.mxu1 }
 0x547   :  { %v4516_v12 = vpop.f32.mrf.mxu3 }
 0x549   :  { %v1652_v8 = vpop.f32.mrf.mxu0  ;;  %v1750_v45 = vpop.f32.mrf.mxu2 }
 0x54a   :  { %v1765_v32 = vpack.c.bf16 %v1652_v8, %v1650_v56  ;;  %v4841_v45 = vld [vmem:[#allocation53_spill] sm:$0xff] }
 0x54b   :  { %v4518_v49 = vpop.f32.mrf.mxu1 }
 0x54f   :  { %v4520_v14 = vpop.f32.mrf.mxu3 }
 0x551   :  { %v1655_v57 = vpop.f32.mrf.mxu0 }
 0x552   :  { %v1766_v0 = vpack.c.bf16 %v1748_v28, %v1655_v57  ;;  %v1824_v18 = vpack.c.bf16 %v1655_v57, %v1652_v8  ;;  %v4551_v57 = vld [vmem:[#allocation4] sm:$0xff] }
 0x553   :  { %v1625_v34 = vpop.f32.mrf.mxu1 }
 0x554   :  { %1835 = vrot.lane.b32.xlu1 %v1824_v18, %s4771_s17  ;;  %1773 = vmatpush.bf16.msra.mxu2 %v1766_v0  ;;  %v4842_v0 = vld [vmem:[#allocation54_spill] sm:$0xff]  ;;  %v4843_v18 = vld [vmem:[#allocation55_spill] sm:$0xff]  ;;  %v4844_v34 = vld [vmem:[#allocation56_spill] sm:$0xff] }
 0x557   :  { %v4523_v41 = vpop.f32.mrf.mxu3 }
 0x558   :  { %1774 = vmatpush.bf16.msra.mxu2 %v1765_v32 }
 0x559   :  { %v1657_v39 = vpop.f32.mrf.mxu0 }
 0x55b   :  { %v1698_v5 = vpop.f32.mrf.mxu1  ;;  %2741 = vmatmul.msk.bf16.vlgmr.msra.gmra.mxu2 %vm950_vm3, %v4529_v29 }
 0x55c   :  { %1965 = vmatpush.bf16.msrb.mxu2 %v4839_v10 }
 0x55f   :  { %v1675_v30 = vpop.f32.mrf.mxu3 }
 0x560   :  { %1966 = vmatpush.bf16.msrb.mxu2 %v4840_v11 }
 0x561   :  { %v1721_v47 = vpop.f32.mrf.mxu0 }
 0x563   :  { %v1700_v15 = vpop.f32.mrf.mxu1 }
 0x564   :  { %1967 = vmatpush.bf16.msrb.mxu2 %v4238_v20  ;;  %v1799_v43 = vpack.c.bf16 %v1700_v15, %v1698_v5  ;;  %v4845_v5 = vld [vmem:[#allocation47_spill] sm:$0xff] }
 0x566   :  { %1829 = vrot.lane.b32.xlu1 %v1799_v43, %s4771_s17 }
 0x567   :  { %v4537_v21 = vpop.f32.mrf.mxu3 }
 0x568   :  { %1968 = vmatpush.bf16.msrb.mxu2 %v4255_v60 }
 0x569   :  { %v1723_v24 = vpop.f32.mrf.mxu0 }
 0x56b   :  { %v1703_v19 = vpop.f32.mrf.mxu1  ;;  %2742 = vmatmul.msk.bf16.gmra.mxu2 %vm950_vm3, %v4542_v50 }
 0x56f   :  { %v1763_v53 = vpop.f32.mrf.mxu3 }
 0x570   :  { %v4846_v53 = vld [vmem:[#allocation48_spill] sm:$0xff] }
 0x571   :  { %v1726_v20 = vpop.f32.mrf.mxu0 }
 0x573   :  { %v1705_v42 = vpop.f32.mrf.mxu1 }
 0x574   :  { %v1800_v3 = vpack.c.bf16 %v1705_v42, %v1703_v19 }
 0x576   :  { %1831 = vrot.lane.b32.xlu0 %v1800_v3, %s4771_s17 }
 0x579   :  { %v1728_v60 = vpop.f32.mrf.mxu0 }
 0x57b   :  { %v1708_v25 = vpop.f32.mrf.mxu1  ;;  %2743 = vmatmul.msk.bf16.gmra.mxu2 %vm950_vm3, %v3887_v40 }
 0x57c   :  { %v1823_v63 = vpack.c.bf16 %v1650_v56, %v1708_v25 }
 0x57e   :  { %1833 = vrot.lane.b32.xlu2 %v1823_v63, %s4771_s17 }
 0x581   :  { %v1731_v44 = vpop.f32.mrf.mxu0 }
 0x583   :  { %v1710_v37 = vpop.f32.mrf.mxu1 }
 0x589   :  { %v1733_v7 = vpop.f32.mrf.mxu0 }
 0x5b4   :  { %v1797_v28 = vpop.permute.xlu0 %1796 }
 0x5b5   :  { %v1801_v8 = vpack.c.bf16 %v1797_v28, %v1708_v25  ;;  %v4847_v28 = vld [vmem:[#allocation38_spill] sm:$0xff] }
 0x5b7   :  { %1807 = vmatpush.bf16.msrb.mxu3 %v1801_v8 }
 0x5bb   :  { %1808 = vmatpush.bf16.msrb.mxu3 %v1800_v3 }
 0x5bf   :  { %1809 = vmatpush.bf16.msrb.mxu3 %v1799_v43 }
 0x5c2   :  { %2744 = vmatmul.msk.bf16.vlgmr.msrb.gmra.mxu3 %vm280_vm0, %v4551_v57 }
 0x5c3   :  { %1912 = vmatpush.bf16.msra.mxu3 %v4841_v45 }
 0x5c6   :  { %v1836_v56 = vpop.permute.xlu1 %1835 }
 0x5c7   :  { %1913 = vmatpush.bf16.msra.mxu3 %v4842_v0  ;;  %1845 = vmatpush.bf16.msra.mxu1 %v1836_v56  ;;  %v2994_v0 = vld [vmem:[#allocation6] sm:$0xf] }
 0x5c8   :  { %v4848_v56 = vld [vmem:[#allocation40_spill] sm:$0xff] }
 0x5cb   :  { %1914 = vmatpush.bf16.msra.mxu3 %v4843_v18  ;;  %v4849_v18 = vld [vmem:[#allocation49_spill] sm:$0xff] }
 0x5cf   :  { %1915 = vmatpush.bf16.msra.mxu3 %v4844_v34 }
 0x5d2   :  { %2745 = vmatmul.msk.bf16.gmra.mxu3 %vm280_vm0, %v4824_v62 }
 0x5d8   :  { %v1834_v32 = vpop.permute.xlu2 %1833  ;;  %v1830_v63 = vpop.permute.xlu1 %1829 }
 0x5d9   :  { %1846 = vmatpush.bf16.msra.mxu1 %v1834_v32  ;;  %v4850_v32 = vld [vmem:[#allocation42_spill] sm:$0xff] }
 0x5de   :  { %v1776_v39 = vpop.f32.mrf.mxu2 }
 0x5df   :  { %v1777_v10 = vadd.f32 %v1776_v39, %v1721_v47 }
 0x5e1   :  { %v1790_v11 = vadd.f32 %v1777_v10, %v4845_v5  ;;  %v4851_v10 = vld [vmem:[#allocation50_spill] sm:$0xff] }
 0x5e3   :  { %v1855_v15 = vmax.f32 %v1790_v11, 0.0  ;;  %v4852_v11 = vld [vmem:[#allocation43_spill] sm:$0xff] }
 0x5e5   :  { %v1860_v3 = vadd.f32 %v1855_v15, %v4472_v26 }
 0x5e6   :  { %v1778_v30 = vpop.f32.mrf.mxu2 }
 0x5e7   :  { %v1779_v43 = vadd.f32 %v1778_v30, %v1723_v24  ;;  %v1865_v47 = vmul.f32 0.5, %v1860_v3  ;;  %v4853_v3 = vld [vmem:[#allocation51_spill] sm:$0xff] }
 0x5e8   :  { %v1832_v19 = vpop.permute.xlu0 %1831 }
 0x5e9   :  { %v1791_v42 = vadd.f32 %v1779_v43, %v4846_v53  ;;  %1847 = vmatpush.bf16.msra.mxu1 %v1832_v19 }
 0x5eb   :  { %v1856_v25 = vmax.f32 %v1791_v42, 0.0 }
 0x5ed   :  { %v1861_v37 = vadd.f32 %v1856_v25, %v4470_v16  ;;  %1848 = vmatpush.bf16.msra.mxu1 %v1830_v63 }
 0x5ee   :  { %v1781_v7 = vpop.f32.mrf.mxu2 }
 0x5ef   :  { %v1866_v8 = vmul.f32 0.5, %v1861_v37  ;;  %v1782_v45 = vadd.f32 %v1781_v7, %v1726_v20 }
 0x5f0   :  { %2746 = vmatmul.msk.bf16.vlgmr.msra.gmra.mxu1 %vm706_vm2, %v2994_v0 }
 0x5f1   :  { %1942 = vmatpush.bf16.msrb.mxu1 %v4847_v28  ;;  %v1926_v24 = vpack.c.bf16 %v1866_v8, %v1865_v47  ;;  %v1792_v34 = vadd.f32 %v1782_v45, %v4849_v18  ;;  %v4854_v47 = vld [vmem:[#allocation60_spill] sm:$0xff] }
 0x5f3   :  { %2754 = vmatmul.msk.bf16.vlgmr.msrb.gmra.mxu2 %vm706_vm2, %v1926_v24  ;;  %v1857_v16 = vmax.f32 %v1792_v34, 0.0 }
 0x5f5   :  { %1943 = vmatpush.bf16.msrb.mxu1 %v4848_v56  ;;  %v1862_v20 = vadd.f32 %v1857_v16, %v4491_v36  ;;  %v4855_v56 = vld [vmem:[#allocation63_spill] sm:$0xff] }
 0x5f6   :  { %v1783_v26 = vpop.f32.mrf.mxu2 }
 0x5f7   :  { %v1784_v39 = vadd.f32 %v1783_v26, %v1728_v60  ;;  %v1867_v19 = vmul.f32 0.5, %v1862_v20 }
 0x5f9   :  { %1944 = vmatpush.bf16.msrb.mxu1 %v4850_v32  ;;  %v1793_v5 = vadd.f32 %v1784_v39, %v4851_v10 }
 0x5fb   :  { %v1858_v30 = vmax.f32 %v1793_v5, 0.0 }
 0x5fd   :  { %1945 = vmatpush.bf16.msrb.mxu1 %v4852_v11  ;;  %v1863_v15 = vadd.f32 %v1858_v30, %v4488_v9 }
 0x5fe   :  { %v1786_v43 = vpop.f32.mrf.mxu2 }
 0x5ff   :  { %v1868_v53 = vmul.f32 0.5, %v1863_v15  ;;  %v1787_v42 = vadd.f32 %v1786_v43, %v1731_v44 }
 0x600   :  { %2751 = vmatmul.msk.bf16.vlgmr.msrb.gmra.mxu1 %vm706_vm2, %v1926_v24 }
 0x601   :  { %v1794_v25 = vadd.f32 %v1787_v42, %v4853_v3  ;;  %v1927_v63 = vpack.c.bf16 %v1868_v53, %v1867_v19 }
 0x603   :  { %2755 = vmatmul.msk.bf16.gmra.mxu2 %vm706_vm2, %v1927_v63  ;;  %v1859_v60 = vmax.f32 %v1794_v25, 0.0 }
 0x605   :  { %v1864_v7 = vadd.f32 %v1859_v60, %v4505_v54 }
 0x606   :  { %v1788_v37 = vpop.f32.mrf.mxu2 }
 0x607   :  { %v1869_v28 = vmul.f32 0.5, %v1864_v7 }
 0x609   :  { %v1928_v36 = vpack.c.bf16 %v1869_v28, %v1869_v28 }
 0x610   :  { %2752 = vmatmul.msk.bf16.gmra.mxu1 %vm706_vm2, %v1927_v63 }
 0x613   :  { %2756 = vmatmul.msk.bf16.gmra.mxu2 %vm706_vm2, %v1928_v36 }
 0x620   :  { %2753 = vmatmul.msk.bf16.gmra.mxu1 %vm706_vm2, %v1928_v36 }
 0x645   :  { %v1811_v9 = vpop.f32.mrf.mxu3 }
 0x646   :  { %v1812_v44 = vadd.f32 %v1811_v9, %v4516_v12 }
 0x648   :  { %v1820_v8 = vadd.f32 %v1812_v44, %v4854_v47 }
 0x64a   :  { %v1870_v0 = vmax.f32 %v1820_v8, 0.0 }
 0x64c   :  { %v1873_v54 = vadd.f32 %v1870_v0, %v4439_v61 }
 0x64d   :  { %v1813_v45 = vpop.f32.mrf.mxu3 }
 0x64e   :  { %v1814_v24 = vadd.f32 %v1813_v45, %v4520_v14  ;;  %v1876_v16 = vmul.f32 0.5, %v1873_v54 }
 0x650   :  { %v1821_v18 = vadd.f32 %v1814_v24, %v4855_v56 }
 0x652   :  { %v1871_v34 = vmax.f32 %v1821_v18, 0.0 }
 0x654   :  { %v1874_v26 = vadd.f32 %v1871_v34, %v4441_v33 }
 0x655   :  { %v1816_v32 = vpop.f32.mrf.mxu3 }
 0x656   :  { %v1877_v39 = vmul.f32 0.5, %v1874_v26  ;;  %v1817_v10 = vadd.f32 %v1816_v32, %v4523_v41 }
 0x658   :  { %v1882_v5 = vpack.c.bf16 %v1877_v39, %v1876_v16  ;;  %v1822_v12 = vadd.f32 %v1817_v10, %v4263_v27 }
 0x65a   :  { %2747 = vmatmul.msk.bf16.vlgmr.msra.gmra.mxu0 %vm706_vm2, %v1882_v5  ;;  %2749 = vmatmul.msk.bf16.vlgmr.msra.gmra.mxu3 %vm706_vm2, %v1882_v5  ;;  %v1872_v14 = vmax.f32 %v1822_v12, 0.0  ;;  %v2924_v5 = vld [vmem:[%s4706_s14 + $0x38] sm:$0xff] }
 0x65b   :  { %2110 = vmatpush.bf16.msra.mxu1 %v2924_v5 }
 0x65c   :  { %v1875_v20 = vadd.f32 %v1872_v14, %v4456_v6 }
 0x65d   :  { %v1818_v11 = vpop.f32.mrf.mxu3 }
 0x65e   :  { %v1878_v61 = vmul.f32 0.5, %v1875_v20 }
 0x660   :  { %v1883_v30 = vpack.c.bf16 %v1878_v61, %v1878_v61 }
 0x66a   :  { %2748 = vmatmul.msk.bf16.gmra.mxu0 %vm706_vm2, %v1883_v30  ;;  %2750 = vmatmul.msk.bf16.gmra.mxu3 %vm706_vm2, %v1883_v30 }
 0x66d   :  { %v1850_v33 = vpop.f32.mrf.mxu1 }
 0x66e   :  { %v1851_v41 = vadd.f32 %v1850_v33, %v4537_v21 }
 0x670   :  { %v1854_v15 = vadd.f32 %v1851_v41, %v4271_v35 }
 0x672   :  { %v1879_v27 = vmax.f32 %v1854_v15, 0.0 }
 0x674   :  { %v1880_v43 = vadd.f32 %v1879_v27, %v4430_v48 }
 0x675   :  { %v1852_v19 = vpop.f32.mrf.mxu1 }
 0x676   :  { %v1881_v53 = vmul.f32 0.5, %v1880_v43  ;;  %v1970_v42 = vpop.f32.mrf.mxu2 }
 0x678   :  { %v1984_v3 = vpack.c.bf16 %v1881_v53, %v1881_v53 }
 0x67a   :  { %2757 = vmatmul.msk.bf16.vlgmr.msrb.gmra.mxu0 %vm706_vm2, %v1984_v3 }
 0x67d   :  { %v1947_v6 = vpop.f32.mrf.mxu1 }
 0x67e   :  { %v1972_v25 = vpop.f32.mrf.mxu2 }
 0x685   :  { %v1949_v63 = vpop.f32.mrf.mxu1 }
 0x686   :  { %v2035_v60 = vpack.c.bf16 %v1949_v63, %v1947_v6  ;;  %v1975_v37 = vpop.f32.mrf.mxu2  ;;  %v2928_v6 = vld [vmem:[%s4710_s18 + $0x38] sm:$0xff] }
 0x687   :  { %2186 = vmatpush.bf16.msra.mxu2 %v2928_v6 }
 0x68d   :  { %v1952_v7 = vpop.f32.mrf.mxu1 }
 0x68e   :  { %v1977_v28 = vpop.f32.mrf.mxu2 }
 0x695   :  { %v1954_v36 = vpop.f32.mrf.mxu1 }
 0x696   :  { %v2036_v21 = vpack.c.bf16 %v1954_v36, %v1952_v7  ;;  %v1980_v9 = vpop.f32.mrf.mxu2 }
 0x69d   :  { %v1957_v35 = vpop.f32.mrf.mxu1 }
 0x69e   :  { %v1982_v44 = vpop.f32.mrf.mxu2 }
 0x69f   :  { %v2931_v44 = vld [vmem:[#allocation12 + $0x10] sm:$0xff] }
 0x6a5   :  { %v1959_v47 = vpop.f32.mrf.mxu1 }
 0x6d7   :  { %v1899_v48 = vpop.f32.mrf.mxu0 }
 0x6dd   :  { %v4598_v8 = vpop.f32.mrf.mxu3 }
 0x6df   :  { %v1901_v45 = vpop.f32.mrf.mxu0 }
 0x6e0   :  { %v2001_v32 = vpack.c.bf16 %v1901_v45, %v1899_v48 }
 0x6e5   :  { %v4600_v0 = vpop.f32.mrf.mxu3 }
 0x6e7   :  { %v1904_v24 = vpop.f32.mrf.mxu0 }
 0x6ed   :  { %v4602_v56 = vpop.f32.mrf.mxu3 }
 0x6ef   :  { %v1906_v18 = vpop.f32.mrf.mxu0 }
 0x6f5   :  { %v1924_v54 = vpop.f32.mrf.mxu3 }
 0x6f7   :  { %v1997_v34 = vpop.f32.mrf.mxu0 }
 0x6f8   :  { %v2002_v26 = vpack.c.bf16 %v1997_v34, %v1904_v24  ;;  %2032 = vrot.lane.b32.xlu2 %v1997_v34, %s4771_s17  ;;  %v2985_v24 = vld [vmem:[#allocation10] ss:$0 sm:$0xff] }
 0x6f9   :  { %v1544_v54 = vadd.f32 %v2985_v24, %v4468_v23 }
 0x6fa   :  { %2009 = vmatpush.bf16.msrb.mxu3 %v2002_v26 }
 0x6fe   :  { %2010 = vmatpush.bf16.msrb.mxu3 %v2001_v32 }
 0x6ff   :  { %v1999_v16 = vpop.f32.mrf.mxu0 }
 0x701   :  { %2758 = vmatmul.msk.bf16.vlgmr.msrb.gmra.mxu3 %vm950_vm3, %v4529_v29  ;;  %v2923_v29 = vld [vmem:[%s4706_s14 + $0x30] sm:$0xff] }
 0x702   :  { %2111 = vmatpush.bf16.msra.mxu1 %v2923_v29 }
 0x711   :  { %2759 = vmatmul.msk.bf16.gmra.mxu3 %vm950_vm3, %v4542_v50  ;;  %v2921_v50 = vld [vmem:[%s4706_s14 + $0x20] sm:$0xff] }
 0x721   :  { %2760 = vmatmul.msk.bf16.gmra.mxu3 %vm950_vm3, %v3887_v40  ;;  %v2922_v40 = vld [vmem:[%s4706_s14 + $0x28] sm:$0xff] }
 0x722   :  { %2112 = vmatpush.bf16.msra.mxu1 %v2922_v40 }
 0x726   :  { %2113 = vmatpush.bf16.msra.mxu1 %v2921_v50 }
 0x752   :  { %v2033_v39 = vpop.permute.xlu2 %2032 }
 0x753   :  { %v2037_v10 = vpack.c.bf16 %v2033_v39, %v1957_v35 }
 0x755   :  { %2043 = vmatpush.bf16.msra.mxu0 %v2037_v10 }
 0x759   :  { %2044 = vmatpush.bf16.msra.mxu0 %v2036_v21 }
 0x75d   :  { %2045 = vmatpush.bf16.msra.mxu0 %v2035_v60 }
 0x760   :  { %2761 = vmatmul.msk.bf16.vlgmr.msra.gmra.mxu0 %vm280_vm0, %v4551_v57 }
 0x770   :  { %2762 = vmatmul.msk.bf16.gmra.mxu0 %vm280_vm0, %v4824_v62 }
 0x784   :  { %v2012_v57 = vpop.f32.mrf.mxu3 }
 0x785   :  { %v2013_v12 = vadd.f32 %v2012_v57, %v1970_v42  ;;  %v1549_v57 = vadd.f32 %v2985_v24, %v4486_v1 }
 0x787   :  { %v2026_v20 = vadd.f32 %v2013_v12, %v4357_v2  ;;  %v1551_v12 = vadd.f32 %v2985_v24, %v4497_v13 }
 0x78c   :  { %v2014_v14 = vpop.f32.mrf.mxu3 }
 0x78d   :  { %v2015_v11 = vadd.f32 %v2014_v14, %v1972_v25 }
 0x78f   :  { %v2027_v61 = vadd.f32 %v2015_v11, %v4360_v59  ;;  %v1559_v11 = vmax.f32 %v1549_v57, 0.0 }
 0x791   :  { %v2068_v30 = vpack.c.bf16 %v2027_v61, %v2026_v20  ;;  %v1560_v20 = vmax.f32 %v1551_v12, 0.0 }
 0x793   :  { %2787 = vmatmul.msk.bf16.vlgmr.msra.gmra.mxu1 %vm706_vm2, %v2068_v30 }
 0x794   :  { %v2017_v33 = vpop.f32.mrf.mxu3 }
 0x795   :  { %v2018_v41 = vadd.f32 %v2017_v33, %v1975_v37 }
 0x797   :  { %v2028_v43 = vadd.f32 %v2018_v41, %v4376_v55  ;;  %v2927_v55 = vld [vmem:[%s4710_s18 + $0x30] sm:$0xff] }
 0x798   :  { %2187 = vmatpush.bf16.msra.mxu2 %v2927_v55  ;;  %v2988_v55 = vld [vmem:[#allocation15 + $0x1] ss:$0 sm:$0xff] }
 0x79c   :  { %v2019_v15 = vpop.f32.mrf.mxu3 }
 0x79d   :  { %v2020_v27 = vadd.f32 %v2019_v15, %v1977_v28 }
 0x79f   :  { %v2029_v62 = vadd.f32 %v2020_v27, %v4378_v17  ;;  %v2926_v17 = vld [vmem:[%s4710_s18 + $0x28] sm:$0xff] }
 0x7a0   :  { %2188 = vmatpush.bf16.msra.mxu2 %v2926_v17  ;;  %v2986_v17 = vld [vmem:[#allocation15] ss:$0 sm:$0xff] }
 0x7a1   :  { %v2069_v19 = vpack.c.bf16 %v2029_v62, %v2028_v43  ;;  %v1554_v43 = vadd.f32 %v2985_v24, %v4503_v38  ;;  %v1619_v38 = vadd.f32 %v2986_v17, %v4511_v4 }
 0x7a3   :  { %2788 = vmatmul.msk.bf16.gmra.mxu1 %vm706_vm2, %v2069_v19  ;;  %v1561_v1 = vmax.f32 %v1554_v43, 0.0 }
 0x7a4   :  { %v2022_v53 = vpop.f32.mrf.mxu3 }
 0x7a5   :  { %v2023_v42 = vadd.f32 %v2022_v53, %v1980_v9  ;;  %v2932_v9 = vld [vmem:[#allocation12 + $0x18] sm:$0xff] }
 0x7a6   :  { %2258 = vmatpush.bf16.msrb.mxu0 %v2932_v9 }
 0x7a7   :  { %v2030_v2 = vadd.f32 %v2023_v42, %v4394_v22  ;;  %v2925_v22 = vld [vmem:[%s4710_s18 + $0x20] sm:$0xff] }
 0x7a8   :  { %2189 = vmatpush.bf16.msra.mxu2 %v2925_v22  ;;  %v2936_v42 = vld [vmem:[#allocation16 + $0x18] sm:$0xff] }
 0x7a9   :  { %v2070_v59 = vpack.c.bf16 %v2030_v2, %v2030_v2  ;;  %2335 = vmatpush.bf16.msra.mxu3 %v2936_v42  ;;  %v2934_v2 = vld [vmem:[#allocation16 + $0x8] sm:$0xff] }
 0x7aa   :  { %2259 = vmatpush.bf16.msrb.mxu0 %v2931_v44 }
 0x7ac   :  { %v2024_v3 = vpop.f32.mrf.mxu3 }
 0x7ad   :  { %v2935_v3 = vld [vmem:[#allocation16 + $0x10] sm:$0xff] }
 0x7ae   :  { %2336 = vmatpush.bf16.msra.mxu3 %v2935_v3 }
 0x7b2   :  { %2337 = vmatpush.bf16.msra.mxu3 %v2934_v2 }
 0x7b3   :  { %2789 = vmatmul.msk.bf16.gmra.mxu1 %vm706_vm2, %v2070_v59  ;;  %v2933_v59 = vld [vmem:[#allocation16] sm:$0xff] }
 0x7b6   :  { %2338 = vmatpush.bf16.msra.mxu3 %v2933_v59 }
 0x7dd   :  { %v2047_v25 = vpop.f32.mrf.mxu0 }
 0x7de   :  { %v2048_v63 = vadd.f32 %v2047_v25, %v4598_v8  ;;  %v2930_v8 = vld [vmem:[#allocation12 + $0x8] sm:$0xff]  ;;  %v1621_v25 = vadd.f32 %v2986_v17, %v4514_v52 }
 0x7df   :  { %2260 = vmatpush.bf16.msrb.mxu0 %v2930_v8 }
 0x7e0   :  { %v2056_v7 = vadd.f32 %v2048_v63, %v4420_v31  ;;  %v2929_v31 = vld [vmem:[#allocation12] sm:$0xff] }
 0x7e3   :  { %2261 = vmatpush.bf16.msrb.mxu0 %v2929_v31 }
 0x7e5   :  { %v2049_v60 = vpop.f32.mrf.mxu0 }
 0x7e6   :  { %v2050_v37 = vadd.f32 %v2049_v60, %v4600_v0  ;;  %v2987_v0 = vld [vmem:[#allocation10 + $0x1] ss:$0 sm:$0xff] }
 0x7e8   :  { %v2057_v28 = vadd.f32 %v2050_v37, %v4427_v58 }
 0x7ea   :  { %v2148_v36 = vpack.c.bf16 %v2057_v28, %v2056_v7  ;;  %v1627_v7 = vmax.f32 %v1619_v38, 0.0  ;;  %v1628_v28 = vmax.f32 %v1621_v25, 0.0 }
 0x7ec   :  { %2814 = vmatmul.msk.bf16.vlgmr.msra.gmra.mxu2 %vm706_vm2, %v2148_v36 }
 0x7ed   :  { %v2052_v21 = vpop.f32.mrf.mxu0 }
 0x7ee   :  { %v2053_v35 = vadd.f32 %v2052_v21, %v4602_v56  ;;  %v1546_v56 = vadd.f32 %v2985_v24, %v4477_v46 }
 0x7f0   :  { %v2058_v48 = vadd.f32 %v2053_v35, %v4444_v51  ;;  %v1557_v51 = vmax.f32 %v1544_v54, 0.0  ;;  %v1558_v16 = vmax.f32 %v1546_v56, 0.0 }
 0x7f2   :  { %v2149_v45 = vpack.c.bf16 %v2058_v48, %v2058_v48  ;;  %v1624_v48 = vadd.f32 %v2986_v17, %v4518_v49 }
 0x7f4   :  { %v1629_v4 = vmax.f32 %v1624_v48, 0.0 }
 0x7f5   :  { %v2054_v47 = vpop.f32.mrf.mxu0 }
 0x7fc   :  { %2815 = vmatmul.msk.bf16.gmra.mxu2 %vm706_vm2, %v2149_v45 }
 0x810   :  { %v2115_v58 = vpop.f32.mrf.mxu1 }
 0x811   :  { %v2116_v18 = vadd.f32 %v2987_v0, %v2115_v58  ;;  %v2989_v58 = vld [vmem:[#allocation13] ss:$0 sm:$0xff] }
 0x813   :  { %v2129_v26 = vmax.f32 %v2116_v18, 0.0 }
 0x815   :  { %v2134_v10 = vadd.f32 %v2129_v26, %v1557_v51 }
 0x818   :  { %v2117_v34 = vpop.f32.mrf.mxu1 }
 0x819   :  { %v2118_v32 = vadd.f32 %v2987_v0, %v2117_v34 }
 0x81b   :  { %v2130_v39 = vmax.f32 %v2118_v32, 0.0 }
 0x81d   :  { %v2135_v5 = vadd.f32 %v2130_v39, %v1558_v16 }
 0x81f   :  { %v2214_v29 = vpack.c.bf16 %v2135_v5, %v2134_v10 }
 0x820   :  { %v2120_v40 = vpop.f32.mrf.mxu1 }
 0x821   :  { %2832 = vmatmul.msk.bf16.vlgmr.msrb.gmra.mxu0 %vm706_vm2, %v2214_v29  ;;  %v2121_v50 = vadd.f32 %v2987_v0, %v2120_v40 }
 0x823   :  { %v2131_v14 = vmax.f32 %v2121_v50, 0.0  ;;  %v2990_v50 = vld [vmem:[#allocation18] ss:$0 sm:$0xff] }
 0x825   :  { %v2136_v30 = vadd.f32 %v2131_v14, %v1559_v11 }
 0x828   :  { %v2122_v23 = vpop.f32.mrf.mxu1 }
 0x829   :  { %v2123_v46 = vadd.f32 %v2987_v0, %v2122_v23 }
 0x82b   :  { %v2132_v61 = vmax.f32 %v2123_v46, 0.0 }
 0x82d   :  { %v2137_v33 = vadd.f32 %v2132_v61, %v1560_v20 }
 0x82f   :  { %v2215_v41 = vpack.c.bf16 %v2137_v33, %v2136_v30 }
 0x830   :  { %v2125_v15 = vpop.f32.mrf.mxu1 }
 0x831   :  { %2833 = vmatmul.msk.bf16.gmra.mxu0 %vm706_vm2, %v2215_v41  ;;  %v2126_v27 = vadd.f32 %v2987_v0, %v2125_v15 }
 0x833   :  { %v2133_v62 = vmax.f32 %v2126_v27, 0.0 }
 0x835   :  { %v2138_v53 = vadd.f32 %v2133_v62, %v1561_v1 }
 0x837   :  { %v2216_v13 = vpack.c.bf16 %v2138_v53, %v2138_v53 }
 0x838   :  { %v2127_v19 = vpop.f32.mrf.mxu1 }
 0x841   :  { %2834 = vmatmul.msk.bf16.gmra.mxu0 %vm706_vm2, %v2216_v13 }
 0x86f   :  { %v2191_v6 = vpop.f32.mrf.mxu2 }
 0x870   :  { %v2192_v22 = vadd.f32 %v2988_v55, %v2191_v6 }
 0x872   :  { %v2200_v60 = vmax.f32 %v2192_v22, 0.0 }
 0x874   :  { %v2203_v21 = vadd.f32 %v2200_v60, %v1627_v7 }
 0x877   :  { %v2193_v63 = vpop.f32.mrf.mxu2 }
 0x878   :  { %v2194_v37 = vadd.f32 %v2988_v55, %v2193_v63 }
 0x87a   :  { %v2201_v36 = vmax.f32 %v2194_v37, 0.0 }
 0x87c   :  { %v2204_v9 = vadd.f32 %v2201_v36, %v1628_v28 }
 0x87e   :  { %v2295_v35 = vpack.c.bf16 %v2204_v9, %v2203_v21 }
 0x87f   :  { %v2196_v44 = vpop.f32.mrf.mxu2 }
 0x880   :  { %2851 = vmatmul.msk.bf16.vlgmr.msra.gmra.mxu3 %vm706_vm2, %v2295_v35  ;;  %v2197_v47 = vadd.f32 %v2988_v55, %v2196_v44 }
 0x882   :  { %v2202_v8 = vmax.f32 %v2197_v47, 0.0 }
 0x884   :  { %v2205_v31 = vadd.f32 %v2202_v8, %v1629_v4 }
 0x886   :  { %v2296_v52 = vpack.c.bf16 %v2205_v31, %v2205_v31 }
 0x887   :  { %v2198_v45 = vpop.f32.mrf.mxu2 }
 0x890   :  { %2852 = vmatmul.msk.bf16.gmra.mxu3 %vm706_vm2, %v2296_v52 }
 0x89e   :  { %v2263_v0 = vpop.f32.mrf.mxu0 }
 0x89f   :  { %v2264_v24 = vadd.f32 %v2989_v58, %v2263_v0 }
 0x8a1   :  { %v2277_v18 = vmax.f32 %v2264_v24, 0.0 }
 0x8a3   :  { %2282 = vst [vmem:[%s4714_s22] sm:$0xff] %v2277_v18 }
 0x8a6   :  { %v2265_v54 = vpop.f32.mrf.mxu0 }
 0x8a7   :  { %v2266_v56 = vadd.f32 %v2989_v58, %v2265_v54 }
 0x8a9   :  { %v2278_v34 = vmax.f32 %v2266_v56, 0.0 }
 0x8ab   :  { %2283 = vst [vmem:[%s4714_s22 + $0x8] sm:$0xff] %v2278_v34 }
 0x8ae   :  { %v2268_v49 = vpop.f32.mrf.mxu0 }
 0x8af   :  { %v2269_v26 = vadd.f32 %v2989_v58, %v2268_v49 }
 0x8b1   :  { %v2279_v32 = vmax.f32 %v2269_v26, 0.0 }
 0x8b3   :  { %2284 = vst [vmem:[%s4714_s22 + $0x10] sm:$0xff] %v2279_v32 }
 0x8b6   :  { %v2270_v51 = vpop.f32.mrf.mxu0 }
 0x8b7   :  { %v2271_v16 = vadd.f32 %v2989_v58, %v2270_v51 }
 0x8b9   :  { %v2280_v39 = vmax.f32 %v2271_v16, 0.0 }
 0x8bb   :  { %2285 = vst [vmem:[%s4714_s22 + $0x18] sm:$0xff] %v2280_v39 }
 0x8be   :  { %v2273_v10 = vpop.f32.mrf.mxu0 }
 0x8bf   :  { %v2274_v5 = vadd.f32 %v2989_v58, %v2273_v10 }
 0x8c1   :  { %v2281_v29 = vmax.f32 %v2274_v5, 0.0 }
 0x8c3   :  { %2286 = vst [vmem:[%s4714_s22 + $0x20] sm:$0xff] %v2281_v29 }
 0x8c6   :  { %v2275_v40 = vpop.f32.mrf.mxu0 }
 0x903   :  { %v2340_v57 = vpop.f32.mrf.mxu3 }
 0x904   :  { %v2341_v12 = vadd.f32 %v2990_v50, %v2340_v57 }
 0x906   :  { %2349 = vst [vmem:[%s4856_s16] sm:$0xff] %v2341_v12 }
 0x90b   :  { %v2342_v23 = vpop.f32.mrf.mxu3 }
 0x90c   :  { %v2343_v14 = vadd.f32 %v2990_v50, %v2342_v23 }
 0x90e   :  { %2350 = vst [vmem:[%s4856_s16 + $0x8] sm:$0xff] %v2343_v14 }
 0x913   :  { %v2345_v46 = vpop.f32.mrf.mxu3 }
 0x914   :  { %v2346_v11 = vadd.f32 %v2990_v50, %v2345_v46 }
 0x916   :  { %2351 = vst [vmem:[%s4856_s16 + $0x10] sm:$0xff] %v2346_v11 }
 0x91b   :  { %v2347_v20 = vpop.f32.mrf.mxu3 }
 0x91c   :  { %2360 = vsyncpa [#allocation3], 1 }
 0x91d   :  { %2361 = vsyncpa [#allocation5], 1 }
 0x91e   :  { %2362 = vsyncpa [#allocation8], 1 }
 0x91f   :  { %2363 = vsyncpa [#allocation11], 1 }
 0x920   :  { %2364 = vsyncpa [#allocation14], 1 }
 0x921   :  { %2365 = vsyncpa [#allocation17], 1 }

</bundles_post_ra>
